<compile_context>
chip_gen: v5e
topology: v5e:2x2
jax: 0.10.0
libtpu: 0.0.40
codegen_flags: <defaults>
</compile_context>

<pallas_src>
import functools
import math

import jax
import jax.numpy as jnp
from jax.experimental import pallas as pl
from jax.experimental.pallas import tpu as pltpu

H = 16
W = 16
HW = H * W  # 256


# ------------------------------ fused kernel -------------------------------

def _student_kernel(x_ref, w1_ref, b1_ref, w2_ref, b2_ref,
                    wt_ref, bt_ref, w3_ref, b3_ref, o_ref, *, L):
    """One grid step == B images.  All tensors are (C, L) with L = B*256 lanes,
    lane index q = b*256 + h*16 + w (channel-first, lane-dense)."""
    q = jax.lax.broadcasted_iota(jnp.int32, (1, L), 1)
    h = (q >> 4) & 15            # pixel row within its image
    w = q & 15                   # pixel col within its image

    # Boundary masks + lane shifts for the 9 taps of a "same" 3x3 conv.
    # Valid lanes always read within their own image, so a full-array roll is
    # safe; invalid (zero-padding) lanes are masked to 0.
    tap_masks = []
    tap_shifts = []
    for dh in (-1, 0, 1):
        for dw in (-1, 0, 1):
            hh = h + dh
            ww = w + dw
            tap_masks.append((hh >= 0) & (hh < H) & (ww >= 0) & (ww < W))
            tap_shifts.append(dh * W + dw)

    def conv3x3_relu(x, w_ref, b_ref):
        # x: (cin, L); w_ref: (9, cout, cin); b_ref: (cout, 1) -> (cout, L)
        acc = None
        for t in range(9):
            s = tap_shifts[t]
            xs = x if s == 0 else pltpu.roll(x, shift=(-s) % L, axis=1)
            xs = jnp.where(tap_masks[t], xs, 0.0)
            p = jnp.dot(w_ref[t], xs, preferred_element_type=jnp.float32)
            acc = p if acc is None else acc + p
        return jnp.maximum(acc + b_ref[...], 0.0)

    # ------------------------------ encoder --------------------------------
    x = x_ref[...]                                  # (3, L)
    h1 = conv3x3_relu(x, w1_ref, b1_ref)            # (32, L)
    h2 = conv3x3_relu(h1, w2_ref, b2_ref)           # (64, L)

    # MaxPool2x2, result broadcast back to full resolution: every full-res
    # pixel holds the max of its 2x2 block (exactly what the stride-2 deconv
    # consumes), so no lane compaction / relayout is ever needed.
    w_even = (w & 1) == 0
    h_even = (h & 1) == 0
    a = jnp.maximum(h2, pltpu.roll(h2, shift=L - 1, axis=1))        # pair over w
    m1 = jnp.where(w_even, a, pltpu.roll(a, shift=1, axis=1))
    b = jnp.maximum(m1, pltpu.roll(m1, shift=L - W, axis=1))        # pair over h
    pooled = jnp.where(h_even, b, pltpu.roll(b, shift=W, axis=1))   # (64, L)

    # ------------------------------ decoder --------------------------------
    # ConvTranspose2d(64->64, k=2, s=2): output pixel (2i+a, 2j+d) depends only
    # on pooled(i, j), so run the 4 per-parity matmuls at full resolution and
    # select by output-pixel parity (no pixel interleave / scatter).
    d00 = jnp.dot(wt_ref[0], pooled, preferred_element_type=jnp.float32)
    d01 = jnp.dot(wt_ref[1], pooled, preferred_element_type=jnp.float32)
    d10 = jnp.dot(wt_ref[2], pooled, preferred_element_type=jnp.float32)
    d11 = jnp.dot(wt_ref[3], pooled, preferred_element_type=jnp.float32)
    dec = jnp.where(h_even,
                    jnp.where(w_even, d00, d01),
                    jnp.where(w_even, d10, d11))
    dec = jnp.maximum(dec + bt_ref[...], 0.0)        # (64, L)

    # Conv2d(64 -> 3, k=3, pad=1) + ReLU ; lane-dense (3, L) store.
    o_ref[...] = conv3x3_relu(dec, w3_ref, b3_ref)


# -------------------------------- wrapper -----------------------------------

def student_forward(params, x_nchw, *, block_images=None):
    """Matches StudentModel.forward; accepts/returns NCHW like PyTorch."""
    N = x_nchw.shape[0]
    x = x_nchw.astype(jnp.float32).reshape(N, 3, HW)

    # Images per grid step: amortize launch overhead but keep >= 2 grid steps
    # (when N >= 2) so v7x's two TensorCores both get work.
    B = block_images if block_images is not None else max(1, min(8, pl.cdiv(N, 2)))
    Npad = pl.cdiv(N, B) * B
    if Npad != N:
        x = jnp.concatenate([x, jnp.zeros((Npad - N, 3, HW), jnp.float32)], 0)

    # Channel-major, lane-dense input: (3, Npad*256).
    xk = jnp.transpose(x, (1, 0, 2)).reshape(3, Npad * HW)

    def conv_w(wo):  # PyTorch OIHW -> (9, O, I), tap index t = kh*3 + kw
        o, i = wo.shape[0], wo.shape[1]
        return jnp.transpose(wo, (2, 3, 0, 1)).reshape(9, o, i).astype(jnp.float32)

    w1 = conv_w(params["enc1_w"])
    b1 = params["enc1_b"].reshape(32, 1).astype(jnp.float32)
    w2 = conv_w(params["enc2_w"])
    b2 = params["enc2_b"].reshape(64, 1).astype(jnp.float32)
    # PyTorch ConvTranspose2d weight (Ci, Co, kH, kW) -> (4, Co, Ci), idx a*2+d
    wt = jnp.transpose(params["dec1_w"], (2, 3, 1, 0)).reshape(4, 64, 64).astype(jnp.float32)
    bt = params["dec1_b"].reshape(64, 1).astype(jnp.float32)
    w3 = conv_w(params["dec2_w"])
    b3 = params["dec2_b"].reshape(3, 1).astype(jnp.float32)

    L = B * HW
    kern = functools.partial(_student_kernel, L=L)

    out = pl.pallas_call(
        kern,
        out_shape=jax.ShapeDtypeStruct((3, Npad * HW), jnp.float32),
        grid=(Npad // B,),
        in_specs=[
            pl.BlockSpec((3, L), lambda i: (0, i)),            # x  (lane-dense)
            pl.BlockSpec((9, 32, 3), lambda i: (0, 0, 0)),     # w1
            pl.BlockSpec((32, 1), lambda i: (0, 0)),           # b1
            pl.BlockSpec((9, 64, 32), lambda i: (0, 0, 0)),    # w2
            pl.BlockSpec((64, 1), lambda i: (0, 0)),           # b2
            pl.BlockSpec((4, 64, 64), lambda i: (0, 0, 0)),    # wt
            pl.BlockSpec((64, 1), lambda i: (0, 0)),           # bt
            pl.BlockSpec((9, 3, 64), lambda i: (0, 0, 0)),     # w3
            pl.BlockSpec((3, 1), lambda i: (0, 0)),            # b3
        ],
        out_specs=pl.BlockSpec((3, L), lambda i: (0, i)),
        compiler_params=pltpu.CompilerParams(
            dimension_semantics=("parallel",)),
    )(xk, w1, b1, w2, b2, wt, bt, w3, b3)

    # (3, Npad*256) -> NCHW (N, 3, 16, 16)
    out = out.reshape(3, Npad, HW)[:, :N, :]
    return jnp.transpose(out, (1, 0, 2)).reshape(N, 3, H, W)


# -------------------- pure-JAX reference (for validation) -------------------

def _reference_forward(params, x_nchw):
    dn = ("NCHW", "OIHW", "NCHW")
    y = jax.lax.conv_general_dilated(x_nchw.astype(jnp.float32), params["enc1_w"],
                                     (1, 1), "SAME", dimension_numbers=dn)
    y = jax.nn.relu(y + params["enc1_b"][None, :, None, None])
    y = jax.lax.conv_general_dilated(y, params["enc2_w"], (1, 1), "SAME",
                                     dimension_numbers=dn)
    y = jax.nn.relu(y + params["enc2_b"][None, :, None, None])
    y = jax.lax.reduce_window(y, -jnp.inf, jax.lax.max,
                              (1, 1, 2, 2), (1, 1, 2, 2), "VALID")
    n = y.shape[0]
    d = jnp.einsum("ncij,coab->noiajb", y, params["dec1_w"]).reshape(n, 64, H, W)
    d = jax.nn.relu(d + params["dec1_b"][None, :, None, None])
    z = jax.lax.conv_general_dilated(d, params["dec2_w"], (1, 1), "SAME",
                                     dimension_numbers=dn)
    return jax.nn.relu(z + params["dec2_b"][None, :, None, None])


# ------------------------- deterministic parameters --------------------------

def init_params(key):
    """PyTorch-style uniform init, PyTorch-native layouts:
    conv weights OIHW, ConvTranspose2d weight (Ci, Co, kH, kW)."""
    ks = jax.random.split(key, 8)

    def u(k, shape, fan_in):
        bound = 1.0 / math.sqrt(fan_in)
        return jax.random.uniform(k, shape, jnp.float32, -bound, bound)

    return {
        "enc1_w": u(ks[0], (32, 3, 3, 3), 3 * 9),
        "enc1_b": u(ks[1], (32,), 3 * 9),
        "enc2_w": u(ks[2], (64, 32, 3, 3), 32 * 9),
        "enc2_b": u(ks[3], (64,), 32 * 9),
        "dec1_w": u(ks[4], (64, 64, 2, 2), 64 * 4),
        "dec1_b": u(ks[5], (64,), 64 * 4),
        "dec2_w": u(ks[6], (3, 64, 3, 3), 64 * 9),
        "dec2_b": u(ks[7], (3,), 64 * 9),
    }


if __name__ == "__main__":
    key = jax.random.PRNGKey(0)
    pkey, xkey = jax.random.split(key)
    params = init_params(pkey)
    x = jax.random.normal(xkey, (2, 3, 16, 16), dtype=jnp.float32)  # NCHW

    fwd = jax.jit(student_forward)
    out = fwd(params, x)
    jax.block_until_ready(out)
    assert out.shape == (2, 3, 16, 16), out.shape

    ref = _reference_forward(params, x)
    err = float(jnp.max(jnp.abs(out - ref)))
    assert err < 1e-3, f"mismatch vs reference: {err}"
    print("KERNEL_OK")
</pallas_src>

<mosaic_0001>
module attributes {stable_mosaic.version = 11 : i64} {
  func.func @_student_kernel(%arg0: i32, %arg1: memref<3x256xf32, #tpu.memory_space<vmem>>, %arg2: memref<9x32x3xf32, #tpu.memory_space<vmem>>, %arg3: memref<32x1xf32, #tpu.memory_space<vmem>>, %arg4: memref<9x64x32xf32, #tpu.memory_space<vmem>>, %arg5: memref<64x1xf32, #tpu.memory_space<vmem>>, %arg6: memref<4x64x64xf32, #tpu.memory_space<vmem>>, %arg7: memref<64x1xf32, #tpu.memory_space<vmem>>, %arg8: memref<9x3x64xf32, #tpu.memory_space<vmem>>, %arg9: memref<3x1xf32, #tpu.memory_space<vmem>>, %arg10: memref<3x256xf32, #tpu.memory_space<vmem>>) attributes {dimension_semantics = [#tpu.dimension_semantics<parallel>], iteration_bounds = array<i64: 2>, scalar_prefetch = 0 : i64, scratch_operands = 0 : i64, tpu.core_type = #tpu.core_type<tc>, window_params = [{transform_indices = @transform_0, window_bounds = array<i64: 3, 256>}, {pipeline_mode = #tpu.pipeline_mode<synchronous>, transform_indices = @transform_1, window_bounds = array<i64: 9, 32, 3>}, {pipeline_mode = #tpu.pipeline_mode<synchronous>, transform_indices = @transform_2, window_bounds = array<i64: 32, 1>}, {pipeline_mode = #tpu.pipeline_mode<synchronous>, transform_indices = @transform_3, window_bounds = array<i64: 9, 64, 32>}, {pipeline_mode = #tpu.pipeline_mode<synchronous>, transform_indices = @transform_4, window_bounds = array<i64: 64, 1>}, {pipeline_mode = #tpu.pipeline_mode<synchronous>, transform_indices = @transform_5, window_bounds = array<i64: 4, 64, 64>}, {pipeline_mode = #tpu.pipeline_mode<synchronous>, transform_indices = @transform_6, window_bounds = array<i64: 64, 1>}, {pipeline_mode = #tpu.pipeline_mode<synchronous>, transform_indices = @transform_7, window_bounds = array<i64: 9, 3, 64>}, {pipeline_mode = #tpu.pipeline_mode<synchronous>, transform_indices = @transform_8, window_bounds = array<i64: 3, 1>}, {transform_indices = @transform_9, window_bounds = array<i64: 3, 256>}]} {
    %0 = tpu.iota {dimensions = array<i32: 1>} : vector<1x256xi32>
    %c4_i32 = arith.constant 4 : i32
    %1 = vector.broadcast %c4_i32 : i32 to vector<1x256xi32>
    %2 = arith.shrsi %0, %1 : vector<1x256xi32>
    %c15_i32 = arith.constant 15 : i32
    %3 = vector.broadcast %c15_i32 : i32 to vector<1x256xi32>
    %4 = arith.andi %2, %3 : vector<1x256xi32>
    %c15_i32_0 = arith.constant 15 : i32
    %5 = vector.broadcast %c15_i32_0 : i32 to vector<1x256xi32>
    %6 = arith.andi %0, %5 : vector<1x256xi32>
    %c-1_i32 = arith.constant -1 : i32
    %7 = vector.broadcast %c-1_i32 : i32 to vector<1x256xi32>
    %8 = arith.addi %4, %7 : vector<1x256xi32>
    %c-1_i32_1 = arith.constant -1 : i32
    %9 = vector.broadcast %c-1_i32_1 : i32 to vector<1x256xi32>
    %10 = arith.addi %6, %9 : vector<1x256xi32>
    %c0_i32 = arith.constant 0 : i32
    %11 = vector.broadcast %c0_i32 : i32 to vector<1x256xi32>
    %12 = arith.cmpi sge, %8, %11 : vector<1x256xi32>
    %c16_i32 = arith.constant 16 : i32
    %13 = vector.broadcast %c16_i32 : i32 to vector<1x256xi32>
    %14 = arith.cmpi slt, %8, %13 : vector<1x256xi32>
    %15 = arith.andi %12, %14 : vector<1x256xi1>
    %c0_i32_2 = arith.constant 0 : i32
    %16 = vector.broadcast %c0_i32_2 : i32 to vector<1x256xi32>
    %17 = arith.cmpi sge, %10, %16 : vector<1x256xi32>
    %18 = arith.andi %15, %17 : vector<1x256xi1>
    %c16_i32_3 = arith.constant 16 : i32
    %19 = vector.broadcast %c16_i32_3 : i32 to vector<1x256xi32>
    %20 = arith.cmpi slt, %10, %19 : vector<1x256xi32>
    %21 = arith.andi %18, %20 : vector<1x256xi1>
    %c-1_i32_4 = arith.constant -1 : i32
    %22 = vector.broadcast %c-1_i32_4 : i32 to vector<1x256xi32>
    %23 = arith.addi %4, %22 : vector<1x256xi32>
    %c0_i32_5 = arith.constant 0 : i32
    %24 = vector.broadcast %c0_i32_5 : i32 to vector<1x256xi32>
    %25 = arith.addi %6, %24 : vector<1x256xi32>
    %c0_i32_6 = arith.constant 0 : i32
    %26 = vector.broadcast %c0_i32_6 : i32 to vector<1x256xi32>
    %27 = arith.cmpi sge, %23, %26 : vector<1x256xi32>
    %c16_i32_7 = arith.constant 16 : i32
    %28 = vector.broadcast %c16_i32_7 : i32 to vector<1x256xi32>
    %29 = arith.cmpi slt, %23, %28 : vector<1x256xi32>
    %30 = arith.andi %27, %29 : vector<1x256xi1>
    %c0_i32_8 = arith.constant 0 : i32
    %31 = vector.broadcast %c0_i32_8 : i32 to vector<1x256xi32>
    %32 = arith.cmpi sge, %25, %31 : vector<1x256xi32>
    %33 = arith.andi %30, %32 : vector<1x256xi1>
    %c16_i32_9 = arith.constant 16 : i32
    %34 = vector.broadcast %c16_i32_9 : i32 to vector<1x256xi32>
    %35 = arith.cmpi slt, %25, %34 : vector<1x256xi32>
    %36 = arith.andi %33, %35 : vector<1x256xi1>
    %c-1_i32_10 = arith.constant -1 : i32
    %37 = vector.broadcast %c-1_i32_10 : i32 to vector<1x256xi32>
    %38 = arith.addi %4, %37 : vector<1x256xi32>
    %c1_i32 = arith.constant 1 : i32
    %39 = vector.broadcast %c1_i32 : i32 to vector<1x256xi32>
    %40 = arith.addi %6, %39 : vector<1x256xi32>
    %c0_i32_11 = arith.constant 0 : i32
    %41 = vector.broadcast %c0_i32_11 : i32 to vector<1x256xi32>
    %42 = arith.cmpi sge, %38, %41 : vector<1x256xi32>
    %c16_i32_12 = arith.constant 16 : i32
    %43 = vector.broadcast %c16_i32_12 : i32 to vector<1x256xi32>
    %44 = arith.cmpi slt, %38, %43 : vector<1x256xi32>
    %45 = arith.andi %42, %44 : vector<1x256xi1>
    %c0_i32_13 = arith.constant 0 : i32
    %46 = vector.broadcast %c0_i32_13 : i32 to vector<1x256xi32>
    %47 = arith.cmpi sge, %40, %46 : vector<1x256xi32>
    %48 = arith.andi %45, %47 : vector<1x256xi1>
    %c16_i32_14 = arith.constant 16 : i32
    %49 = vector.broadcast %c16_i32_14 : i32 to vector<1x256xi32>
    %50 = arith.cmpi slt, %40, %49 : vector<1x256xi32>
    %51 = arith.andi %48, %50 : vector<1x256xi1>
    %c0_i32_15 = arith.constant 0 : i32
    %52 = vector.broadcast %c0_i32_15 : i32 to vector<1x256xi32>
    %53 = arith.addi %4, %52 : vector<1x256xi32>
    %c-1_i32_16 = arith.constant -1 : i32
    %54 = vector.broadcast %c-1_i32_16 : i32 to vector<1x256xi32>
    %55 = arith.addi %6, %54 : vector<1x256xi32>
    %c0_i32_17 = arith.constant 0 : i32
    %56 = vector.broadcast %c0_i32_17 : i32 to vector<1x256xi32>
    %57 = arith.cmpi sge, %53, %56 : vector<1x256xi32>
    %c16_i32_18 = arith.constant 16 : i32
    %58 = vector.broadcast %c16_i32_18 : i32 to vector<1x256xi32>
    %59 = arith.cmpi slt, %53, %58 : vector<1x256xi32>
    %60 = arith.andi %57, %59 : vector<1x256xi1>
    %c0_i32_19 = arith.constant 0 : i32
    %61 = vector.broadcast %c0_i32_19 : i32 to vector<1x256xi32>
    %62 = arith.cmpi sge, %55, %61 : vector<1x256xi32>
    %63 = arith.andi %60, %62 : vector<1x256xi1>
    %c16_i32_20 = arith.constant 16 : i32
    %64 = vector.broadcast %c16_i32_20 : i32 to vector<1x256xi32>
    %65 = arith.cmpi slt, %55, %64 : vector<1x256xi32>
    %66 = arith.andi %63, %65 : vector<1x256xi1>
    %c0_i32_21 = arith.constant 0 : i32
    %67 = vector.broadcast %c0_i32_21 : i32 to vector<1x256xi32>
    %68 = arith.addi %4, %67 : vector<1x256xi32>
    %c0_i32_22 = arith.constant 0 : i32
    %69 = vector.broadcast %c0_i32_22 : i32 to vector<1x256xi32>
    %70 = arith.addi %6, %69 : vector<1x256xi32>
    %c0_i32_23 = arith.constant 0 : i32
    %71 = vector.broadcast %c0_i32_23 : i32 to vector<1x256xi32>
    %72 = arith.cmpi sge, %68, %71 : vector<1x256xi32>
    %c16_i32_24 = arith.constant 16 : i32
    %73 = vector.broadcast %c16_i32_24 : i32 to vector<1x256xi32>
    %74 = arith.cmpi slt, %68, %73 : vector<1x256xi32>
    %75 = arith.andi %72, %74 : vector<1x256xi1>
    %c0_i32_25 = arith.constant 0 : i32
    %76 = vector.broadcast %c0_i32_25 : i32 to vector<1x256xi32>
    %77 = arith.cmpi sge, %70, %76 : vector<1x256xi32>
    %78 = arith.andi %75, %77 : vector<1x256xi1>
    %c16_i32_26 = arith.constant 16 : i32
    %79 = vector.broadcast %c16_i32_26 : i32 to vector<1x256xi32>
    %80 = arith.cmpi slt, %70, %79 : vector<1x256xi32>
    %81 = arith.andi %78, %80 : vector<1x256xi1>
    %c0_i32_27 = arith.constant 0 : i32
    %82 = vector.broadcast %c0_i32_27 : i32 to vector<1x256xi32>
    %83 = arith.addi %4, %82 : vector<1x256xi32>
    %c1_i32_28 = arith.constant 1 : i32
    %84 = vector.broadcast %c1_i32_28 : i32 to vector<1x256xi32>
    %85 = arith.addi %6, %84 : vector<1x256xi32>
    %c0_i32_29 = arith.constant 0 : i32
    %86 = vector.broadcast %c0_i32_29 : i32 to vector<1x256xi32>
    %87 = arith.cmpi sge, %83, %86 : vector<1x256xi32>
    %c16_i32_30 = arith.constant 16 : i32
    %88 = vector.broadcast %c16_i32_30 : i32 to vector<1x256xi32>
    %89 = arith.cmpi slt, %83, %88 : vector<1x256xi32>
    %90 = arith.andi %87, %89 : vector<1x256xi1>
    %c0_i32_31 = arith.constant 0 : i32
    %91 = vector.broadcast %c0_i32_31 : i32 to vector<1x256xi32>
    %92 = arith.cmpi sge, %85, %91 : vector<1x256xi32>
    %93 = arith.andi %90, %92 : vector<1x256xi1>
    %c16_i32_32 = arith.constant 16 : i32
    %94 = vector.broadcast %c16_i32_32 : i32 to vector<1x256xi32>
    %95 = arith.cmpi slt, %85, %94 : vector<1x256xi32>
    %96 = arith.andi %93, %95 : vector<1x256xi1>
    %c1_i32_33 = arith.constant 1 : i32
    %97 = vector.broadcast %c1_i32_33 : i32 to vector<1x256xi32>
    %98 = arith.addi %4, %97 : vector<1x256xi32>
    %c-1_i32_34 = arith.constant -1 : i32
    %99 = vector.broadcast %c-1_i32_34 : i32 to vector<1x256xi32>
    %100 = arith.addi %6, %99 : vector<1x256xi32>
    %c0_i32_35 = arith.constant 0 : i32
    %101 = vector.broadcast %c0_i32_35 : i32 to vector<1x256xi32>
    %102 = arith.cmpi sge, %98, %101 : vector<1x256xi32>
    %c16_i32_36 = arith.constant 16 : i32
    %103 = vector.broadcast %c16_i32_36 : i32 to vector<1x256xi32>
    %104 = arith.cmpi slt, %98, %103 : vector<1x256xi32>
    %105 = arith.andi %102, %104 : vector<1x256xi1>
    %c0_i32_37 = arith.constant 0 : i32
    %106 = vector.broadcast %c0_i32_37 : i32 to vector<1x256xi32>
    %107 = arith.cmpi sge, %100, %106 : vector<1x256xi32>
    %108 = arith.andi %105, %107 : vector<1x256xi1>
    %c16_i32_38 = arith.constant 16 : i32
    %109 = vector.broadcast %c16_i32_38 : i32 to vector<1x256xi32>
    %110 = arith.cmpi slt, %100, %109 : vector<1x256xi32>
    %111 = arith.andi %108, %110 : vector<1x256xi1>
    %c1_i32_39 = arith.constant 1 : i32
    %112 = vector.broadcast %c1_i32_39 : i32 to vector<1x256xi32>
    %113 = arith.addi %4, %112 : vector<1x256xi32>
    %c0_i32_40 = arith.constant 0 : i32
    %114 = vector.broadcast %c0_i32_40 : i32 to vector<1x256xi32>
    %115 = arith.addi %6, %114 : vector<1x256xi32>
    %c0_i32_41 = arith.constant 0 : i32
    %116 = vector.broadcast %c0_i32_41 : i32 to vector<1x256xi32>
    %117 = arith.cmpi sge, %113, %116 : vector<1x256xi32>
    %c16_i32_42 = arith.constant 16 : i32
    %118 = vector.broadcast %c16_i32_42 : i32 to vector<1x256xi32>
    %119 = arith.cmpi slt, %113, %118 : vector<1x256xi32>
    %120 = arith.andi %117, %119 : vector<1x256xi1>
    %c0_i32_43 = arith.constant 0 : i32
    %121 = vector.broadcast %c0_i32_43 : i32 to vector<1x256xi32>
    %122 = arith.cmpi sge, %115, %121 : vector<1x256xi32>
    %123 = arith.andi %120, %122 : vector<1x256xi1>
    %c16_i32_44 = arith.constant 16 : i32
    %124 = vector.broadcast %c16_i32_44 : i32 to vector<1x256xi32>
    %125 = arith.cmpi slt, %115, %124 : vector<1x256xi32>
    %126 = arith.andi %123, %125 : vector<1x256xi1>
    %c1_i32_45 = arith.constant 1 : i32
    %127 = vector.broadcast %c1_i32_45 : i32 to vector<1x256xi32>
    %128 = arith.addi %4, %127 : vector<1x256xi32>
    %c1_i32_46 = arith.constant 1 : i32
    %129 = vector.broadcast %c1_i32_46 : i32 to vector<1x256xi32>
    %130 = arith.addi %6, %129 : vector<1x256xi32>
    %c0_i32_47 = arith.constant 0 : i32
    %131 = vector.broadcast %c0_i32_47 : i32 to vector<1x256xi32>
    %132 = arith.cmpi sge, %128, %131 : vector<1x256xi32>
    %c16_i32_48 = arith.constant 16 : i32
    %133 = vector.broadcast %c16_i32_48 : i32 to vector<1x256xi32>
    %134 = arith.cmpi slt, %128, %133 : vector<1x256xi32>
    %135 = arith.andi %132, %134 : vector<1x256xi1>
    %c0_i32_49 = arith.constant 0 : i32
    %136 = vector.broadcast %c0_i32_49 : i32 to vector<1x256xi32>
    %137 = arith.cmpi sge, %130, %136 : vector<1x256xi32>
    %138 = arith.andi %135, %137 : vector<1x256xi1>
    %c16_i32_50 = arith.constant 16 : i32
    %139 = vector.broadcast %c16_i32_50 : i32 to vector<1x256xi32>
    %140 = arith.cmpi slt, %130, %139 : vector<1x256xi32>
    %141 = arith.andi %138, %140 : vector<1x256xi1>
    %c0 = arith.constant 0 : index
    %c0_51 = arith.constant 0 : index
    %142 = vector.load %arg1[%c0, %c0_51] : memref<3x256xf32, #tpu.memory_space<vmem>>, vector<3x256xf32>
    %c17_i32 = arith.constant 17 : i32
    %143 = tpu.dynamic_rotate %142 by %c17_i32 dim 1 : vector<3x256xf32>, i32 -> vector<3x256xf32>
    %cst = arith.constant 0.000000e+00 : f32
    %144 = vector.shape_cast %21 : vector<1x256xi1> to vector<1x256xi1>
    %145 = vector.broadcast %144 : vector<1x256xi1> to vector<3x256xi1>
    %146 = vector.broadcast %cst : f32 to vector<3x256xf32>
    %147 = arith.select %145, %143, %146 : vector<3x256xi1>, vector<3x256xf32>
    %c0_52 = arith.constant 0 : index
    %c0_53 = arith.constant 0 : index
    %c0_54 = arith.constant 0 : index
    %148 = vector.load %arg2[%c0_52, %c0_53, %c0_54] : memref<9x32x3xf32, #tpu.memory_space<vmem>>, vector<1x32x3xf32>
    %149 = vector.shape_cast %148 : vector<1x32x3xf32> to vector<32x3xf32>
    %cst_55 = arith.constant dense<0.000000e+00> : vector<32x256xf32>
    %150 = tpu.matmul %149, %147, %cst_55 {dimension_numbers = #tpu.dot_dimension_numbers<[1], [0], [0], [1], [0, 0, 1, 1], [], []>} : vector<32x3xf32>, vector<3x256xf32>, vector<32x256xf32> -> vector<32x256xf32>
    %c16_i32_56 = arith.constant 16 : i32
    %151 = tpu.dynamic_rotate %142 by %c16_i32_56 dim 1 : vector<3x256xf32>, i32 -> vector<3x256xf32>
    %cst_57 = arith.constant 0.000000e+00 : f32
    %152 = vector.shape_cast %36 : vector<1x256xi1> to vector<1x256xi1>
    %153 = vector.broadcast %152 : vector<1x256xi1> to vector<3x256xi1>
    %154 = vector.broadcast %cst_57 : f32 to vector<3x256xf32>
    %155 = arith.select %153, %151, %154 : vector<3x256xi1>, vector<3x256xf32>
    %c1 = arith.constant 1 : index
    %c0_58 = arith.constant 0 : index
    %c0_59 = arith.constant 0 : index
    %156 = vector.load %arg2[%c1, %c0_58, %c0_59] : memref<9x32x3xf32, #tpu.memory_space<vmem>>, vector<1x32x3xf32>
    %157 = vector.shape_cast %156 : vector<1x32x3xf32> to vector<32x3xf32>
    %cst_60 = arith.constant dense<0.000000e+00> : vector<32x256xf32>
    %158 = tpu.matmul %157, %155, %cst_60 {dimension_numbers = #tpu.dot_dimension_numbers<[1], [0], [0], [1], [0, 0, 1, 1], [], []>} : vector<32x3xf32>, vector<3x256xf32>, vector<32x256xf32> -> vector<32x256xf32>
    %159 = arith.addf %150, %158 : vector<32x256xf32>
    %c15_i32_61 = arith.constant 15 : i32
    %160 = tpu.dynamic_rotate %142 by %c15_i32_61 dim 1 : vector<3x256xf32>, i32 -> vector<3x256xf32>
    %cst_62 = arith.constant 0.000000e+00 : f32
    %161 = vector.shape_cast %51 : vector<1x256xi1> to vector<1x256xi1>
    %162 = vector.broadcast %161 : vector<1x256xi1> to vector<3x256xi1>
    %163 = vector.broadcast %cst_62 : f32 to vector<3x256xf32>
    %164 = arith.select %162, %160, %163 : vector<3x256xi1>, vector<3x256xf32>
    %c2 = arith.constant 2 : index
    %c0_63 = arith.constant 0 : index
    %c0_64 = arith.constant 0 : index
    %165 = vector.load %arg2[%c2, %c0_63, %c0_64] : memref<9x32x3xf32, #tpu.memory_space<vmem>>, vector<1x32x3xf32>
    %166 = vector.shape_cast %165 : vector<1x32x3xf32> to vector<32x3xf32>
    %cst_65 = arith.constant dense<0.000000e+00> : vector<32x256xf32>
    %167 = tpu.matmul %166, %164, %cst_65 {dimension_numbers = #tpu.dot_dimension_numbers<[1], [0], [0], [1], [0, 0, 1, 1], [], []>} : vector<32x3xf32>, vector<3x256xf32>, vector<32x256xf32> -> vector<32x256xf32>
    %168 = arith.addf %159, %167 : vector<32x256xf32>
    %c1_i32_66 = arith.constant 1 : i32
    %169 = tpu.dynamic_rotate %142 by %c1_i32_66 dim 1 : vector<3x256xf32>, i32 -> vector<3x256xf32>
    %cst_67 = arith.constant 0.000000e+00 : f32
    %170 = vector.shape_cast %66 : vector<1x256xi1> to vector<1x256xi1>
    %171 = vector.broadcast %170 : vector<1x256xi1> to vector<3x256xi1>
    %172 = vector.broadcast %cst_67 : f32 to vector<3x256xf32>
    %173 = arith.select %171, %169, %172 : vector<3x256xi1>, vector<3x256xf32>
    %c3 = arith.constant 3 : index
    %c0_68 = arith.constant 0 : index
    %c0_69 = arith.constant 0 : index
    %174 = vector.load %arg2[%c3, %c0_68, %c0_69] : memref<9x32x3xf32, #tpu.memory_space<vmem>>, vector<1x32x3xf32>
    %175 = vector.shape_cast %174 : vector<1x32x3xf32> to vector<32x3xf32>
    %cst_70 = arith.constant dense<0.000000e+00> : vector<32x256xf32>
    %176 = tpu.matmul %175, %173, %cst_70 {dimension_numbers = #tpu.dot_dimension_numbers<[1], [0], [0], [1], [0, 0, 1, 1], [], []>} : vector<32x3xf32>, vector<3x256xf32>, vector<32x256xf32> -> vector<32x256xf32>
    %177 = arith.addf %168, %176 : vector<32x256xf32>
    %cst_71 = arith.constant 0.000000e+00 : f32
    %178 = vector.shape_cast %81 : vector<1x256xi1> to vector<1x256xi1>
    %179 = vector.broadcast %178 : vector<1x256xi1> to vector<3x256xi1>
    %180 = vector.broadcast %cst_71 : f32 to vector<3x256xf32>
    %181 = arith.select %179, %142, %180 : vector<3x256xi1>, vector<3x256xf32>
    %c4 = arith.constant 4 : index
    %c0_72 = arith.constant 0 : index
    %c0_73 = arith.constant 0 : index
    %182 = vector.load %arg2[%c4, %c0_72, %c0_73] : memref<9x32x3xf32, #tpu.memory_space<vmem>>, vector<1x32x3xf32>
    %183 = vector.shape_cast %182 : vector<1x32x3xf32> to vector<32x3xf32>
    %cst_74 = arith.constant dense<0.000000e+00> : vector<32x256xf32>
    %184 = tpu.matmul %183, %181, %cst_74 {dimension_numbers = #tpu.dot_dimension_numbers<[1], [0], [0], [1], [0, 0, 1, 1], [], []>} : vector<32x3xf32>, vector<3x256xf32>, vector<32x256xf32> -> vector<32x256xf32>
    %185 = arith.addf %177, %184 : vector<32x256xf32>
    %c255_i32 = arith.constant 255 : i32
    %186 = tpu.dynamic_rotate %142 by %c255_i32 dim 1 : vector<3x256xf32>, i32 -> vector<3x256xf32>
    %cst_75 = arith.constant 0.000000e+00 : f32
    %187 = vector.shape_cast %96 : vector<1x256xi1> to vector<1x256xi1>
    %188 = vector.broadcast %187 : vector<1x256xi1> to vector<3x256xi1>
    %189 = vector.broadcast %cst_75 : f32 to vector<3x256xf32>
    %190 = arith.select %188, %186, %189 : vector<3x256xi1>, vector<3x256xf32>
    %c5 = arith.constant 5 : index
    %c0_76 = arith.constant 0 : index
    %c0_77 = arith.constant 0 : index
    %191 = vector.load %arg2[%c5, %c0_76, %c0_77] : memref<9x32x3xf32, #tpu.memory_space<vmem>>, vector<1x32x3xf32>
    %192 = vector.shape_cast %191 : vector<1x32x3xf32> to vector<32x3xf32>
    %cst_78 = arith.constant dense<0.000000e+00> : vector<32x256xf32>
    %193 = tpu.matmul %192, %190, %cst_78 {dimension_numbers = #tpu.dot_dimension_numbers<[1], [0], [0], [1], [0, 0, 1, 1], [], []>} : vector<32x3xf32>, vector<3x256xf32>, vector<32x256xf32> -> vector<32x256xf32>
    %194 = arith.addf %185, %193 : vector<32x256xf32>
    %c241_i32 = arith.constant 241 : i32
    %195 = tpu.dynamic_rotate %142 by %c241_i32 dim 1 : vector<3x256xf32>, i32 -> vector<3x256xf32>
    %cst_79 = arith.constant 0.000000e+00 : f32
    %196 = vector.shape_cast %111 : vector<1x256xi1> to vector<1x256xi1>
    %197 = vector.broadcast %196 : vector<1x256xi1> to vector<3x256xi1>
    %198 = vector.broadcast %cst_79 : f32 to vector<3x256xf32>
    %199 = arith.select %197, %195, %198 : vector<3x256xi1>, vector<3x256xf32>
    %c6 = arith.constant 6 : index
    %c0_80 = arith.constant 0 : index
    %c0_81 = arith.constant 0 : index
    %200 = vector.load %arg2[%c6, %c0_80, %c0_81] : memref<9x32x3xf32, #tpu.memory_space<vmem>>, vector<1x32x3xf32>
    %201 = vector.shape_cast %200 : vector<1x32x3xf32> to vector<32x3xf32>
    %cst_82 = arith.constant dense<0.000000e+00> : vector<32x256xf32>
    %202 = tpu.matmul %201, %199, %cst_82 {dimension_numbers = #tpu.dot_dimension_numbers<[1], [0], [0], [1], [0, 0, 1, 1], [], []>} : vector<32x3xf32>, vector<3x256xf32>, vector<32x256xf32> -> vector<32x256xf32>
    %203 = arith.addf %194, %202 : vector<32x256xf32>
    %c240_i32 = arith.constant 240 : i32
    %204 = tpu.dynamic_rotate %142 by %c240_i32 dim 1 : vector<3x256xf32>, i32 -> vector<3x256xf32>
    %cst_83 = arith.constant 0.000000e+00 : f32
    %205 = vector.shape_cast %126 : vector<1x256xi1> to vector<1x256xi1>
    %206 = vector.broadcast %205 : vector<1x256xi1> to vector<3x256xi1>
    %207 = vector.broadcast %cst_83 : f32 to vector<3x256xf32>
    %208 = arith.select %206, %204, %207 : vector<3x256xi1>, vector<3x256xf32>
    %c7 = arith.constant 7 : index
    %c0_84 = arith.constant 0 : index
    %c0_85 = arith.constant 0 : index
    %209 = vector.load %arg2[%c7, %c0_84, %c0_85] : memref<9x32x3xf32, #tpu.memory_space<vmem>>, vector<1x32x3xf32>
    %210 = vector.shape_cast %209 : vector<1x32x3xf32> to vector<32x3xf32>
    %cst_86 = arith.constant dense<0.000000e+00> : vector<32x256xf32>
    %211 = tpu.matmul %210, %208, %cst_86 {dimension_numbers = #tpu.dot_dimension_numbers<[1], [0], [0], [1], [0, 0, 1, 1], [], []>} : vector<32x3xf32>, vector<3x256xf32>, vector<32x256xf32> -> vector<32x256xf32>
    %212 = arith.addf %203, %211 : vector<32x256xf32>
    %c239_i32 = arith.constant 239 : i32
    %213 = tpu.dynamic_rotate %142 by %c239_i32 dim 1 : vector<3x256xf32>, i32 -> vector<3x256xf32>
    %cst_87 = arith.constant 0.000000e+00 : f32
    %214 = vector.shape_cast %141 : vector<1x256xi1> to vector<1x256xi1>
    %215 = vector.broadcast %214 : vector<1x256xi1> to vector<3x256xi1>
    %216 = vector.broadcast %cst_87 : f32 to vector<3x256xf32>
    %217 = arith.select %215, %213, %216 : vector<3x256xi1>, vector<3x256xf32>
    %c8 = arith.constant 8 : index
    %c0_88 = arith.constant 0 : index
    %c0_89 = arith.constant 0 : index
    %218 = vector.load %arg2[%c8, %c0_88, %c0_89] : memref<9x32x3xf32, #tpu.memory_space<vmem>>, vector<1x32x3xf32>
    %219 = vector.shape_cast %218 : vector<1x32x3xf32> to vector<32x3xf32>
    %cst_90 = arith.constant dense<0.000000e+00> : vector<32x256xf32>
    %220 = tpu.matmul %219, %217, %cst_90 {dimension_numbers = #tpu.dot_dimension_numbers<[1], [0], [0], [1], [0, 0, 1, 1], [], []>} : vector<32x3xf32>, vector<3x256xf32>, vector<32x256xf32> -> vector<32x256xf32>
    %221 = arith.addf %212, %220 : vector<32x256xf32>
    %c0_91 = arith.constant 0 : index
    %c0_92 = arith.constant 0 : index
    %222 = vector.load %arg3[%c0_91, %c0_92] : memref<32x1xf32, #tpu.memory_space<vmem>>, vector<32x1xf32>
    %223 = vector.broadcast %222 : vector<32x1xf32> to vector<32x256xf32>
    %224 = arith.addf %221, %223 : vector<32x256xf32>
    %cst_93 = arith.constant 0.000000e+00 : f32
    %225 = vector.broadcast %cst_93 : f32 to vector<32x256xf32>
    %226 = arith.maximumf %224, %225 : vector<32x256xf32>
    %c17_i32_94 = arith.constant 17 : i32
    %227 = tpu.dynamic_rotate %226 by %c17_i32_94 dim 1 : vector<32x256xf32>, i32 -> vector<32x256xf32>
    %cst_95 = arith.constant 0.000000e+00 : f32
    %228 = vector.shape_cast %21 : vector<1x256xi1> to vector<1x256xi1>
    %229 = vector.broadcast %228 : vector<1x256xi1> to vector<32x256xi1>
    %230 = vector.broadcast %cst_95 : f32 to vector<32x256xf32>
    %231 = arith.select %229, %227, %230 : vector<32x256xi1>, vector<32x256xf32>
    %c0_96 = arith.constant 0 : index
    %c0_97 = arith.constant 0 : index
    %c0_98 = arith.constant 0 : index
    %232 = vector.load %arg4[%c0_96, %c0_97, %c0_98] : memref<9x64x32xf32, #tpu.memory_space<vmem>>, vector<1x64x32xf32>
    %233 = vector.shape_cast %232 : vector<1x64x32xf32> to vector<64x32xf32>
    %cst_99 = arith.constant dense<0.000000e+00> : vector<64x256xf32>
    %234 = tpu.matmul %233, %231, %cst_99 {dimension_numbers = #tpu.dot_dimension_numbers<[1], [0], [0], [1], [0, 0, 1, 1], [], []>} : vector<64x32xf32>, vector<32x256xf32>, vector<64x256xf32> -> vector<64x256xf32>
    %c16_i32_100 = arith.constant 16 : i32
    %235 = tpu.dynamic_rotate %226 by %c16_i32_100 dim 1 : vector<32x256xf32>, i32 -> vector<32x256xf32>
    %cst_101 = arith.constant 0.000000e+00 : f32
    %236 = vector.shape_cast %36 : vector<1x256xi1> to vector<1x256xi1>
    %237 = vector.broadcast %236 : vector<1x256xi1> to vector<32x256xi1>
    %238 = vector.broadcast %cst_101 : f32 to vector<32x256xf32>
    %239 = arith.select %237, %235, %238 : vector<32x256xi1>, vector<32x256xf32>
    %c1_102 = arith.constant 1 : index
    %c0_103 = arith.constant 0 : index
    %c0_104 = arith.constant 0 : index
    %240 = vector.load %arg4[%c1_102, %c0_103, %c0_104] : memref<9x64x32xf32, #tpu.memory_space<vmem>>, vector<1x64x32xf32>
    %241 = vector.shape_cast %240 : vector<1x64x32xf32> to vector<64x32xf32>
    %cst_105 = arith.constant dense<0.000000e+00> : vector<64x256xf32>
    %242 = tpu.matmul %241, %239, %cst_105 {dimension_numbers = #tpu.dot_dimension_numbers<[1], [0], [0], [1], [0, 0, 1, 1], [], []>} : vector<64x32xf32>, vector<32x256xf32>, vector<64x256xf32> -> vector<64x256xf32>
    %243 = arith.addf %234, %242 : vector<64x256xf32>
    %c15_i32_106 = arith.constant 15 : i32
    %244 = tpu.dynamic_rotate %226 by %c15_i32_106 dim 1 : vector<32x256xf32>, i32 -> vector<32x256xf32>
    %cst_107 = arith.constant 0.000000e+00 : f32
    %245 = vector.shape_cast %51 : vector<1x256xi1> to vector<1x256xi1>
    %246 = vector.broadcast %245 : vector<1x256xi1> to vector<32x256xi1>
    %247 = vector.broadcast %cst_107 : f32 to vector<32x256xf32>
    %248 = arith.select %246, %244, %247 : vector<32x256xi1>, vector<32x256xf32>
    %c2_108 = arith.constant 2 : index
    %c0_109 = arith.constant 0 : index
    %c0_110 = arith.constant 0 : index
    %249 = vector.load %arg4[%c2_108, %c0_109, %c0_110] : memref<9x64x32xf32, #tpu.memory_space<vmem>>, vector<1x64x32xf32>
    %250 = vector.shape_cast %249 : vector<1x64x32xf32> to vector<64x32xf32>
    %cst_111 = arith.constant dense<0.000000e+00> : vector<64x256xf32>
    %251 = tpu.matmul %250, %248, %cst_111 {dimension_numbers = #tpu.dot_dimension_numbers<[1], [0], [0], [1], [0, 0, 1, 1], [], []>} : vector<64x32xf32>, vector<32x256xf32>, vector<64x256xf32> -> vector<64x256xf32>
    %252 = arith.addf %243, %251 : vector<64x256xf32>
    %c1_i32_112 = arith.constant 1 : i32
    %253 = tpu.dynamic_rotate %226 by %c1_i32_112 dim 1 : vector<32x256xf32>, i32 -> vector<32x256xf32>
    %cst_113 = arith.constant 0.000000e+00 : f32
    %254 = vector.shape_cast %66 : vector<1x256xi1> to vector<1x256xi1>
    %255 = vector.broadcast %254 : vector<1x256xi1> to vector<32x256xi1>
    %256 = vector.broadcast %cst_113 : f32 to vector<32x256xf32>
    %257 = arith.select %255, %253, %256 : vector<32x256xi1>, vector<32x256xf32>
    %c3_114 = arith.constant 3 : index
    %c0_115 = arith.constant 0 : index
    %c0_116 = arith.constant 0 : index
    %258 = vector.load %arg4[%c3_114, %c0_115, %c0_116] : memref<9x64x32xf32, #tpu.memory_space<vmem>>, vector<1x64x32xf32>
    %259 = vector.shape_cast %258 : vector<1x64x32xf32> to vector<64x32xf32>
    %cst_117 = arith.constant dense<0.000000e+00> : vector<64x256xf32>
    %260 = tpu.matmul %259, %257, %cst_117 {dimension_numbers = #tpu.dot_dimension_numbers<[1], [0], [0], [1], [0, 0, 1, 1], [], []>} : vector<64x32xf32>, vector<32x256xf32>, vector<64x256xf32> -> vector<64x256xf32>
    %261 = arith.addf %252, %260 : vector<64x256xf32>
    %cst_118 = arith.constant 0.000000e+00 : f32
    %262 = vector.shape_cast %81 : vector<1x256xi1> to vector<1x256xi1>
    %263 = vector.broadcast %262 : vector<1x256xi1> to vector<32x256xi1>
    %264 = vector.broadcast %cst_118 : f32 to vector<32x256xf32>
    %265 = arith.select %263, %226, %264 : vector<32x256xi1>, vector<32x256xf32>
    %c4_119 = arith.constant 4 : index
    %c0_120 = arith.constant 0 : index
    %c0_121 = arith.constant 0 : index
    %266 = vector.load %arg4[%c4_119, %c0_120, %c0_121] : memref<9x64x32xf32, #tpu.memory_space<vmem>>, vector<1x64x32xf32>
    %267 = vector.shape_cast %266 : vector<1x64x32xf32> to vector<64x32xf32>
    %cst_122 = arith.constant dense<0.000000e+00> : vector<64x256xf32>
    %268 = tpu.matmul %267, %265, %cst_122 {dimension_numbers = #tpu.dot_dimension_numbers<[1], [0], [0], [1], [0, 0, 1, 1], [], []>} : vector<64x32xf32>, vector<32x256xf32>, vector<64x256xf32> -> vector<64x256xf32>
    %269 = arith.addf %261, %268 : vector<64x256xf32>
    %c255_i32_123 = arith.constant 255 : i32
    %270 = tpu.dynamic_rotate %226 by %c255_i32_123 dim 1 : vector<32x256xf32>, i32 -> vector<32x256xf32>
    %cst_124 = arith.constant 0.000000e+00 : f32
    %271 = vector.shape_cast %96 : vector<1x256xi1> to vector<1x256xi1>
    %272 = vector.broadcast %271 : vector<1x256xi1> to vector<32x256xi1>
    %273 = vector.broadcast %cst_124 : f32 to vector<32x256xf32>
    %274 = arith.select %272, %270, %273 : vector<32x256xi1>, vector<32x256xf32>
    %c5_125 = arith.constant 5 : index
    %c0_126 = arith.constant 0 : index
    %c0_127 = arith.constant 0 : index
    %275 = vector.load %arg4[%c5_125, %c0_126, %c0_127] : memref<9x64x32xf32, #tpu.memory_space<vmem>>, vector<1x64x32xf32>
    %276 = vector.shape_cast %275 : vector<1x64x32xf32> to vector<64x32xf32>
    %cst_128 = arith.constant dense<0.000000e+00> : vector<64x256xf32>
    %277 = tpu.matmul %276, %274, %cst_128 {dimension_numbers = #tpu.dot_dimension_numbers<[1], [0], [0], [1], [0, 0, 1, 1], [], []>} : vector<64x32xf32>, vector<32x256xf32>, vector<64x256xf32> -> vector<64x256xf32>
    %278 = arith.addf %269, %277 : vector<64x256xf32>
    %c241_i32_129 = arith.constant 241 : i32
    %279 = tpu.dynamic_rotate %226 by %c241_i32_129 dim 1 : vector<32x256xf32>, i32 -> vector<32x256xf32>
    %cst_130 = arith.constant 0.000000e+00 : f32
    %280 = vector.shape_cast %111 : vector<1x256xi1> to vector<1x256xi1>
    %281 = vector.broadcast %280 : vector<1x256xi1> to vector<32x256xi1>
    %282 = vector.broadcast %cst_130 : f32 to vector<32x256xf32>
    %283 = arith.select %281, %279, %282 : vector<32x256xi1>, vector<32x256xf32>
    %c6_131 = arith.constant 6 : index
    %c0_132 = arith.constant 0 : index
    %c0_133 = arith.constant 0 : index
    %284 = vector.load %arg4[%c6_131, %c0_132, %c0_133] : memref<9x64x32xf32, #tpu.memory_space<vmem>>, vector<1x64x32xf32>
    %285 = vector.shape_cast %284 : vector<1x64x32xf32> to vector<64x32xf32>
    %cst_134 = arith.constant dense<0.000000e+00> : vector<64x256xf32>
    %286 = tpu.matmul %285, %283, %cst_134 {dimension_numbers = #tpu.dot_dimension_numbers<[1], [0], [0], [1], [0, 0, 1, 1], [], []>} : vector<64x32xf32>, vector<32x256xf32>, vector<64x256xf32> -> vector<64x256xf32>
    %287 = arith.addf %278, %286 : vector<64x256xf32>
    %c240_i32_135 = arith.constant 240 : i32
    %288 = tpu.dynamic_rotate %226 by %c240_i32_135 dim 1 : vector<32x256xf32>, i32 -> vector<32x256xf32>
    %cst_136 = arith.constant 0.000000e+00 : f32
    %289 = vector.shape_cast %126 : vector<1x256xi1> to vector<1x256xi1>
    %290 = vector.broadcast %289 : vector<1x256xi1> to vector<32x256xi1>
    %291 = vector.broadcast %cst_136 : f32 to vector<32x256xf32>
    %292 = arith.select %290, %288, %291 : vector<32x256xi1>, vector<32x256xf32>
    %c7_137 = arith.constant 7 : index
    %c0_138 = arith.constant 0 : index
    %c0_139 = arith.constant 0 : index
    %293 = vector.load %arg4[%c7_137, %c0_138, %c0_139] : memref<9x64x32xf32, #tpu.memory_space<vmem>>, vector<1x64x32xf32>
    %294 = vector.shape_cast %293 : vector<1x64x32xf32> to vector<64x32xf32>
    %cst_140 = arith.constant dense<0.000000e+00> : vector<64x256xf32>
    %295 = tpu.matmul %294, %292, %cst_140 {dimension_numbers = #tpu.dot_dimension_numbers<[1], [0], [0], [1], [0, 0, 1, 1], [], []>} : vector<64x32xf32>, vector<32x256xf32>, vector<64x256xf32> -> vector<64x256xf32>
    %296 = arith.addf %287, %295 : vector<64x256xf32>
    %c239_i32_141 = arith.constant 239 : i32
    %297 = tpu.dynamic_rotate %226 by %c239_i32_141 dim 1 : vector<32x256xf32>, i32 -> vector<32x256xf32>
    %cst_142 = arith.constant 0.000000e+00 : f32
    %298 = vector.shape_cast %141 : vector<1x256xi1> to vector<1x256xi1>
    %299 = vector.broadcast %298 : vector<1x256xi1> to vector<32x256xi1>
    %300 = vector.broadcast %cst_142 : f32 to vector<32x256xf32>
    %301 = arith.select %299, %297, %300 : vector<32x256xi1>, vector<32x256xf32>
    %c8_143 = arith.constant 8 : index
    %c0_144 = arith.constant 0 : index
    %c0_145 = arith.constant 0 : index
    %302 = vector.load %arg4[%c8_143, %c0_144, %c0_145] : memref<9x64x32xf32, #tpu.memory_space<vmem>>, vector<1x64x32xf32>
    %303 = vector.shape_cast %302 : vector<1x64x32xf32> to vector<64x32xf32>
    %cst_146 = arith.constant dense<0.000000e+00> : vector<64x256xf32>
    %304 = tpu.matmul %303, %301, %cst_146 {dimension_numbers = #tpu.dot_dimension_numbers<[1], [0], [0], [1], [0, 0, 1, 1], [], []>} : vector<64x32xf32>, vector<32x256xf32>, vector<64x256xf32> -> vector<64x256xf32>
    %305 = arith.addf %296, %304 : vector<64x256xf32>
    %c0_147 = arith.constant 0 : index
    %c0_148 = arith.constant 0 : index
    %306 = vector.load %arg5[%c0_147, %c0_148] : memref<64x1xf32, #tpu.memory_space<vmem>>, vector<64x1xf32>
    %307 = vector.broadcast %306 : vector<64x1xf32> to vector<64x256xf32>
    %308 = arith.addf %305, %307 : vector<64x256xf32>
    %cst_149 = arith.constant 0.000000e+00 : f32
    %309 = vector.broadcast %cst_149 : f32 to vector<64x256xf32>
    %310 = arith.maximumf %308, %309 : vector<64x256xf32>
    %c1_i32_150 = arith.constant 1 : i32
    %311 = vector.broadcast %c1_i32_150 : i32 to vector<1x256xi32>
    %312 = arith.andi %6, %311 : vector<1x256xi32>
    %c0_i32_151 = arith.constant 0 : i32
    %313 = vector.broadcast %c0_i32_151 : i32 to vector<1x256xi32>
    %314 = arith.cmpi eq, %312, %313 : vector<1x256xi32>
    %c1_i32_152 = arith.constant 1 : i32
    %315 = vector.broadcast %c1_i32_152 : i32 to vector<1x256xi32>
    %316 = arith.andi %4, %315 : vector<1x256xi32>
    %c0_i32_153 = arith.constant 0 : i32
    %317 = vector.broadcast %c0_i32_153 : i32 to vector<1x256xi32>
    %318 = arith.cmpi eq, %316, %317 : vector<1x256xi32>
    %c255_i32_154 = arith.constant 255 : i32
    %319 = tpu.dynamic_rotate %310 by %c255_i32_154 dim 1 : vector<64x256xf32>, i32 -> vector<64x256xf32>
    %320 = arith.maximumf %310, %319 : vector<64x256xf32>
    %c1_i32_155 = arith.constant 1 : i32
    %321 = tpu.dynamic_rotate %320 by %c1_i32_155 dim 1 : vector<64x256xf32>, i32 -> vector<64x256xf32>
    %322 = vector.shape_cast %314 : vector<1x256xi1> to vector<1x256xi1>
    %323 = vector.broadcast %322 : vector<1x256xi1> to vector<64x256xi1>
    %324 = arith.select %323, %320, %321 : vector<64x256xi1>, vector<64x256xf32>
    %c240_i32_156 = arith.constant 240 : i32
    %325 = tpu.dynamic_rotate %324 by %c240_i32_156 dim 1 : vector<64x256xf32>, i32 -> vector<64x256xf32>
    %326 = arith.maximumf %324, %325 : vector<64x256xf32>
    %c16_i32_157 = arith.constant 16 : i32
    %327 = tpu.dynamic_rotate %326 by %c16_i32_157 dim 1 : vector<64x256xf32>, i32 -> vector<64x256xf32>
    %328 = vector.shape_cast %318 : vector<1x256xi1> to vector<1x256xi1>
    %329 = vector.broadcast %328 : vector<1x256xi1> to vector<64x256xi1>
    %330 = arith.select %329, %326, %327 : vector<64x256xi1>, vector<64x256xf32>
    %c0_158 = arith.constant 0 : index
    %c0_159 = arith.constant 0 : index
    %c0_160 = arith.constant 0 : index
    %331 = vector.load %arg6[%c0_158, %c0_159, %c0_160] : memref<4x64x64xf32, #tpu.memory_space<vmem>>, vector<1x64x64xf32>
    %332 = vector.shape_cast %331 : vector<1x64x64xf32> to vector<64x64xf32>
    %cst_161 = arith.constant dense<0.000000e+00> : vector<64x256xf32>
    %333 = tpu.matmul %332, %330, %cst_161 {dimension_numbers = #tpu.dot_dimension_numbers<[1], [0], [0], [1], [0, 0, 1, 1], [], []>} : vector<64x64xf32>, vector<64x256xf32>, vector<64x256xf32> -> vector<64x256xf32>
    %c1_162 = arith.constant 1 : index
    %c0_163 = arith.constant 0 : index
    %c0_164 = arith.constant 0 : index
    %334 = vector.load %arg6[%c1_162, %c0_163, %c0_164] : memref<4x64x64xf32, #tpu.memory_space<vmem>>, vector<1x64x64xf32>
    %335 = vector.shape_cast %334 : vector<1x64x64xf32> to vector<64x64xf32>
    %cst_165 = arith.constant dense<0.000000e+00> : vector<64x256xf32>
    %336 = tpu.matmul %335, %330, %cst_165 {dimension_numbers = #tpu.dot_dimension_numbers<[1], [0], [0], [1], [0, 0, 1, 1], [], []>} : vector<64x64xf32>, vector<64x256xf32>, vector<64x256xf32> -> vector<64x256xf32>
    %c2_166 = arith.constant 2 : index
    %c0_167 = arith.constant 0 : index
    %c0_168 = arith.constant 0 : index
    %337 = vector.load %arg6[%c2_166, %c0_167, %c0_168] : memref<4x64x64xf32, #tpu.memory_space<vmem>>, vector<1x64x64xf32>
    %338 = vector.shape_cast %337 : vector<1x64x64xf32> to vector<64x64xf32>
    %cst_169 = arith.constant dense<0.000000e+00> : vector<64x256xf32>
    %339 = tpu.matmul %338, %330, %cst_169 {dimension_numbers = #tpu.dot_dimension_numbers<[1], [0], [0], [1], [0, 0, 1, 1], [], []>} : vector<64x64xf32>, vector<64x256xf32>, vector<64x256xf32> -> vector<64x256xf32>
    %c3_170 = arith.constant 3 : index
    %c0_171 = arith.constant 0 : index
    %c0_172 = arith.constant 0 : index
    %340 = vector.load %arg6[%c3_170, %c0_171, %c0_172] : memref<4x64x64xf32, #tpu.memory_space<vmem>>, vector<1x64x64xf32>
    %341 = vector.shape_cast %340 : vector<1x64x64xf32> to vector<64x64xf32>
    %cst_173 = arith.constant dense<0.000000e+00> : vector<64x256xf32>
    %342 = tpu.matmul %341, %330, %cst_173 {dimension_numbers = #tpu.dot_dimension_numbers<[1], [0], [0], [1], [0, 0, 1, 1], [], []>} : vector<64x64xf32>, vector<64x256xf32>, vector<64x256xf32> -> vector<64x256xf32>
    %343 = vector.shape_cast %314 : vector<1x256xi1> to vector<1x256xi1>
    %344 = vector.broadcast %343 : vector<1x256xi1> to vector<64x256xi1>
    %345 = arith.select %344, %333, %336 : vector<64x256xi1>, vector<64x256xf32>
    %346 = vector.shape_cast %314 : vector<1x256xi1> to vector<1x256xi1>
    %347 = vector.broadcast %346 : vector<1x256xi1> to vector<64x256xi1>
    %348 = arith.select %347, %339, %342 : vector<64x256xi1>, vector<64x256xf32>
    %349 = vector.shape_cast %318 : vector<1x256xi1> to vector<1x256xi1>
    %350 = vector.broadcast %349 : vector<1x256xi1> to vector<64x256xi1>
    %351 = arith.select %350, %345, %348 : vector<64x256xi1>, vector<64x256xf32>
    %c0_174 = arith.constant 0 : index
    %c0_175 = arith.constant 0 : index
    %352 = vector.load %arg7[%c0_174, %c0_175] : memref<64x1xf32, #tpu.memory_space<vmem>>, vector<64x1xf32>
    %353 = vector.broadcast %352 : vector<64x1xf32> to vector<64x256xf32>
    %354 = arith.addf %351, %353 : vector<64x256xf32>
    %cst_176 = arith.constant 0.000000e+00 : f32
    %355 = vector.broadcast %cst_176 : f32 to vector<64x256xf32>
    %356 = arith.maximumf %354, %355 : vector<64x256xf32>
    %c17_i32_177 = arith.constant 17 : i32
    %357 = tpu.dynamic_rotate %356 by %c17_i32_177 dim 1 : vector<64x256xf32>, i32 -> vector<64x256xf32>
    %cst_178 = arith.constant 0.000000e+00 : f32
    %358 = vector.shape_cast %21 : vector<1x256xi1> to vector<1x256xi1>
    %359 = vector.broadcast %358 : vector<1x256xi1> to vector<64x256xi1>
    %360 = vector.broadcast %cst_178 : f32 to vector<64x256xf32>
    %361 = arith.select %359, %357, %360 : vector<64x256xi1>, vector<64x256xf32>
    %c0_179 = arith.constant 0 : index
    %c0_180 = arith.constant 0 : index
    %c0_181 = arith.constant 0 : index
    %362 = vector.load %arg8[%c0_179, %c0_180, %c0_181] : memref<9x3x64xf32, #tpu.memory_space<vmem>>, vector<1x3x64xf32>
    %363 = vector.shape_cast %362 : vector<1x3x64xf32> to vector<3x64xf32>
    %cst_182 = arith.constant dense<0.000000e+00> : vector<3x256xf32>
    %364 = tpu.matmul %363, %361, %cst_182 {dimension_numbers = #tpu.dot_dimension_numbers<[1], [0], [0], [1], [0, 0, 1, 1], [], []>} : vector<3x64xf32>, vector<64x256xf32>, vector<3x256xf32> -> vector<3x256xf32>
    %c16_i32_183 = arith.constant 16 : i32
    %365 = tpu.dynamic_rotate %356 by %c16_i32_183 dim 1 : vector<64x256xf32>, i32 -> vector<64x256xf32>
    %cst_184 = arith.constant 0.000000e+00 : f32
    %366 = vector.shape_cast %36 : vector<1x256xi1> to vector<1x256xi1>
    %367 = vector.broadcast %366 : vector<1x256xi1> to vector<64x256xi1>
    %368 = vector.broadcast %cst_184 : f32 to vector<64x256xf32>
    %369 = arith.select %367, %365, %368 : vector<64x256xi1>, vector<64x256xf32>
    %c1_185 = arith.constant 1 : index
    %c0_186 = arith.constant 0 : index
    %c0_187 = arith.constant 0 : index
    %370 = vector.load %arg8[%c1_185, %c0_186, %c0_187] : memref<9x3x64xf32, #tpu.memory_space<vmem>>, vector<1x3x64xf32>
    %371 = vector.shape_cast %370 : vector<1x3x64xf32> to vector<3x64xf32>
    %cst_188 = arith.constant dense<0.000000e+00> : vector<3x256xf32>
    %372 = tpu.matmul %371, %369, %cst_188 {dimension_numbers = #tpu.dot_dimension_numbers<[1], [0], [0], [1], [0, 0, 1, 1], [], []>} : vector<3x64xf32>, vector<64x256xf32>, vector<3x256xf32> -> vector<3x256xf32>
    %373 = arith.addf %364, %372 : vector<3x256xf32>
    %c15_i32_189 = arith.constant 15 : i32
    %374 = tpu.dynamic_rotate %356 by %c15_i32_189 dim 1 : vector<64x256xf32>, i32 -> vector<64x256xf32>
    %cst_190 = arith.constant 0.000000e+00 : f32
    %375 = vector.shape_cast %51 : vector<1x256xi1> to vector<1x256xi1>
    %376 = vector.broadcast %375 : vector<1x256xi1> to vector<64x256xi1>
    %377 = vector.broadcast %cst_190 : f32 to vector<64x256xf32>
    %378 = arith.select %376, %374, %377 : vector<64x256xi1>, vector<64x256xf32>
    %c2_191 = arith.constant 2 : index
    %c0_192 = arith.constant 0 : index
    %c0_193 = arith.constant 0 : index
    %379 = vector.load %arg8[%c2_191, %c0_192, %c0_193] : memref<9x3x64xf32, #tpu.memory_space<vmem>>, vector<1x3x64xf32>
    %380 = vector.shape_cast %379 : vector<1x3x64xf32> to vector<3x64xf32>
    %cst_194 = arith.constant dense<0.000000e+00> : vector<3x256xf32>
    %381 = tpu.matmul %380, %378, %cst_194 {dimension_numbers = #tpu.dot_dimension_numbers<[1], [0], [0], [1], [0, 0, 1, 1], [], []>} : vector<3x64xf32>, vector<64x256xf32>, vector<3x256xf32> -> vector<3x256xf32>
    %382 = arith.addf %373, %381 : vector<3x256xf32>
    %c1_i32_195 = arith.constant 1 : i32
    %383 = tpu.dynamic_rotate %356 by %c1_i32_195 dim 1 : vector<64x256xf32>, i32 -> vector<64x256xf32>
    %cst_196 = arith.constant 0.000000e+00 : f32
    %384 = vector.shape_cast %66 : vector<1x256xi1> to vector<1x256xi1>
    %385 = vector.broadcast %384 : vector<1x256xi1> to vector<64x256xi1>
    %386 = vector.broadcast %cst_196 : f32 to vector<64x256xf32>
    %387 = arith.select %385, %383, %386 : vector<64x256xi1>, vector<64x256xf32>
    %c3_197 = arith.constant 3 : index
    %c0_198 = arith.constant 0 : index
    %c0_199 = arith.constant 0 : index
    %388 = vector.load %arg8[%c3_197, %c0_198, %c0_199] : memref<9x3x64xf32, #tpu.memory_space<vmem>>, vector<1x3x64xf32>
    %389 = vector.shape_cast %388 : vector<1x3x64xf32> to vector<3x64xf32>
    %cst_200 = arith.constant dense<0.000000e+00> : vector<3x256xf32>
    %390 = tpu.matmul %389, %387, %cst_200 {dimension_numbers = #tpu.dot_dimension_numbers<[1], [0], [0], [1], [0, 0, 1, 1], [], []>} : vector<3x64xf32>, vector<64x256xf32>, vector<3x256xf32> -> vector<3x256xf32>
    %391 = arith.addf %382, %390 : vector<3x256xf32>
    %cst_201 = arith.constant 0.000000e+00 : f32
    %392 = vector.shape_cast %81 : vector<1x256xi1> to vector<1x256xi1>
    %393 = vector.broadcast %392 : vector<1x256xi1> to vector<64x256xi1>
    %394 = vector.broadcast %cst_201 : f32 to vector<64x256xf32>
    %395 = arith.select %393, %356, %394 : vector<64x256xi1>, vector<64x256xf32>
    %c4_202 = arith.constant 4 : index
    %c0_203 = arith.constant 0 : index
    %c0_204 = arith.constant 0 : index
    %396 = vector.load %arg8[%c4_202, %c0_203, %c0_204] : memref<9x3x64xf32, #tpu.memory_space<vmem>>, vector<1x3x64xf32>
    %397 = vector.shape_cast %396 : vector<1x3x64xf32> to vector<3x64xf32>
    %cst_205 = arith.constant dense<0.000000e+00> : vector<3x256xf32>
    %398 = tpu.matmul %397, %395, %cst_205 {dimension_numbers = #tpu.dot_dimension_numbers<[1], [0], [0], [1], [0, 0, 1, 1], [], []>} : vector<3x64xf32>, vector<64x256xf32>, vector<3x256xf32> -> vector<3x256xf32>
    %399 = arith.addf %391, %398 : vector<3x256xf32>
    %c255_i32_206 = arith.constant 255 : i32
    %400 = tpu.dynamic_rotate %356 by %c255_i32_206 dim 1 : vector<64x256xf32>, i32 -> vector<64x256xf32>
    %cst_207 = arith.constant 0.000000e+00 : f32
    %401 = vector.shape_cast %96 : vector<1x256xi1> to vector<1x256xi1>
    %402 = vector.broadcast %401 : vector<1x256xi1> to vector<64x256xi1>
    %403 = vector.broadcast %cst_207 : f32 to vector<64x256xf32>
    %404 = arith.select %402, %400, %403 : vector<64x256xi1>, vector<64x256xf32>
    %c5_208 = arith.constant 5 : index
    %c0_209 = arith.constant 0 : index
    %c0_210 = arith.constant 0 : index
    %405 = vector.load %arg8[%c5_208, %c0_209, %c0_210] : memref<9x3x64xf32, #tpu.memory_space<vmem>>, vector<1x3x64xf32>
    %406 = vector.shape_cast %405 : vector<1x3x64xf32> to vector<3x64xf32>
    %cst_211 = arith.constant dense<0.000000e+00> : vector<3x256xf32>
    %407 = tpu.matmul %406, %404, %cst_211 {dimension_numbers = #tpu.dot_dimension_numbers<[1], [0], [0], [1], [0, 0, 1, 1], [], []>} : vector<3x64xf32>, vector<64x256xf32>, vector<3x256xf32> -> vector<3x256xf32>
    %408 = arith.addf %399, %407 : vector<3x256xf32>
    %c241_i32_212 = arith.constant 241 : i32
    %409 = tpu.dynamic_rotate %356 by %c241_i32_212 dim 1 : vector<64x256xf32>, i32 -> vector<64x256xf32>
    %cst_213 = arith.constant 0.000000e+00 : f32
    %410 = vector.shape_cast %111 : vector<1x256xi1> to vector<1x256xi1>
    %411 = vector.broadcast %410 : vector<1x256xi1> to vector<64x256xi1>
    %412 = vector.broadcast %cst_213 : f32 to vector<64x256xf32>
    %413 = arith.select %411, %409, %412 : vector<64x256xi1>, vector<64x256xf32>
    %c6_214 = arith.constant 6 : index
    %c0_215 = arith.constant 0 : index
    %c0_216 = arith.constant 0 : index
    %414 = vector.load %arg8[%c6_214, %c0_215, %c0_216] : memref<9x3x64xf32, #tpu.memory_space<vmem>>, vector<1x3x64xf32>
    %415 = vector.shape_cast %414 : vector<1x3x64xf32> to vector<3x64xf32>
    %cst_217 = arith.constant dense<0.000000e+00> : vector<3x256xf32>
    %416 = tpu.matmul %415, %413, %cst_217 {dimension_numbers = #tpu.dot_dimension_numbers<[1], [0], [0], [1], [0, 0, 1, 1], [], []>} : vector<3x64xf32>, vector<64x256xf32>, vector<3x256xf32> -> vector<3x256xf32>
    %417 = arith.addf %408, %416 : vector<3x256xf32>
    %c240_i32_218 = arith.constant 240 : i32
    %418 = tpu.dynamic_rotate %356 by %c240_i32_218 dim 1 : vector<64x256xf32>, i32 -> vector<64x256xf32>
    %cst_219 = arith.constant 0.000000e+00 : f32
    %419 = vector.shape_cast %126 : vector<1x256xi1> to vector<1x256xi1>
    %420 = vector.broadcast %419 : vector<1x256xi1> to vector<64x256xi1>
    %421 = vector.broadcast %cst_219 : f32 to vector<64x256xf32>
    %422 = arith.select %420, %418, %421 : vector<64x256xi1>, vector<64x256xf32>
    %c7_220 = arith.constant 7 : index
    %c0_221 = arith.constant 0 : index
    %c0_222 = arith.constant 0 : index
    %423 = vector.load %arg8[%c7_220, %c0_221, %c0_222] : memref<9x3x64xf32, #tpu.memory_space<vmem>>, vector<1x3x64xf32>
    %424 = vector.shape_cast %423 : vector<1x3x64xf32> to vector<3x64xf32>
    %cst_223 = arith.constant dense<0.000000e+00> : vector<3x256xf32>
    %425 = tpu.matmul %424, %422, %cst_223 {dimension_numbers = #tpu.dot_dimension_numbers<[1], [0], [0], [1], [0, 0, 1, 1], [], []>} : vector<3x64xf32>, vector<64x256xf32>, vector<3x256xf32> -> vector<3x256xf32>
    %426 = arith.addf %417, %425 : vector<3x256xf32>
    %c239_i32_224 = arith.constant 239 : i32
    %427 = tpu.dynamic_rotate %356 by %c239_i32_224 dim 1 : vector<64x256xf32>, i32 -> vector<64x256xf32>
    %cst_225 = arith.constant 0.000000e+00 : f32
    %428 = vector.shape_cast %141 : vector<1x256xi1> to vector<1x256xi1>
    %429 = vector.broadcast %428 : vector<1x256xi1> to vector<64x256xi1>
    %430 = vector.broadcast %cst_225 : f32 to vector<64x256xf32>
    %431 = arith.select %429, %427, %430 : vector<64x256xi1>, vector<64x256xf32>
    %c8_226 = arith.constant 8 : index
    %c0_227 = arith.constant 0 : index
    %c0_228 = arith.constant 0 : index
    %432 = vector.load %arg8[%c8_226, %c0_227, %c0_228] : memref<9x3x64xf32, #tpu.memory_space<vmem>>, vector<1x3x64xf32>
    %433 = vector.shape_cast %432 : vector<1x3x64xf32> to vector<3x64xf32>
    %cst_229 = arith.constant dense<0.000000e+00> : vector<3x256xf32>
    %434 = tpu.matmul %433, %431, %cst_229 {dimension_numbers = #tpu.dot_dimension_numbers<[1], [0], [0], [1], [0, 0, 1, 1], [], []>} : vector<3x64xf32>, vector<64x256xf32>, vector<3x256xf32> -> vector<3x256xf32>
    %435 = arith.addf %426, %434 : vector<3x256xf32>
    %c0_230 = arith.constant 0 : index
    %c0_231 = arith.constant 0 : index
    %436 = vector.load %arg9[%c0_230, %c0_231] : memref<3x1xf32, #tpu.memory_space<vmem>>, vector<3x1xf32>
    %437 = vector.broadcast %436 : vector<3x1xf32> to vector<3x256xf32>
    %438 = arith.addf %435, %437 : vector<3x256xf32>
    %cst_232 = arith.constant 0.000000e+00 : f32
    %439 = vector.broadcast %cst_232 : f32 to vector<3x256xf32>
    %440 = arith.maximumf %438, %439 : vector<3x256xf32>
    %c0_233 = arith.constant 0 : index
    %c0_234 = arith.constant 0 : index
    %441 = vector.load %arg10[%c0_233, %c0_234] : memref<3x256xf32, #tpu.memory_space<vmem>>, vector<3x256xf32>
    tpu.vector_store %arg10[%c0_233, %c0_234], %440 {strides = array<i32>} : memref<3x256xf32, #tpu.memory_space<vmem>>, vector<3x256xf32>,
    return
  }
  func.func @transform_0(%arg0: i32) -> (i32, i32) {
    %c0_i32 = arith.constant 0 : i32
    %c0_i32_0 = arith.constant 0 : i32
    return %c0_i32, %arg0 : i32, i32
  }
  func.func @transform_1(%arg0: i32) -> (i32, i32, i32) {
    %c0_i32 = arith.constant 0 : i32
    %c0_i32_0 = arith.constant 0 : i32
    %c0_i32_1 = arith.constant 0 : i32
    %c0_i32_2 = arith.constant 0 : i32
    return %c0_i32, %c0_i32_0, %c0_i32_1 : i32, i32, i32
  }
  func.func @transform_2(%arg0: i32) -> (i32, i32) {
    %c0_i32 = arith.constant 0 : i32
    %c0_i32_0 = arith.constant 0 : i32
    %c0_i32_1 = arith.constant 0 : i32
    return %c0_i32, %c0_i32_0 : i32, i32
  }
  func.func @transform_3(%arg0: i32) -> (i32, i32, i32) {
    %c0_i32 = arith.constant 0 : i32
    %c0_i32_0 = arith.constant 0 : i32
    %c0_i32_1 = arith.constant 0 : i32
    %c0_i32_2 = arith.constant 0 : i32
    return %c0_i32, %c0_i32_0, %c0_i32_1 : i32, i32, i32
  }
  func.func @transform_4(%arg0: i32) -> (i32, i32) {
    %c0_i32 = arith.constant 0 : i32
    %c0_i32_0 = arith.constant 0 : i32
    %c0_i32_1 = arith.constant 0 : i32
    return %c0_i32, %c0_i32_0 : i32, i32
  }
  func.func @transform_5(%arg0: i32) -> (i32, i32, i32) {
    %c0_i32 = arith.constant 0 : i32
    %c0_i32_0 = arith.constant 0 : i32
    %c0_i32_1 = arith.constant 0 : i32
    %c0_i32_2 = arith.constant 0 : i32
    return %c0_i32, %c0_i32_0, %c0_i32_1 : i32, i32, i32
  }
  func.func @transform_6(%arg0: i32) -> (i32, i32) {
    %c0_i32 = arith.constant 0 : i32
    %c0_i32_0 = arith.constant 0 : i32
    %c0_i32_1 = arith.constant 0 : i32
    return %c0_i32, %c0_i32_0 : i32, i32
  }
  func.func @transform_7(%arg0: i32) -> (i32, i32, i32) {
    %c0_i32 = arith.constant 0 : i32
    %c0_i32_0 = arith.constant 0 : i32
    %c0_i32_1 = arith.constant 0 : i32
    %c0_i32_2 = arith.constant 0 : i32
    return %c0_i32, %c0_i32_0, %c0_i32_1 : i32, i32, i32
  }
  func.func @transform_8(%arg0: i32) -> (i32, i32) {
    %c0_i32 = arith.constant 0 : i32
    %c0_i32_0 = arith.constant 0 : i32
    %c0_i32_1 = arith.constant 0 : i32
    return %c0_i32, %c0_i32_0 : i32, i32
  }
  func.func @transform_9(%arg0: i32) -> (i32, i32) {
    %c0_i32 = arith.constant 0 : i32
    %c0_i32_0 = arith.constant 0 : i32
    return %c0_i32, %arg0 : i32, i32
  }
}

</mosaic_0001>

<bundles_post_ra>
// kernel: student_forward.1
= control target key start
LH: loop header
LB: loop body
LE: loop exit
PB: predicated region body
PF: predicated region fallthrough
CT: control target
= control target key end

     0   :  { %s5692_s30 = smov 0   ;;  %s9745_s0 = inlined_call_operand.vmem [shape: f32[3,512], index: 0, kind: input, shape index: {}]   ;;  %s9746_s1 = inlined_call_operand.vmem [shape: f32[9,32,3], index: 1, kind: input, shape index: {}]   ;;  %s9747_s2 = inlined_call_operand.vmem [shape: f32[32,1], index: 2, kind: input, shape index: {}]   ;;  %s9748_s3 = inlined_call_operand.vmem [shape: f32[9,64,32], index: 3, kind: input, shape index: {}]   ;;  %s9749_s4 = inlined_call_operand.vmem [shape: f32[64,1], index: 4, kind: input, shape index: {}]   ;;  %s9750_s5 = inlined_call_operand.vmem [shape: f32[4,64,64], index: 5, kind: input, shape index: {}]   ;;  %s9751_s6 = inlined_call_operand.vmem [shape: f32[64,1], index: 6, kind: input, shape index: {}]   ;;  %s9752_s7 = inlined_call_operand.vmem [shape: f32[9,3,64], index: 7, kind: input, shape index: {}]   ;;  %s9753_s8 = inlined_call_operand.vmem [shape: f32[3,1], index: 8, kind: input, shape index: {}]   ;;  %s9754_s9 = inlined_call_operand.vmem [shape: f32[3,512], index: 9, kind: output, shape index: {}]  }
   0x1 LB: > { %s4772_s10 = sadd.s32 4294967295, %s5631_s30   ;;  %p4776_p0 = scmp.ge.s32.totalorder %s5631_s30, 1  ;;  %s5631_s30 = sphi %s5692_s30, %s19_s30  }
   0x2   : > { %p288_p1 = scmp.lt.s32.totalorder %s5631_s30, 3 }
   0x4   : > { %p289_p2 = pnand %p4776_p0, %p288_p1 }
   0x6   : > { %292 = sbr.rel (%p289_p2) target bundleno = 2337 (0x921), region = 56 }
   0xb   : > { %s4777_s11 = sshll.u32 %s4772_s10, 1  ;;  %s5633_s16 = smov 17   ;;  %v336_v17 = vlaneseq  ;;  %v9889_v36 = vmov 0  ;;  %v9892_v37 = vmov 0  ;;  %v9895_v40 = vmov 0  ;;  %v4781_v51 = vld [vmem:[%s9746_s1 + $0x20] sm:$0xff] }
   0xc   : > { %p325_p3 = scmp.lt.s32.totalorder %s4777_s11, 3  ;;  %s5634_s17 = smov 16   ;;  %v9898_v43 = vmov 0  ;;  %v9901_v48 = vmov 0  ;;  %v4784_v52 = vld [vmem:[%s9746_s1 + $0x38] sm:$0xff]  ;;  %v9904_v54 = vmov 0 }
   0xd   : > { %s5635_s18 = smov 15   ;;  %s5636_s19 = smov 1   ;;  %v5726_v19 = vand.u32 127, %v336_v17  ;;  %v9907_v56 = vmov 0  ;;  %v9910_v59 = vmov 0  ;;  %v9914_v62 = vmov 0 }
   0xe   : > { %s10660_s11 = smov (!%p325_p3, %s4777_s11), 3  ;;  %s5637_s20 = smov 127   ;;  %v9921_v17 = vmov 0 }
   0xf   : > { %s4778_s12 = sshll.u32 %s10660_s11, 2  ;;  %s5638_s21 = smov 113   ;;  %9884 = vst [vmem:[#allocation2_spill] sm:$0xff] %v5726_v19  ;;  %v338_v20 = vadd.s32 128, %v5726_v19  ;;  %v339_v21 = vshra.s32 %v5726_v19, 4  ;;  %v5736_v26 = vand.u32 15, %v5726_v19 }
  0x10   : > { %s328_s15 = scalar_lea.vmem %s9745_s0, %s4778_s12  ;;  %s5639_s22 = smov 112   ;;  %vm9758_vm7 = vcmp.lt.s32.totalorder %v5726_v19, 16  ;;  %vm9757_vm9 = vcmp.lt.s32.totalorder %v5726_v19, 17  ;;  %vm9759_vm14 = vcmp.lt.s32.totalorder %v5726_v19, 15 }
  0x11   : > { %v419_v0 = vld [vmem:[%s328_s15] sm:$0x77]  ;;  %s5640_s23 = smov 111   ;;  %v340_v22 = vshra.s32 %v338_v20, 4  ;;  %v5731_v23 = vand.u32 15, %v339_v21  ;;  %9887 = vst [vmem:[#allocation5_spill] sm:$0xff] %v5736_v26 }
  0x12   : > { %421 = vst [vmem:[#allocation1] ss:$2 sm:$0xff] %v419_v0  ;;  %v5738_v28 = vand.u32 15, %v338_v20  ;;  %v5743_v32 = vadd.s32 4294967295, %v5736_v26  ;;  %v5749_v34 = vadd.s32 1, %v5736_v26  ;;  %v9925_v20 = vmov 0 }
  0x13   : > { %9885 = vst [vmem:[#allocation3_spill] sm:$0xff] %v5731_v23  ;;  %v5733_v24 = vand.u32 15, %v340_v22  ;;  %v345_v29 = vadd.s32 4294967295, %v5731_v23  ;;  %vm381_vm11 = vcmp.ge.s32.totalorder %v5731_v23, 0  ;;  %vm383_vm12 = vcmp.lt.s32.totalorder %v5731_v23, 16 }
  0x14   : > { %9888 = vst [vmem:[#allocation6_spill] sm:$0xff] %v5738_v28  ;;  %v5746_v33 = vadd.s32 4294967295, %v5738_v28  ;;  %v5752_v35 = vadd.s32 1, %v5738_v28  ;;  %vm9755_vm4 = vcmp.ge.s32.totalorder %v5743_v32, 0  ;;  %vm9763_vm10 = vcmp.lt.s32.totalorder %v5749_v34, 16 }
  0x15   : > { %9886 = vst [vmem:[#allocation4_spill] sm:$0xff] %v5733_v24  ;;  %v346_v30 = vadd.s32 4294967295, %v5733_v24  ;;  %vm349_vm0 = vcmp.ge.s32.totalorder %v345_v29, 0  ;;  %vm351_vm1 = vcmp.lt.s32.totalorder %v345_v29, 16  ;;  %v4807_v29 = vld [vmem:[%s9746_s1 + $0x50] sm:$0xff] }
  0x16   : > { %vm5755_vm5 = vmand %vm349_vm0, %vm351_vm1  ;;  %vm9756_vm6 = vcmp.ge.s32.totalorder %v5746_v33, 0  ;;  %vm9760_vm15 = vcmp.lt.s32.totalorder %v5752_v35, 16  ;;  %vm9762_vm0 = vcmask 1042432   ;;  %vm382_vm1 = vcmp.ge.s32.totalorder %v5733_v24, 0 }
  0x17   : > { %vm350_vm2 = vcmp.ge.s32.totalorder %v346_v30, 0  ;;  %vm352_vm3 = vcmp.lt.s32.totalorder %v346_v30, 16  ;;  %v9890_v36 = vsel %vm5755_vm5, 4294967295, %v9889_v36  ;;  %vm5773_vm13 = vmand %vm5755_vm5, %vm9755_vm4  ;;  %v4819_v30 = vld [vmem:[%s9746_s1 + $0x60] sm:$0xff] }
  0x18   : > { %9891 = vst [vmem:[#allocation7_spill] sm:$0xff] %v9890_v36  ;;  %vm5761_vm8 = vmand %vm350_vm2, %vm352_vm3  ;;  %v9896_v40 = vsel %vm5773_vm13, 4294967295, %v9895_v40  ;;  %vm384_vm2 = vcmp.lt.s32.totalorder %v5733_v24, 16  ;;  %vm9764_vm3 = vcmask 23552  }
  0x19   : > { %v422_v1 = vld.sshfl [vmem:[#allocation1] sm:$0xff pattern:$0x75316420]  ;;  %v423_v2 = vld.sshfl [vmem:[#allocation1 + $0x8] sm:$0xff pattern:$0x75316420]  ;;  %vm5786_vm4 = vmand %vm5761_vm8, %vm9756_vm6 }
  0x1a   : > { %443 = vst [vmem:[#allocation1] ss:$2 sm:$0xff] %v419_v0  ;;  %426 = vrot.lane.b32.xlu1 %v422_v1, %s5633_s16  ;;  %v9893_v37 = vsel %vm5761_vm8, 4294967295, %v9892_v37  ;;  %v9899_v43 = vsel %vm5786_vm4, 4294967295, %v9898_v43  ;;  %vm5802_vm6 = vmand %vm5755_vm5, %vm9763_vm10 }
  0x1b   : > { %9894 = vst [vmem:[#allocation8_spill] sm:$0xff] %v9893_v37  ;;  %v9902_v48 = vsel %vm5802_vm6, 4294967295, %v9901_v48 }
  0x1c   : > { %9897 = vst [vmem:[#allocation9_spill] sm:$0xff] %v9896_v40 }
  0x1d   : > { %9900 = vst [vmem:[#allocation10_spill] sm:$0xff] %v9899_v43 }
  0x1e   : > { %9903 = vst [vmem:[#allocation11_spill] sm:$0xff] %v9902_v48 }
  0x21   : > { %v444_v3 = vld.sshfl [vmem:[#allocation1] sm:$0xff pattern:$0x75316420]  ;;  %v445_v4 = vld.sshfl [vmem:[#allocation1 + $0x8] sm:$0xff pattern:$0x75316420] }
  0x22   : > { %448 = vrot.lane.b32.xlu0 %v444_v3, %s5634_s17  ;;  %620 = vst [vmem:[#allocation1] ss:$2 sm:$0xff] %v419_v0  ;;  %428 = vrot.lane.b32.xlu1 %v423_v2, %s5633_s16  ;;  %v4782_v2 = vld [vmem:[%s9746_s1 + $0x28] sm:$0xff]  ;;  %v439_v3 = vld [vmem:[%s9746_s1] sm:$0xff] }
  0x29   : > { %v621_v5 = vld.sshfl [vmem:[#allocation1] sm:$0xff pattern:$0x75316420]  ;;  %v622_v6 = vld.sshfl [vmem:[#allocation1 + $0x8] sm:$0xff pattern:$0x75316420] }
  0x2a   : > { %450 = vrot.lane.b32.xlu0 %v445_v4, %s5634_s17  ;;  %625 = vrot.lane.b32.xlu2 %v621_v5, %s5635_s18  ;;  %727 = vst [vmem:[#allocation1] ss:$2 sm:$0xff] %v419_v0 }
  0x31   : > { %v729_v7 = vld.sshfl [vmem:[#allocation1 + $0x8] sm:$0xff pattern:$0x75316420]  ;;  %v728_v8 = vld.sshfl [vmem:[#allocation1] sm:$0xff pattern:$0x75316420] }
  0x32   : > { %627 = vrot.lane.b32.xlu2 %v622_v6, %s5635_s18  ;;  %734 = vrot.lane.b32.xlu1 %v729_v7, %s5636_s19  ;;  %838 = vst [vmem:[#allocation1] ss:$2 sm:$0xff] %v419_v0 }
  0x33   : > { %732 = vrot.lane.b32.xlu0 %v728_v8, %s5636_s19  ;;  %v4783_v8 = vld [vmem:[%s9746_s1 + $0x30] sm:$0xff] }
  0x39   : > { %v5716_v9 = vld.sshfl [vmem:[#allocation1] sm:$0xff pattern:$0x75316420]  ;;  %v5718_v10 = vld.sshfl [vmem:[#allocation1 + $0x8] sm:$0xff pattern:$0x75316420] }
  0x3a   : > { %934 = vst [vmem:[#allocation1] ss:$2 sm:$0xff] %v419_v0 }
  0x41   : > { %v936_v11 = vld.sshfl [vmem:[#allocation1 + $0x8] sm:$0xff pattern:$0x75316420]  ;;  %v935_v12 = vld.sshfl [vmem:[#allocation1] sm:$0xff pattern:$0x75316420] }
  0x42   : > { %941 = vrot.lane.b32.xlu0 %v936_v11, %s5637_s20  ;;  %1041 = vst [vmem:[#allocation1] ss:$2 sm:$0xff] %v419_v0  ;;  %939 = vrot.lane.b32.xlu2 %v935_v12, %s5637_s20  ;;  %v440_v11 = vld [vmem:[%s9746_s1 + $0x8] sm:$0xff] }
  0x49   : > { %v1042_v13 = vld.sshfl [vmem:[#allocation1] sm:$0xff pattern:$0x75316420]  ;;  %v1043_v14 = vld.sshfl [vmem:[#allocation1 + $0x8] sm:$0xff pattern:$0x75316420] }
  0x4a   : > { %1046 = vrot.lane.b32.xlu1 %v1042_v13, %s5638_s21  ;;  %1148 = vst [vmem:[#allocation1] ss:$2 sm:$0xff] %v419_v0  ;;  %1048 = vrot.lane.b32.xlu2 %v1043_v14, %s5638_s21  ;;  %v441_v14 = vld [vmem:[%s9746_s1 + $0x10] sm:$0xff] }
  0x51   : > { %v1150_v15 = vld.sshfl [vmem:[#allocation1 + $0x8] sm:$0xff pattern:$0x75316420]  ;;  %v1149_v16 = vld.sshfl [vmem:[#allocation1] sm:$0xff pattern:$0x75316420] }
  0x52   : > { %1155 = vrot.lane.b32.xlu1 %v1150_v15, %s5639_s22  ;;  %1153 = vrot.lane.b32.xlu0 %v1149_v16, %s5639_s22  ;;  %1255 = vst [vmem:[#allocation1] ss:$2 sm:$0xff] %v419_v0  ;;  %v9918_v0 = vmov 0  ;;  %v4805_v15 = vld [vmem:[%s9746_s1 + $0x40] sm:$0xff] }
  0x59   : > { %v1257_v18 = vld.sshfl [vmem:[#allocation1 + $0x8] sm:$0xff pattern:$0x75316420]  ;;  %v1256_v39 = vld.sshfl [vmem:[#allocation1] sm:$0xff pattern:$0x75316420] }
  0x5a   : > { %1262 = vrot.lane.b32.xlu0 %v1257_v18, %s5640_s23  ;;  %1260 = vrot.lane.b32.xlu2 %v1256_v39, %s5640_s23  ;;  %v4808_v39 = vld [vmem:[%s9746_s1 + $0x58] sm:$0xff] }
  0x84   : > { %v626_v27 = vpop.permute.xlu2 %625 }
  0x8c   : > { %v427_v25 = vpop.permute.xlu1 %426  ;;  %v628_v41 = vpop.permute.xlu2 %627 }
  0x8d   : > { %v631_v53 = vsel %vm9759_vm14, %v628_v41, %v626_v27  ;;  %v630_v55 = vsel %vm9759_vm14, %v626_v27, %v628_v41  ;;  %vm5848_vm14 = vmand %vm382_vm1, %vm384_vm2  ;;  %vm9917_vm2 = vcmp.ge.s32.totalorder %v5746_v33, 0  ;;  %v4820_v41 = vld [vmem:[%s9746_s1 + $0x68] sm:$0xff] }
  0x8e   : > { %v9911_v59 = vsel %vm5848_vm14, 4294967295, %v9910_v59  ;;  %v636_v60 = vsel %vm5802_vm6, %v631_v53, 0.0  ;;  %v844_v13 = vsel %vm5848_vm14, %v5718_v10, 0.0  ;;  %v4806_v10 = vld [vmem:[%s9746_s1 + $0x48] sm:$0xff]  ;;  %v4833_v53 = vld [vmem:[%s9746_s1 + $0x80] sm:$0xff] }
  0x8f   : > { %9912 = vst [vmem:[#allocation14_spill] sm:$0xff] %v9911_v59 }
  0x94   : > { %v449_v31 = vpop.permute.xlu0 %448  ;;  %v429_v38 = vpop.permute.xlu1 %428 }
  0x95   : > { %v432_v46 = vsel %vm9757_vm9, %v429_v38, %v427_v25  ;;  %v431_v47 = vsel %vm9757_vm9, %v427_v25, %v429_v38  ;;  %vm5822_vm9 = vmand %vm5761_vm8, %vm9760_vm15  ;;  %v400_v38 = vadd.s32 1, %v5733_v24 }
  0x96   : > { %v9905_v54 = vsel %vm5822_vm9, 4294967295, %v9904_v54  ;;  %v437_v57 = vsel %vm5773_vm13, %v432_v46, 0.0  ;;  %v438_v58 = vsel %vm5786_vm4, %v431_v47, 0.0  ;;  %v637_v61 = vsel %vm5822_vm9, %v630_v55, 0.0  ;;  %vm5877_vm15 = vmand %vm5848_vm14, %vm9917_vm2  ;;  %v4822_v55 = vld [vmem:[%s9746_s1 + $0x78] sm:$0xff] }
  0x97   : > { %9906 = vst [vmem:[#allocation12_spill] sm:$0xff] %v9905_v54  ;;  %v9919_v0 = vsel %vm5877_vm15, 4294967295, %v9918_v0  ;;  %v9944_v46 = vmov 0 }
  0x98   : > { %9920 = vst [vmem:[#allocation16_spill] sm:$0xff] %v9919_v0 }
  0x9c   : > { %v451_v42 = vpop.permute.xlu0 %450  ;;  %v940_v18 = vpop.permute.xlu2 %939 }
  0x9d   : > { %v454_v44 = vsel %vm9758_vm7, %v451_v42, %v449_v31  ;;  %v453_v45 = vsel %vm9758_vm7, %v449_v31, %v451_v42  ;;  %vm5834_vm7 = vmand %vm381_vm11, %vm383_vm12  ;;  %vm9761_vm11 = vcmp.lt.s32.totalorder %v5726_v19, 1  ;;  %vm9913_vm12 = vcmp.ge.s32.totalorder %v5743_v32, 0 }
  0x9e   : > { %v459_v49 = vsel %vm5755_vm5, %v454_v44, 0.0  ;;  %v460_v50 = vsel %vm5761_vm8, %v453_v45, 0.0  ;;  %v9908_v56 = vsel %vm5834_vm7, 4294967295, %v9907_v56  ;;  %vm5867_vm1 = vmand %vm5834_vm7, %vm9913_vm12  ;;  %v843_v12 = vsel %vm5834_vm7, %v5716_v9, 0.0  ;;  %v442_v9 = vld [vmem:[%s9746_s1 + $0x18] sm:$0xff] }
  0x9f   : > { %4785 = vmatpush.msk.msra.mxu0 %vm9762_vm0, %v459_v49  ;;  %5443 = vmatpush.msk.msra.mxu2 %vm9762_vm0, %v459_v49  ;;  %9909 = vst [vmem:[#allocation13_spill] sm:$0xff] %v9908_v56  ;;  %v9915_v62 = vsel %vm5867_vm1, 4294967295, %v9914_v62  ;;  %vm9765_vm12 = vcmp.lt.s32.totalorder %v5726_v19, 127  ;;  %vm5944_vm2 = vmand %vm5834_vm7, %vm9763_vm10  ;;  %vm9928_vm10 = vcmask 1042432   ;;  %v399_v31 = vadd.s32 1, %v5731_v23 }
  0xa0   : > { %4790 = vmatpush.msk.msra.mxu1 %vm9762_vm0, %v460_v50  ;;  %5444 = vmatpush.msk.msra.mxu3 %vm9762_vm0, %v460_v50  ;;  %9916 = vst [vmem:[#allocation15_spill] sm:$0xff] %v9915_v62  ;;  %v9922_v17 = vsel %vm5944_vm2, 4294967295, %v9921_v17  ;;  %v9934_v42 = vmov 0  ;;  %v9937_v44 = vmov 0  ;;  %v9948_v49 = vmov 0 }
  0xa1   : > { %4786 = vmatmul.msk.f32.vlgmr.msra.gmra.mxu0 %vm9764_vm3, %v4781_v51  ;;  %4789 = vmatmul.msk.f32.vlgmr.msra.gmra.mxu2 %vm9764_vm3, %v4784_v52  ;;  %9923 = vst [vmem:[#allocation17_spill] sm:$0xff] %v9922_v17 }
  0xa2   : > { %4791 = vmatmul.msk.f32.vlgmr.msra.gmra.mxu1 %vm9764_vm3, %v4781_v51  ;;  %4794 = vmatmul.msk.f32.vlgmr.msra.gmra.mxu3 %vm9764_vm3, %v4784_v52 }
  0xa3   : > { %4795 = vmatpush.msk.msrb.mxu2 %vm9762_vm0, %v437_v57  ;;  %4800 = vmatpush.msk.msrb.mxu3 %vm9762_vm0, %v438_v58  ;;  %v4834_v57 = vld [vmem:[%s9746_s1 + $0x88] sm:$0xff] }
  0xa4   : > { %4809 = vmatpush.msk.msrb.mxu0 %vm9762_vm0, %v636_v60  ;;  %4814 = vmatpush.msk.msrb.mxu1 %vm9762_vm0, %v637_v61  ;;  %v735_v63 = vpop.permute.xlu1 %734  ;;  %v1049_v45 = vpop.permute.xlu2 %1048 }
  0xa5   : > { %v733_v1 = vpop.permute.xlu0 %732 }
  0xa6   : > { %v737_v4 = vsel %vm9761_vm11, %v733_v1, %v735_v63  ;;  %v738_v5 = vsel %vm9761_vm11, %v735_v63, %v733_v1  ;;  %4837 = vmatpush.msk.msra.mxu0 %vm9762_vm0, %v843_v12  ;;  %4842 = vmatpush.msk.msra.mxu1 %vm9762_vm0, %v844_v13  ;;  %vm9924_vm11 = vcmp.lt.s32.totalorder %v5752_v35, 16  ;;  %v4861_v13 = vld [vmem:[%s9746_s1 + $0xc0] sm:$0xff] }
  0xa7   : > { %v743_v6 = vsel %vm5867_vm1, %v738_v5, 0.0  ;;  %v744_v7 = vsel %vm5877_vm15, %v737_v4, 0.0  ;;  %vm402_vm15 = vcmp.ge.s32.totalorder %v400_v38, 0  ;;  %vm404_vm1 = vcmp.lt.s32.totalorder %v400_v38, 16  ;;  %v4847_v4 = vld [vmem:[%s9746_s1 + $0xa0] sm:$0xff]  ;;  %v4836_v5 = vld [vmem:[%s9746_s1 + $0x98] sm:$0xff] }
  0xa8   : > { %4823 = vmatpush.msk.msra.mxu2 %vm9762_vm0, %v743_v6  ;;  %4828 = vmatpush.msk.msra.mxu3 %vm9762_vm0, %v744_v7  ;;  %vm5952_vm0 = vmand %vm5848_vm14, %vm9924_vm11  ;;  %vm9930_vm11 = vcmask 23552   ;;  %vm9943_vm14 = vcmp.ge.s32.totalorder %v5743_v32, 0  ;;  %v4848_v6 = vld [vmem:[%s9746_s1 + $0xa8] sm:$0xff]  ;;  %v9969_v7 = vmov 0  ;;  %v4877_v38 = vld [vmem:[%s9746_s1 + $0xf0] sm:$0xff] }
  0xa9   : > { %4787 = vmatmul.msk.f32.gmra.mxu0 %vm9764_vm3, %v4782_v2  ;;  %4796 = vmatmul.msk.f32.vlgmr.msrb.gmra.mxu2 %vm9764_vm3, %v439_v3  ;;  %v9926_v20 = vsel %vm5952_vm0, 4294967295, %v9925_v20 }
  0xaa   : > { %4792 = vmatmul.msk.f32.gmra.mxu1 %vm9764_vm3, %v4782_v2  ;;  %4801 = vmatmul.msk.f32.vlgmr.msrb.gmra.mxu3 %vm9764_vm3, %v439_v3  ;;  %9927 = vst [vmem:[#allocation18_spill] sm:$0xff] %v9926_v20  ;;  %v4835_v3 = vld [vmem:[%s9746_s1 + $0x90] sm:$0xff] }
  0xb1   : > { %4788 = vmatmul.msk.f32.gmra.mxu0 %vm9764_vm3, %v4783_v8  ;;  %4797 = vmatmul.msk.f32.gmra.mxu2 %vm9764_vm3, %v440_v11 }
  0xb2   : > { %4793 = vmatmul.msk.f32.gmra.mxu1 %vm9764_vm3, %v4783_v8  ;;  %4802 = vmatmul.msk.f32.gmra.mxu3 %vm9764_vm3, %v440_v11  ;;  %v9973_v8 = vmov 0 }
  0xb4   : > { %v942_v16 = vpop.permute.xlu0 %941  ;;  %v1261_v12 = vpop.permute.xlu2 %1260 }
  0xb5   : > { %v944_v21 = vsel %vm9765_vm12, %v940_v18, %v942_v16  ;;  %v945_v22 = vsel %vm9765_vm12, %v942_v16, %v940_v18  ;;  %vm9931_vm12 = vmmov %vm9930_vm11  ;;  %v4850_v16 = vld [vmem:[%s9746_s1 + $0xb8] sm:$0xff]  ;;  %v4862_v18 = vld [vmem:[%s9746_s1 + $0xc8] sm:$0xff] }
  0xb6   : > { %v950_v25 = vsel %vm5944_vm2, %v944_v21, 0.0  ;;  %v951_v27 = vsel %vm5952_vm0, %v945_v22, 0.0  ;;  %vm9932_vm0 = vmmov %vm9930_vm11  ;;  %vm403_vm2 = vcmp.lt.s32.totalorder %v399_v31, 16  ;;  %v1365_v21 = vld [vmem:[%s9747_s2 + $0x18] sm:$0xff]  ;;  %v4863_v22 = vld [vmem:[%s9746_s1 + $0xd0] sm:$0xff] }
  0xb7   : > { %4851 = vmatpush.msk.msrb.mxu2 %vm9928_vm10, %v950_v25  ;;  %vm9942_vm13 = vmmov %vm9932_vm0  ;;  %v4875_v25 = vld [vmem:[%s9746_s1 + $0xe0] sm:$0xff] }
  0xb9   : > { %4798 = vmatmul.msk.f32.gmra.mxu2 %vm9764_vm3, %v441_v14  ;;  %4810 = vmatmul.msk.f32.vlgmr.msrb.gmra.mxu0 %vm9764_vm3, %v4805_v15 }
  0xba   : > { %4803 = vmatmul.msk.f32.gmra.mxu3 %vm9764_vm3, %v441_v14  ;;  %4815 = vmatmul.msk.f32.vlgmr.msrb.gmra.mxu1 %vm9764_vm3, %v4805_v15 }
  0xbc   : > { %v1047_v47 = vpop.permute.xlu1 %1046 }
  0xc1   : > { %4799 = vmatmul.msk.f32.gmra.mxu2 %vm9764_vm3, %v442_v9  ;;  %4811 = vmatmul.msk.f32.gmra.mxu0 %vm9764_vm3, %v4806_v10 }
  0xc2   : > { %4804 = vmatmul.msk.f32.gmra.mxu3 %vm9764_vm3, %v442_v9  ;;  %4816 = vmatmul.msk.f32.gmra.mxu1 %vm9764_vm3, %v4806_v10  ;;  %vm9929_vm3 = vmmov %vm9928_vm10  ;;  %v5641_v10 = vmov 0  }
  0xc3   : > { %4856 = vmatpush.msk.msrb.mxu3 %vm9929_vm3, %v951_v27  ;;  %vm9933_vm10 = vmmov %vm9932_vm0  ;;  %vm401_vm3 = vcmp.ge.s32.totalorder %v399_v31, 0  ;;  %5462 = vset.pattern.permute.xlu1 %v5641_v10  ;;  %v1362_v27 = vld [vmem:[%s9747_s2] sm:$0xff]  ;;  %v1363_v31 = vld [vmem:[%s9747_s2 + $0x8] sm:$0xff] }
  0xc4   : > { %vm5984_vm4 = vmand %vm401_vm3, %vm403_vm2  ;;  %v1156_v58 = vpop.permute.xlu1 %1155  ;;  %v1154_v60 = vpop.permute.xlu0 %1153  ;;  %5464 = vset.pattern.permute.xlu0 %v5641_v10  ;;  %5463 = vset.pattern.permute.xlu2 %v5641_v10 }
  0xc5   : > { %v9935_v42 = vsel %vm5984_vm4, 4294967295, %v9934_v42  ;;  %vm6000_vm2 = vmand %vm5984_vm4, %vm9943_vm14  ;;  %1383 = vperm.xlu1 %5462, %v1365_v21   ;;  %1373 = vperm.xlu0 %5464, %v1363_v31  }
  0xc6   : > { %9936 = vst [vmem:[#allocation19_spill] sm:$0xff] %v9935_v42  ;;  %v9945_v46 = vsel %vm6000_vm2, 4294967295, %v9944_v46 }
  0xc7   : > { %9946 = vst [vmem:[#allocation21_spill] sm:$0xff] %v9945_v46 }
  0xc9   : > { %4812 = vmatmul.msk.f32.gmra.mxu0 %vm9930_vm11, %v4807_v29  ;;  %4824 = vmatmul.msk.f32.vlgmr.msra.gmra.mxu2 %vm9931_vm12, %v4819_v30  ;;  %vm5988_vm12 = vmand %vm402_vm15, %vm404_vm1  ;;  %vm9780_vm15 = vcmp.lt.s32.totalorder %v5726_v19, 113  ;;  %vm9947_vm1 = vcmp.ge.s32.totalorder %v5746_v33, 0  ;;  %v4821_v33 = vld [vmem:[%s9746_s1 + $0x70] sm:$0xff] }
  0xca   : > { %4817 = vmatmul.msk.f32.gmra.mxu1 %vm9932_vm0, %v4807_v29  ;;  %4829 = vmatmul.msk.f32.vlgmr.msra.gmra.mxu3 %vm9933_vm10, %v4819_v30  ;;  %v9938_v44 = vsel %vm5988_vm12, 4294967295, %v9937_v44  ;;  %vm9940_vm11 = vmmov %vm9932_vm0  ;;  %v1051_v32 = vsel %vm9780_vm15, %v1047_v47, %v1049_v45  ;;  %v1052_v50 = vsel %vm9780_vm15, %v1049_v45, %v1047_v47  ;;  %v4864_v29 = vld [vmem:[%s9746_s1 + $0xd8] sm:$0xff]  ;;  %v4876_v30 = vld [vmem:[%s9746_s1 + $0xe8] sm:$0xff] }
  0xcb   : > { %9939 = vst [vmem:[#allocation20_spill] sm:$0xff] %v9938_v44  ;;  %vm9941_vm10 = vmmov %vm9932_vm0  ;;  %v1057_v51 = vsel %vm6000_vm2, %v1051_v32, 0.0  ;;  %v4878_v45 = vld [vmem:[%s9746_s1 + $0xf8] sm:$0xff]  ;;  %v4890_v47 = vld [vmem:[%s9746_s1 + $0x108] sm:$0xff] }
  0xcc   : > { %vm6009_vm3 = vmand %vm5988_vm12, %vm9947_vm1  ;;  %v1263_v11 = vpop.permute.xlu0 %1262 }
  0xcd   : > { %v9949_v49 = vsel %vm6009_vm3, 4294967295, %v9948_v49  ;;  %v1058_v52 = vsel %vm6009_vm3, %v1052_v50, 0.0  ;;  %vm9955_vm1 = vmmov %vm9932_vm0  ;;  %vm9972_vm3 = vcmp.lt.s32.totalorder %v5752_v35, 16  ;;  %1368 = vperm.xlu1 %5462, %v1362_v27  }
  0xce   : > { %9950 = vst [vmem:[#allocation22_spill] sm:$0xff] %v9949_v49  ;;  %vm9957_vm15 = vmmov %vm9932_vm0 }
  0xd1   : > { %4813 = vmatmul.msk.f32.gmra.mxu0 %vm9932_vm0, %v4808_v39  ;;  %4825 = vmatmul.msk.f32.gmra.mxu2 %vm9940_vm11, %v4820_v41  ;;  %vm9953_vm11 = vmmov %vm9932_vm0 }
  0xd2   : > { %4818 = vmatmul.msk.f32.gmra.mxu1 %vm9941_vm10, %v4808_v39  ;;  %4830 = vmatmul.msk.f32.gmra.mxu3 %vm9942_vm13, %v4820_v41  ;;  %vm9951_vm13 = vcmask 1042432   ;;  %vm9954_vm10 = vmmov %vm9932_vm0  ;;  %v4889_v39 = vld [vmem:[%s9746_s1 + $0x100] sm:$0xff] }
  0xd3   : > { %4865 = vmatpush.msk.msrb.mxu0 %vm9951_vm13, %v1057_v51  ;;  %vm9952_vm14 = vmmov %vm9951_vm13  ;;  %vm9781_vm13 = vcmp.lt.s32.totalorder %v5726_v19, 112 }
  0xd4   : > { %4870 = vmatpush.msk.msrb.mxu1 %vm9952_vm14, %v1058_v52  ;;  %vm9956_vm14 = vmmov %vm9932_vm0  ;;  %v1158_v61 = vsel %vm9781_vm13, %v1154_v60, %v1156_v58  ;;  %v1159_v63 = vsel %vm9781_vm13, %v1156_v58, %v1154_v60  ;;  %v4892_v60 = vld [vmem:[%s9746_s1 + $0x118] sm:$0xff] }
  0xd5   : > { %v1164_v1 = vsel %vm5984_vm4, %v1158_v61, 0.0  ;;  %v1165_v2 = vsel %vm5988_vm12, %v1159_v63, 0.0  ;;  %vm9966_vm13 = vmmov %vm9932_vm0  ;;  %v1364_v61 = vld [vmem:[%s9747_s2 + $0x10] sm:$0xff] }
  0xd6   : > { %1378 = vperm.xlu2 %5463, %v1364_v61  }
  0xd9   : > { %4826 = vmatmul.msk.f32.gmra.mxu2 %vm9932_vm0, %v4821_v33  ;;  %4838 = vmatmul.msk.f32.vlgmr.msra.gmra.mxu0 %vm9953_vm11, %v4833_v53  ;;  %vm9958_vm11 = vmmov %vm9932_vm0 }
  0xda   : > { %4831 = vmatmul.msk.f32.gmra.mxu3 %vm9954_vm10, %v4821_v33  ;;  %4843 = vmatmul.msk.f32.vlgmr.msra.gmra.mxu1 %vm9955_vm1, %v4833_v53  ;;  %vm9959_vm10 = vcmask 1042432   ;;  %vm9961_vm1 = vmmov %vm9932_vm0  ;;  %v4891_v33 = vld [vmem:[%s9746_s1 + $0x110] sm:$0xff] }
  0xdb   : > { %4879 = vmatpush.msk.msra.mxu2 %vm9959_vm10, %v1164_v1 }
  0xe1   : > { %4827 = vmatmul.msk.f32.gmra.mxu2 %vm9956_vm14, %v4822_v55  ;;  %4839 = vmatmul.msk.f32.gmra.mxu0 %vm9957_vm15, %v4834_v57  ;;  %vm9960_vm15 = vmmov %vm9959_vm10 }
  0xe2   : > { %4832 = vmatmul.msk.f32.gmra.mxu3 %vm9932_vm0, %v4822_v55  ;;  %4844 = vmatmul.msk.f32.gmra.mxu1 %vm9958_vm11, %v4834_v57  ;;  %vm9962_vm14 = vmmov %vm9932_vm0 }
  0xe3   : > { %4884 = vmatpush.msk.msra.mxu3 %vm9960_vm15, %v1165_v2  ;;  %vm9963_vm11 = vmmov %vm9932_vm0 }
  0xe4   : > { %vm9964_vm10 = vmmov %vm9932_vm0 }
  0xe5   : > { %vm9965_vm15 = vmmov %vm9932_vm0 }
  0xe9   : > { %4840 = vmatmul.msk.f32.gmra.mxu0 %vm9961_vm1, %v4835_v3  ;;  %4852 = vmatmul.msk.f32.vlgmr.msrb.gmra.mxu2 %vm9962_vm14, %v4847_v4  ;;  %vm9967_vm1 = vmmov %vm9932_vm0  ;;  %vm9968_vm14 = vcmp.lt.s32.totalorder %v5749_v34, 16  ;;  %v4849_v34 = vld [vmem:[%s9746_s1 + $0xb0] sm:$0xff] }
  0xea   : > { %4845 = vmatmul.msk.f32.gmra.mxu1 %vm9932_vm0, %v4835_v3  ;;  %4857 = vmatmul.msk.f32.vlgmr.msrb.gmra.mxu3 %vm9963_vm11, %v4847_v4  ;;  %vm6078_vm0 = vmand %vm5984_vm4, %vm9968_vm14  ;;  %vm9786_vm11 = vcmp.lt.s32.totalorder %v5726_v19, 111 }
  0xeb   : > { %v9970_v7 = vsel %vm6078_vm0, 4294967295, %v9969_v7  ;;  %v1265_v14 = vsel %vm9786_vm11, %v1261_v12, %v1263_v11  ;;  %v1266_v35 = vsel %vm9786_vm11, %v1263_v11, %v1261_v12  ;;  %vm9979_vm14 = vmmov %vm9967_vm1 }
  0xec   : > { %9971 = vst [vmem:[#allocation23_spill] sm:$0xff] %v9970_v7  ;;  %v1271_v15 = vsel %vm6078_vm0, %v1265_v14, 0.0  ;;  %vm9993_vm11 = vmmov %vm9967_vm1 }
  0xf1   : > { %4841 = vmatmul.msk.f32.gmra.mxu0 %vm9964_vm10, %v4836_v5  ;;  %4853 = vmatmul.msk.f32.gmra.mxu2 %vm9965_vm15, %v4848_v6  ;;  %vm6087_vm10 = vmand %vm5988_vm12, %vm9972_vm3  ;;  %vm9976_vm3 = vcmask 1042432  }
  0xf2   : > { %4846 = vmatmul.msk.f32.gmra.mxu1 %vm9966_vm13, %v4836_v5  ;;  %4858 = vmatmul.msk.f32.gmra.mxu3 %vm9967_vm1, %v4848_v6  ;;  %v9974_v8 = vsel %vm6087_vm10, 4294967295, %v9973_v8  ;;  %v1272_v9 = vsel %vm6087_vm10, %v1266_v35, 0.0  ;;  %vm9977_vm13 = vmmov %vm9976_vm3 }
  0xf3   : > { %9975 = vst [vmem:[#allocation24_spill] sm:$0xff] %v9974_v8  ;;  %4893 = vmatpush.msk.msra.mxu0 %vm9976_vm3, %v1271_v15  ;;  %4898 = vmatpush.msk.msra.mxu1 %vm9977_vm13, %v1272_v9  ;;  %vm9978_vm15 = vmmov %vm9967_vm1 }
  0xf4   : > { %vm9980_vm12 = vmmov %vm9967_vm1 }
  0xf5   : > { %vm9981_vm3 = vmmov %vm9967_vm1 }
  0xf6   : > { %vm9983_vm13 = vmmov %vm9967_vm1 }
  0xf9   : > { %4854 = vmatmul.msk.f32.gmra.mxu2 %vm9978_vm15, %v4849_v34  ;;  %4866 = vmatmul.msk.f32.vlgmr.msrb.gmra.mxu0 %vm9967_vm1, %v4861_v13  ;;  %vm9984_vm15 = vmmov %vm9967_vm1 }
  0xfa   : > { %4859 = vmatmul.msk.f32.gmra.mxu3 %vm9979_vm14, %v4849_v34  ;;  %4871 = vmatmul.msk.f32.vlgmr.msrb.gmra.mxu1 %vm9980_vm12, %v4861_v13  ;;  %vm9982_vm12 = vmmov %vm9967_vm1 }
  0xfb   : > { %vm9985_vm14 = vmmov %vm9967_vm1 }
 0x101   : > { %4855 = vmatmul.msk.f32.gmra.mxu2 %vm9981_vm3, %v4850_v16  ;;  %4867 = vmatmul.msk.f32.gmra.mxu0 %vm9982_vm12, %v4862_v18  ;;  %vm9986_vm3 = vmmov %vm9967_vm1 }
 0x102   : > { %4860 = vmatmul.msk.f32.gmra.mxu3 %vm9983_vm13, %v4850_v16  ;;  %4872 = vmatmul.msk.f32.gmra.mxu1 %vm9984_vm15, %v4862_v18  ;;  %vm9987_vm12 = vmmov %vm9967_vm1 }
 0x103   : > { %vm9988_vm13 = vmmov %vm9967_vm1 }
 0x104   : > { %vm9989_vm15 = vmmov %vm9967_vm1 }
 0x109   : > { %4868 = vmatmul.msk.f32.gmra.mxu0 %vm9967_vm1, %v4863_v22  ;;  %4880 = vmatmul.msk.f32.vlgmr.msra.gmra.mxu2 %vm9985_vm14, %v4875_v25  ;;  %vm9990_vm14 = vmmov %vm9967_vm1 }
 0x10a   : > { %4873 = vmatmul.msk.f32.gmra.mxu1 %vm9986_vm3, %v4863_v22  ;;  %4885 = vmatmul.msk.f32.vlgmr.msra.gmra.mxu3 %vm9987_vm12, %v4875_v25  ;;  %vm9991_vm3 = vmmov %vm9967_vm1 }
 0x10b   : > { %vm9992_vm12 = vmmov %vm9967_vm1 }
 0x111   : > { %4869 = vmatmul.msk.f32.gmra.mxu0 %vm9988_vm13, %v4864_v29  ;;  %4881 = vmatmul.msk.f32.gmra.mxu2 %vm9989_vm15, %v4876_v30  ;;  %vm9994_vm13 = vmmov %vm9967_vm1 }
 0x112   : > { %4874 = vmatmul.msk.f32.gmra.mxu1 %vm9967_vm1, %v4864_v29  ;;  %4886 = vmatmul.msk.f32.gmra.mxu3 %vm9990_vm14, %v4876_v30  ;;  %vm9995_vm15 = vmmov %vm9967_vm1 }
 0x113   : > { %vm9996_vm14 = vmmov %vm9967_vm1 }
 0x119   : > { %4882 = vmatmul.msk.f32.gmra.mxu2 %vm9991_vm3, %v4877_v38  ;;  %4894 = vmatmul.msk.f32.vlgmr.msra.gmra.mxu0 %vm9992_vm12, %v4889_v39  ;;  %vm9998_vm3 = vmmov %vm9967_vm1 }
 0x11a   : > { %4887 = vmatmul.msk.f32.gmra.mxu3 %vm9993_vm11, %v4877_v38  ;;  %4899 = vmatmul.msk.f32.vlgmr.msra.gmra.mxu1 %vm9994_vm13, %v4889_v39  ;;  %vm9997_vm11 = vmmov %vm9967_vm1 }
 0x11b   : > { %vm9999_vm12 = vmmov %vm9967_vm1 }
 0x11c   : > { %vm10000_vm13 = vmmov %vm9967_vm1 }
 0x11e   : > { %v6160_v41 = vpop.f32.mrf.mxu0 }
 0x11f   : > { %v6168_v32 = vpop.f32.mrf.mxu1 }
 0x121   : > { %4883 = vmatmul.msk.f32.gmra.mxu2 %vm9995_vm15, %v4878_v45  ;;  %4895 = vmatmul.msk.f32.gmra.mxu0 %vm9967_vm1, %v4890_v47  ;;  %vm10001_vm15 = vmmov %vm9967_vm1 }
 0x122   : > { %4888 = vmatmul.msk.f32.gmra.mxu3 %vm9996_vm14, %v4878_v45  ;;  %4900 = vmatmul.msk.f32.gmra.mxu1 %vm9997_vm11, %v4890_v47 }
 0x124   : > { %v6174_v50 = vpop.f32.mrf.mxu2 }
 0x125   : > { %v6176_v51 = vpop.f32.mrf.mxu3 }
 0x126   : > { %v506_v52 = vpop.f32.mrf.mxu0 }
 0x127   : > { %v6181_v53 = vpop.f32.mrf.mxu1 }
 0x129   : > { %4896 = vmatmul.msk.f32.gmra.mxu0 %vm9998_vm3, %v4891_v33 }
 0x12a   : > { %4901 = vmatmul.msk.f32.gmra.mxu1 %vm9999_vm12, %v4891_v33 }
 0x12c   : > { %v6185_v55 = vpop.f32.mrf.mxu2 }
 0x12d   : > { %v6187_v57 = vpop.f32.mrf.mxu3 }
 0x12e   : > { %v6189_v58 = vpop.f32.mrf.mxu0 }
 0x12f   : > { %v538_v63 = vpop.f32.mrf.mxu1 }
 0x131   : > { %4897 = vmatmul.msk.f32.gmra.mxu0 %vm10000_vm13, %v4892_v60 }
 0x132   : > { %4902 = vmatmul.msk.f32.gmra.mxu1 %vm10001_vm15, %v4892_v60  ;;  %vm9829_vm15 = vcmask 261120  }
 0x134   : > { %v582_v1 = vpop.f32.mrf.mxu2 }
 0x135   : > { %v6199_v2 = vpop.f32.mrf.mxu3  ;;  %v583_v56 = vadd.f32 %v582_v1, %v506_v52 }
 0x136   : > { %v6201_v3 = vpop.f32.mrf.mxu0 }
 0x137   : > { %v6203_v4 = vpop.f32.mrf.mxu1  ;;  %v6268_v1 = vpop.permute.xlu0 %1373 }
 0x13c   : > { %v585_v5 = vpop.f32.mrf.mxu2 }
 0x13d   : > { %v614_v6 = vpop.f32.mrf.mxu3 }
 0x13e   : > { %v681_v11 = vpop.f32.mrf.mxu0 }
 0x13f   : > { %v6205_v12 = vpop.f32.mrf.mxu1  ;;  %v721_v54 = vadd.f32 %v681_v11, %v583_v56 }
 0x144   : > { %v6207_v34 = vpop.f32.mrf.mxu2 }
 0x145   : > { %v6209_v13 = vpop.f32.mrf.mxu3 }
 0x146   : > { %v684_v14 = vpop.f32.mrf.mxu0 }
 0x147   : > { %v713_v35 = vpop.f32.mrf.mxu1 }
 0x14c   : > { %v6211_v15 = vpop.f32.mrf.mxu2 }
 0x14d   : > { %v6213_v9 = vpop.f32.mrf.mxu3 }
 0x14e   : > { %v6215_v10 = vpop.f32.mrf.mxu0 }
 0x14f   : > { %v6217_v16 = vpop.f32.mrf.mxu1 }
 0x154   : > { %v788_v18 = vpop.f32.mrf.mxu2 }
 0x155   : > { %v6219_v21 = vpop.f32.mrf.mxu3  ;;  %v828_v48 = vadd.f32 %v788_v18, %v721_v54  ;;  %v580_v54 = vadd.f32 %v6185_v55, %v6160_v41 }
 0x156   : > { %v6221_v22 = vpop.f32.mrf.mxu0 }
 0x157   : > { %v6223_v25 = vpop.f32.mrf.mxu1 }
 0x158   : > { %10002 = vst [vmem:[#allocation25_spill] sm:$0xff] %v6223_v25  ;;  %v615_v25 = vadd.f32 %v614_v6, %v538_v63  ;;  %v1384_v63 = vpop.permute.xlu1 %1383  ;;  %v612_v6 = vadd.f32 %v6199_v2, %v6181_v53 }
 0x15c   : > { %v791_v27 = vpop.f32.mrf.mxu2 }
 0x15d   : > { %v820_v29 = vpop.f32.mrf.mxu3 }
 0x15e   : > { %v888_v30 = vpop.f32.mrf.mxu0 }
 0x15f   : > { %v6225_v31 = vpop.f32.mrf.mxu1  ;;  %v928_v19 = vadd.f32 %v888_v30, %v828_v48 }
 0x160   : > { %10003 = vst [vmem:[#allocation26_spill] sm:$0xff] %v6225_v31 }
 0x164   : > { %v6227_v38 = vpop.f32.mrf.mxu2 }
 0x165   : > { %v6229_v39 = vpop.f32.mrf.mxu3 }
 0x166   : > { %v891_v45 = vpop.f32.mrf.mxu0 }
 0x167   : > { %v920_v47 = vpop.f32.mrf.mxu1 }
 0x16c   : > { %v6231_v33 = vpop.f32.mrf.mxu2 }
 0x16d   : > { %v6233_v60 = vpop.f32.mrf.mxu3 }
 0x16e   : > { %10004 = vst [vmem:[#allocation27_spill] sm:$0xff] %v6233_v60  ;;  %v6235_v61 = vpop.f32.mrf.mxu0  ;;  %v586_v60 = vadd.f32 %v585_v5, %v6189_v58  ;;  %v719_v58 = vadd.f32 %v6201_v3, %v580_v54 }
 0x16f   : > { %v6237_v24 = vpop.f32.mrf.mxu1 }
 0x170   : > { %v826_v41 = vadd.f32 %v6211_v15, %v719_v58  ;;  %v1379_v15 = vpop.permute.xlu2 %1378 }
 0x174   : > { %v995_v23 = vpop.f32.mrf.mxu2 }
 0x175   : > { %v6239_v28 = vpop.f32.mrf.mxu3  ;;  %v10018_v58 = vld [vmem:[#allocation27_spill] sm:$0xff] }
 0x176   : > { %10005 = vst [vmem:[#allocation28_spill] sm:$0xff] %v6239_v28  ;;  %v6241_v26 = vpop.f32.mrf.mxu0  ;;  %v1035_v28 = vadd.f32 %v995_v23, %v928_v19 }
 0x177   : > { %v6243_v44 = vpop.f32.mrf.mxu1 }
 0x178   : > { %10006 = vst [vmem:[#allocation29_spill] sm:$0xff] %v6243_v44 }
 0x17c   : > { %v998_v42 = vpop.f32.mrf.mxu2 }
 0x17d   : > { %v1027_v8 = vpop.f32.mrf.mxu3 }
 0x17e   : > { %v1102_v7 = vpop.f32.mrf.mxu0 }
 0x17f   : > { %v6245_v20 = vpop.f32.mrf.mxu1  ;;  %v1142_v31 = vadd.f32 %v1102_v7, %v1035_v28  ;;  %v589_v28 = vadd.f32 %v6207_v34, %v6174_v50  ;;  %v926_v50 = vadd.f32 %v6221_v22, %v826_v41 }
 0x180   : > { %10007 = vst [vmem:[#allocation30_spill] sm:$0xff] %v6245_v20 }
 0x184   : > { %v6247_v17 = vpop.f32.mrf.mxu2 }
 0x185   : > { %v6249_v49 = vpop.f32.mrf.mxu3 }
 0x186   : > { %v1105_v46 = vpop.f32.mrf.mxu0 }
 0x187   : > { %v1134_v0 = vpop.f32.mrf.mxu1 }
 0x18c   : > { %v6251_v62 = vpop.f32.mrf.mxu2 }
 0x18d   : > { %10008 = vst [vmem:[#allocation31_spill] sm:$0xff] %v6251_v62  ;;  %v6253_v43 = vpop.f32.mrf.mxu3 }
 0x18e   : > { %10009 = vst [vmem:[#allocation32_spill] sm:$0xff] %v6253_v43  ;;  %v6255_v40 = vpop.f32.mrf.mxu0  ;;  %v723_v43 = vadd.f32 %v684_v14, %v586_v60 }
 0x18f   : > { %10010 = vst [vmem:[#allocation33_spill] sm:$0xff] %v6255_v40  ;;  %v6257_v59 = vpop.f32.mrf.mxu1  ;;  %v724_v40 = vadd.f32 %v713_v35, %v615_v25 }
 0x190   : > { %10011 = vst [vmem:[#allocation34_spill] sm:$0xff] %v6257_v59  ;;  %v830_v62 = vadd.f32 %v791_v27, %v723_v43 }
 0x191   : > { %v831_v56 = vadd.f32 %v820_v29, %v724_v40  ;;  %v618_v40 = vadd.f32 %v6209_v13, %v6176_v51  ;;  %v1033_v13 = vadd.f32 %v6231_v33, %v926_v50 }
 0x192   : > { %v930_v48 = vadd.f32 %v891_v45, %v830_v62 }
 0x193   : > { %v931_v19 = vadd.f32 %v920_v47, %v831_v56  ;;  %v726_v5 = vadd.f32 %v6217_v16, %v618_v40  ;;  %v1140_v25 = vadd.f32 %v6241_v26, %v1033_v13  ;;  %v10013_v47 = vld [vmem:[#allocation26_spill] sm:$0xff]  ;;  %v10020_v40 = vld [vmem:[#allocation29_spill] sm:$0xff] }
 0x194   : > { %v1209_v37 = vpop.f32.mrf.mxu2  ;;  %v1037_v43 = vadd.f32 %v998_v42, %v930_v48  ;;  %v1369_v48 = vpop.permute.xlu1 %1368 }
 0x195   : > { %v6261_v44 = vpop.f32.mrf.mxu3  ;;  %v1249_v59 = vadd.f32 %v1209_v37, %v1142_v31  ;;  %v1038_v62 = vadd.f32 %v1027_v8, %v931_v19  ;;  %v833_v8 = vadd.f32 %v6229_v39, %v726_v5  ;;  %v10012_v31 = vld [vmem:[#allocation31_spill] sm:$0xff]  ;;  %v10021_v50 = vld [vmem:[#allocation32_spill] sm:$0xff] }
 0x196   : > { %v6259_v36 = vpop.f32.mrf.mxu0  ;;  %v1144_v55 = vadd.f32 %v1105_v46, %v1037_v43  ;;  %v609_v46 = vadd.f32 %v6187_v57, %v6168_v32  ;;  %v10014_v33 = vld [vmem:[#allocation33_spill] sm:$0xff]  ;;  %v10019_v43 = vld [vmem:[#allocation30_spill] sm:$0xff] }
 0x197   : > { %v6263_v20 = vpop.f32.mrf.mxu1  ;;  %v1145_v42 = vadd.f32 %v1134_v0, %v1038_v62  ;;  %v722_v0 = vadd.f32 %v6205_v12, %v612_v6  ;;  %v933_v22 = vadd.f32 %v6237_v24, %v833_v8  ;;  %v10016_v54 = vld [vmem:[#allocation34_spill] sm:$0xff] }
 0x198   : > { %v720_v16 = vadd.f32 %v6203_v4, %v609_v46 }
 0x199   : > { %v829_v57 = vadd.f32 %v6219_v21, %v722_v0  ;;  %v1040_v12 = vadd.f32 %v6249_v49, %v933_v22  ;;  %v10017_v49 = vld [vmem:[#allocation28_spill] sm:$0xff]  ;;  %v10022_v22 = vld [vmem:[#allocation2_spill] sm:$0xff] }
 0x19a   : > { %v827_v30 = vadd.f32 %v6213_v9, %v720_v16  ;;  %vm10023_vm1 = vcmp.lt.s32.totalorder %v10022_v22, 16 }
 0x19b   : > { %v929_v4 = vadd.f32 %v10013_v47, %v829_v57  ;;  %vm10024_vm14 = vmmov %vm10023_vm1  ;;  %v4903_v47 = vld [vmem:[%s9748_s3 + $0x40] sm:$0xff] }
 0x19c   : > { %v1212_v23 = vpop.f32.mrf.mxu2  ;;  %vm10027_vm11 = vmmov %vm10023_vm1 }
 0x19d   : > { %v1241_v37 = vpop.f32.mrf.mxu3  ;;  %v1251_v51 = vadd.f32 %v1212_v23, %v1144_v55  ;;  %vm10028_vm3 = vmmov %vm10023_vm1 }
 0x19e   : > { %v1316_v52 = vpop.f32.mrf.mxu0  ;;  %v1252_v14 = vadd.f32 %v1241_v37, %v1145_v42  ;;  %vm10029_vm12 = vmmov %vm10023_vm1 }
 0x19f   : > { %v1356_v11 = vadd.f32 %v1316_v52, %v1249_v59  ;;  %v6270_v18 = vpop.f32.mrf.mxu1  ;;  %v725_v59 = vadd.f32 %v6215_v10, %v589_v28  ;;  %v1036_v52 = vadd.f32 %v10017_v49, %v929_v4  ;;  %vm10030_vm13 = vmmov %vm10023_vm1  ;;  %v4905_v49 = vld [vmem:[%s9748_s3 + $0x50] sm:$0xff] }
 0x1a1   : > { %v1388_v7 = vadd.f32 %v6268_v1, %v1356_v11  ;;  %v832_v34 = vadd.f32 %v6227_v38, %v725_v59  ;;  %v1247_v38 = vadd.f32 %v10012_v31, %v1140_v25  ;;  %v1143_v37 = vadd.f32 %v10019_v43, %v1036_v52 }
 0x1a3   : > { %v6280_v3 = vmax.f32 %v1388_v7, 0.0  ;;  %v932_v53 = vadd.f32 %v6235_v61, %v832_v34  ;;  %v10015_v61 = vld [vmem:[#allocation25_spill] sm:$0xff]  ;;  %v1354_v56 = vadd.f32 %v6259_v36, %v1247_v38  ;;  %v1250_v55 = vadd.f32 %v6261_v44, %v1143_v37 }
 0x1a4   : > { %v1215_v39 = vpop.f32.mrf.mxu2  ;;  %v927_v21 = vadd.f32 %v10015_v61, %v827_v30 }
 0x1a5   : > { %1444 = vrot.lane.b32.xlu1 %v6280_v3, %s5634_s17  ;;  %v1039_v27 = vadd.f32 %v6247_v17, %v932_v53  ;;  %v1244_v60 = vpop.f32.mrf.mxu3  ;;  %v1147_v17 = vadd.f32 %v10016_v54, %v1040_v12  ;;  %v1386_v62 = vadd.f32 %v1369_v48, %v1354_v56  ;;  %v1357_v34 = vadd.f32 %v6270_v18, %v1250_v55  ;;  %v10043_v55 = vld [vmem:[#allocation14_spill] sm:$0xff] }
 0x1a6   : > { %v1319_v35 = vpop.f32.mrf.mxu0  ;;  %v1034_v19 = vadd.f32 %v10018_v58, %v927_v21  ;;  %v4904_v21 = vld [vmem:[%s9748_s3 + $0x48] sm:$0xff]  ;;  %v5158_v58 = vld [vmem:[%s9748_s3 + $0x238] sm:$0xff] }
 0x1a7   : > { %v1358_v2 = vadd.f32 %v1319_v35, %v1251_v51  ;;  %v1348_v10 = vpop.f32.mrf.mxu1  ;;  %v1146_v24 = vadd.f32 %v10014_v33, %v1039_v27  ;;  %v1254_v23 = vadd.f32 %v1244_v60, %v1147_v17  ;;  %v6326_v8 = vmax.f32 %v1386_v62, 0.0 }
 0x1a8   : > { %v1359_v32 = vadd.f32 %v1348_v10, %v1252_v14  ;;  %v1141_v41 = vadd.f32 %v10020_v40, %v1034_v19  ;;  %v1389_v44 = vadd.f32 %v6268_v1, %v1357_v34  ;;  %v4906_v40 = vld [vmem:[%s9748_s3 + $0x58] sm:$0xff]  ;;  %v10049_v34 = vld [vmem:[#allocation10_spill] sm:$0xff] }
 0x1a9   : > { %v1390_v29 = vadd.f32 %v1379_v15, %v1358_v2  ;;  %v1253_v11 = vadd.f32 %v1215_v39, %v1146_v24 }
 0x1aa   : > { %v1391_v45 = vadd.f32 %v1379_v15, %v1359_v32  ;;  %v1248_v42 = vadd.f32 %v10021_v50, %v1141_v41 }
 0x1ab   : > { %v6305_v26 = vmax.f32 %v1390_v29, 0.0 }
 0x1ac   : > { %v6310_v9 = vmax.f32 %v1391_v45, 0.0  ;;  %v1355_v46 = vadd.f32 %v6263_v20, %v1248_v42 }
 0x1ad   : > { %1446 = vrot.lane.b32.xlu2 %v6305_v26, %s5634_s17 }
 0x1ae   : > { %1454 = vrot.lane.b32.xlu0 %v6310_v9, %s5634_s17  ;;  %v1322_v28 = vpop.f32.mrf.mxu0  ;;  %v1387_v18 = vadd.f32 %v1369_v48, %v1355_v46 }
 0x1af   : > { %v1360_v7 = vadd.f32 %v1322_v28, %v1253_v11  ;;  %v1351_v36 = vpop.f32.mrf.mxu1 }
 0x1b0   : > { %v1361_v59 = vadd.f32 %v1351_v36, %v1254_v23  ;;  %v6339_v14 = vmax.f32 %v1387_v18, 0.0 }
 0x1b1   : > { %v1392_v5 = vadd.f32 %v1384_v63, %v1360_v7 }
 0x1b2   : > { %v1393_v6 = vadd.f32 %v1384_v63, %v1361_v59  ;;  %v6337_v63 = vmax.f32 %v1389_v44, 0.0  ;;  %v2818_v44 = vld [vmem:[%s9749_s4 + $0x28] sm:$0xff] }
 0x1b3   : > { %v6323_v51 = vmax.f32 %v1392_v5, 0.0 }
 0x1b4   : > { %v6328_v13 = vmax.f32 %v1393_v6, 0.0  ;;  %v4907_v6 = vld [vmem:[%s9748_s3 + $0x60] sm:$0xff] }
 0x1b5   : > { %1448 = vrot.lane.b32.xlu2 %v6323_v51, %s5634_s17 }
 0x1b6   : > { %1442 = vrot.lane.b32.xlu0 %v6326_v8, %s5634_s17  ;;  %1456 = vrot.lane.b32.xlu1 %v6328_v13, %s5634_s17 }
 0x1bd   : > { %1452 = vrot.lane.b32.xlu2 %v6337_v63, %s5634_s17 }
 0x1be   : > { %1706 = vrot.lane.b32.xlu0 %v6337_v63, %s5635_s18  ;;  %1450 = vrot.lane.b32.xlu1 %v6339_v14, %s5634_s17 }
 0x1c5   : > { %1708 = vrot.lane.b32.xlu2 %v6310_v9, %s5635_s18 }
 0x1c6   : > { %1696 = vrot.lane.b32.xlu0 %v6326_v8, %s5635_s18  ;;  %1700 = vrot.lane.b32.xlu1 %v6305_v26, %s5635_s18 }
 0x1cd   : > { %1698 = vrot.lane.b32.xlu2 %v6280_v3, %s5635_s18 }
 0x1ce   : > { %1710 = vrot.lane.b32.xlu0 %v6328_v13, %s5635_s18  ;;  %1406 = vrot.lane.b32.xlu1 %v6305_v26, %s5633_s16 }
 0x1d5   : > { %1414 = vrot.lane.b32.xlu2 %v6310_v9, %s5633_s16 }
 0x1d6   : > { %1704 = vrot.lane.b32.xlu1 %v6339_v14, %s5635_s18  ;;  %1408 = vrot.lane.b32.xlu0 %v6323_v51, %s5633_s16 }
 0x1dd   : > { %1702 = vrot.lane.b32.xlu2 %v6323_v51, %s5635_s18 }
 0x1de   : > { %1416 = vrot.lane.b32.xlu1 %v6328_v13, %s5633_s16  ;;  %1412 = vrot.lane.b32.xlu0 %v6337_v63, %s5633_s16 }
 0x1e5   : > { %1404 = vrot.lane.b32.xlu2 %v6280_v3, %s5633_s16 }
 0x1e6   : > { %1402 = vrot.lane.b32.xlu1 %v6326_v8, %s5633_s16  ;;  %1871 = vrot.lane.b32.xlu0 %v6310_v9, %s5636_s19 }
 0x1ed   : > { %1410 = vrot.lane.b32.xlu2 %v6339_v14, %s5633_s16 }
 0x1ee   : > { %1861 = vrot.lane.b32.xlu1 %v6280_v3, %s5636_s19  ;;  %1865 = vrot.lane.b32.xlu0 %v6323_v51, %s5636_s19 }
 0x1f5   : > { %1863 = vrot.lane.b32.xlu2 %v6305_v26, %s5636_s19 }
 0x1f6   : > { %1873 = vrot.lane.b32.xlu1 %v6328_v13, %s5636_s19  ;;  %1859 = vrot.lane.b32.xlu0 %v6326_v8, %s5636_s19 }
 0x1fd   : > { %1869 = vrot.lane.b32.xlu2 %v6337_v63, %s5636_s19 }
 0x1fe   : > { %1867 = vrot.lane.b32.xlu1 %v6339_v14, %s5636_s19  ;;  %2334 = vrot.lane.b32.xlu0 %v6337_v63, %s5638_s21 }
 0x205   : > { %2336 = vrot.lane.b32.xlu2 %v6310_v9, %s5638_s21 }
 0x206   : > { %2328 = vrot.lane.b32.xlu1 %v6305_v26, %s5638_s21  ;;  %2324 = vrot.lane.b32.xlu0 %v6326_v8, %s5638_s21 }
 0x207   : > { %v1447_v20 = vpop.permute.xlu2 %1446 }
 0x20d   : > { %2326 = vrot.lane.b32.xlu2 %v6280_v3, %s5638_s21 }
 0x20e   : > { %2165 = vrot.lane.b32.xlu1 %v6305_v26, %s5637_s20  ;;  %2338 = vrot.lane.b32.xlu0 %v6328_v13, %s5638_s21 }
 0x20f   : > { %v1449_v1 = vpop.permute.xlu2 %1448 }
 0x215   : > { %2173 = vrot.lane.b32.xlu2 %v6310_v9, %s5637_s20 }
 0x216   : > { %2332 = vrot.lane.b32.xlu1 %v6339_v14, %s5638_s21  ;;  %2167 = vrot.lane.b32.xlu0 %v6323_v51, %s5637_s20 }
 0x217   : > { %v1453_v35 = vpop.permute.xlu2 %1452  ;;  %v1445_v0 = vpop.permute.xlu1 %1444 }
 0x218   : > { %v1463_v12 = vsel %vm10029_vm12, %v1453_v35, %v1445_v0  ;;  %v1459_v31 = vsel %vm10030_vm13, %v1445_v0, %v1453_v35  ;;  %v4908_v0 = vld [vmem:[%s9748_s3 + $0x68] sm:$0xff] }
 0x21d   : > { %2330 = vrot.lane.b32.xlu2 %v6323_v51, %s5638_s21 }
 0x21e   : > { %2175 = vrot.lane.b32.xlu1 %v6328_v13, %s5637_s20  ;;  %2171 = vrot.lane.b32.xlu0 %v6337_v63, %s5637_s20 }
 0x21f   : > { %v1709_v15 = vpop.permute.xlu2 %1708 }
 0x220   : > { %v1455_v53 = vpop.permute.xlu0 %1454 }
 0x221   : > { %v1464_v29 = vsel %vm10027_vm11, %v1455_v53, %v1447_v20  ;;  %v1460_v30 = vsel %vm10028_vm3, %v1447_v20, %v1455_v53  ;;  %vm10032_vm11 = vcmp.lt.s32.totalorder %v10022_v22, 15  ;;  %v2819_v53 = vld [vmem:[%s9749_s4 + $0x30] sm:$0xff] }
 0x222   : > { %vm10033_vm3 = vmmov %vm10032_vm11 }
 0x223   : > { %vm10036_vm12 = vmmov %vm10033_vm3 }
 0x224   : > { %vm10037_vm13 = vmmov %vm10033_vm3 }
 0x225   : > { %2163 = vrot.lane.b32.xlu2 %v6280_v3, %s5637_s20 }
 0x226   : > { %2161 = vrot.lane.b32.xlu1 %v6326_v8, %s5637_s20  ;;  %2662 = vrot.lane.b32.xlu0 %v6310_v9, %s5640_s23 }
 0x227   : > { %v1699_v2 = vpop.permute.xlu2 %1698 }
 0x228   : > { %v1443_v10 = vpop.permute.xlu0 %1442  ;;  %v1457_v16 = vpop.permute.xlu1 %1456 }
 0x229   : > { %v1461_v25 = vsel %vm10023_vm1, %v1449_v1, %v1457_v16  ;;  %v1465_v32 = vsel %vm10024_vm14, %v1457_v16, %v1449_v1  ;;  %vm10031_vm14 = vmmov %vm10023_vm1 }
 0x22a   : > { %4911 = vmatpush.msk.msrb.mxu2 %vm5755_vm5, %v1465_v32  ;;  %4923 = vmatpush.msk.msrb.mxu3 %vm5761_vm8, %v1461_v25 }
 0x22c   : > { %4912 = vmatpush.msk.msrb.mxu2 %vm5755_vm5, %v1464_v29  ;;  %4924 = vmatpush.msk.msrb.mxu3 %vm5761_vm8, %v1460_v30  ;;  %v1435_v29 = vld [vmem:[%s9748_s3 + $0x8] sm:$0xff]  ;;  %v4909_v30 = vld [vmem:[%s9748_s3 + $0x70] sm:$0xff] }
 0x22d   : > { %2169 = vrot.lane.b32.xlu2 %v6339_v14, %s5637_s20 }
 0x22e   : > { %2660 = vrot.lane.b32.xlu1 %v6337_v63, %s5640_s23  ;;  %2652 = vrot.lane.b32.xlu0 %v6280_v3, %s5640_s23 }
 0x22f   : > { %4913 = vmatpush.msk.msrb.mxu2 %vm5755_vm5, %v1463_v12  ;;  %4925 = vmatpush.msk.msrb.mxu3 %vm5761_vm8, %v1459_v31  ;;  %v6455_v38 = vpop.permute.xlu2 %1414  ;;  %v2816_v12 = vld [vmem:[%s9749_s4 + $0x18] sm:$0xff]  ;;  %v2814_v31 = vld [vmem:[%s9749_s4 + $0x8] sm:$0xff] }
 0x230   : > { %v1707_v39 = vpop.permute.xlu0 %1706  ;;  %v1451_v45 = vpop.permute.xlu1 %1450 }
 0x231   : > { %v1462_v4 = vsel %vm10023_vm1, %v1451_v45, %v1443_v10  ;;  %v1458_v33 = vsel %vm10031_vm14, %v1443_v10, %v1451_v45  ;;  %vm10038_vm1 = vmmov %vm10033_vm3  ;;  %v2815_v10 = vld [vmem:[%s9749_s4 + $0x10] sm:$0xff] }
 0x232   : > { %4914 = vmatpush.msk.msrb.mxu2 %vm5755_vm5, %v1462_v4  ;;  %4926 = vmatpush.msk.msrb.mxu3 %vm5761_vm8, %v1458_v33  ;;  %v1717_v28 = vsel %vm10038_vm1, %v1707_v39, %v1699_v2  ;;  %vm10039_vm14 = vmmov %vm10038_vm1 }
 0x233   : > { %4915 = vmatmul.msk.f32.vlgmr.msrb.gmra.mxu2 %vm9829_vm15, %v4903_v47  ;;  %4927 = vmatmul.msk.f32.vlgmr.msrb.gmra.mxu3 %vm9829_vm15, %v4903_v47  ;;  %v1713_v43 = vsel %vm10039_vm14, %v1699_v2, %v1707_v39  ;;  %v2817_v2 = vld [vmem:[%s9749_s4 + $0x20] sm:$0xff]  ;;  %v1436_v47 = vld [vmem:[%s9748_s3 + $0x10] sm:$0xff] }
 0x235   : > { %2654 = vrot.lane.b32.xlu2 %v6305_v26, %s5640_s23 }
 0x236   : > { %2650 = vrot.lane.b32.xlu1 %v6326_v8, %s5640_s23  ;;  %2499 = vrot.lane.b32.xlu0 %v6310_v9, %s5639_s22 }
 0x237   : > { %v1703_v24 = vpop.permute.xlu2 %1702 }
 0x238   : > { %v1697_v60 = vpop.permute.xlu0 %1696  ;;  %v1701_v61 = vpop.permute.xlu1 %1700 }
 0x239   : > { %v1718_v19 = vsel %vm10036_vm12, %v1709_v15, %v1701_v61  ;;  %v1714_v23 = vsel %vm10037_vm13, %v1701_v61, %v1709_v15  ;;  %vm10044_vm12 = vnez %v10043_v55  ;;  %vm10045_vm13 = vcmp.lt.s32.totalorder %v10022_v22, 17  ;;  %v10059_v61 = vld [vmem:[#allocation16_spill] sm:$0xff]  ;;  %v5157_v55 = vld [vmem:[%s9748_s3 + $0x230] sm:$0xff] }
 0x23b   : > { %4916 = vmatmul.msk.f32.gmra.mxu2 %vm9829_vm15, %v4904_v21  ;;  %4928 = vmatmul.msk.f32.gmra.mxu3 %vm9829_vm15, %v4904_v21  ;;  %v2813_v21 = vld [vmem:[%s9749_s4] sm:$0xff] }
 0x23d   : > { %2491 = vrot.lane.b32.xlu2 %v6305_v26, %s5639_s22 }
 0x23e   : > { %2664 = vrot.lane.b32.xlu1 %v6328_v13, %s5640_s23  ;;  %2656 = vrot.lane.b32.xlu0 %v6323_v51, %s5640_s23 }
 0x23f   : > { %v6487_v54 = vpop.permute.xlu2 %1404 }
 0x240   : > { %v1711_v17 = vpop.permute.xlu0 %1710  ;;  %v1407_v56 = vpop.permute.xlu1 %1406 }
 0x241   : > { %v1715_v52 = vsel %vm10032_vm11, %v1703_v24, %v1711_v17  ;;  %v1719_v48 = vsel %vm10033_vm3, %v1711_v17, %v1703_v24  ;;  %vm10040_vm11 = vmmov %vm10038_vm1  ;;  %v4910_v24 = vld [vmem:[%s9748_s3 + $0x78] sm:$0xff] }
 0x242   : > { %4967 = vmatpush.msk.msra.mxu2 %vm5802_vm6, %v1719_v48  ;;  %4979 = vmatpush.msk.msra.mxu3 %vm5822_vm9, %v1715_v52  ;;  %vm10041_vm3 = vmmov %vm10038_vm1 }
 0x243   : > { %4917 = vmatmul.msk.f32.gmra.mxu2 %vm9829_vm15, %v4905_v49  ;;  %4929 = vmatmul.msk.f32.gmra.mxu3 %vm9829_vm15, %v4905_v49  ;;  %vm10046_vm1 = vmmov %vm10045_vm13 }
 0x244   : > { %4968 = vmatpush.msk.msra.mxu2 %vm5802_vm6, %v1718_v19  ;;  %4980 = vmatpush.msk.msra.mxu3 %vm5822_vm9, %v1714_v23  ;;  %v1437_v19 = vld [vmem:[%s9748_s3 + $0x18] sm:$0xff] }
 0x245   : > { %2658 = vrot.lane.b32.xlu2 %v6339_v14, %s5640_s23 }
 0x246   : > { %2493 = vrot.lane.b32.xlu1 %v6323_v51, %s5639_s22  ;;  %2489 = vrot.lane.b32.xlu0 %v6280_v3, %s5639_s22 }
 0x247   : > { %4969 = vmatpush.msk.msra.mxu2 %vm5802_vm6, %v1717_v28  ;;  %4981 = vmatpush.msk.msra.mxu3 %vm5822_vm9, %v1713_v43  ;;  %v1411_v37 = vpop.permute.xlu2 %1410 }
 0x248   : > { %v1705_v7 = vpop.permute.xlu1 %1704  ;;  %v1409_v36 = vpop.permute.xlu0 %1408 }
 0x249   : > { %v1716_v41 = vsel %vm10040_vm11, %v1705_v7, %v1697_v60  ;;  %v1712_v62 = vsel %vm10041_vm3, %v1697_v60, %v1705_v7  ;;  %vm10050_vm11 = vnez %v10049_v34  ;;  %vm10051_vm3 = vmmov %vm10046_vm1  ;;  %v10057_v60 = vld [vmem:[#allocation15_spill] sm:$0xff] }
 0x24a   : > { %4970 = vmatpush.msk.msra.mxu2 %vm5802_vm6, %v1716_v41  ;;  %4982 = vmatpush.msk.msra.mxu3 %vm5822_vm9, %v1712_v62  ;;  %vm10065_vm9 = vcmp.lt.s32.totalorder %v10022_v22, 1  ;;  %v4960_v41 = vld [vmem:[%s9748_s3 + $0x88] sm:$0xff] }
 0x24b   : > { %4918 = vmatmul.msk.f32.gmra.mxu2 %vm9829_vm15, %v4906_v40  ;;  %4930 = vmatmul.msk.f32.gmra.mxu3 %vm9829_vm15, %v4906_v40  ;;  %vm10066_vm6 = vmmov %vm10065_vm9  ;;  %v1438_v40 = vld [vmem:[%s9748_s3 + $0x20] sm:$0xff] }
 0x24c   : > { %5031 = vmatpush.msk.msrb.mxu2 %vm5834_vm7, %v6323_v51  ;;  %5043 = vmatpush.msk.msrb.mxu3 %vm10044_vm12, %v6328_v13  ;;  %v1424_v51 = vsel %vm10051_vm3, %v6455_v38, %v1407_v56  ;;  %vm10053_vm3 = vmmov %vm10046_vm1 }
 0x24d   : > { %2501 = vrot.lane.b32.xlu2 %v6328_v13, %s5639_s22  ;;  %v2820_v13 = vld [vmem:[%s9749_s4 + $0x38] sm:$0xff] }
 0x24e   : > { %5032 = vmatpush.msk.msrb.mxu2 %vm5834_vm7, %v6305_v26  ;;  %5044 = vmatpush.msk.msrb.mxu3 %vm10044_vm12, %v6310_v9 }
 0x24f   : > { %2497 = vrot.lane.b32.xlu1 %v6337_v63, %s5639_s22  ;;  %2495 = vrot.lane.b32.xlu0 %v6339_v14, %s5639_s22  ;;  %v6555_v5 = vpop.permute.xlu2 %1863 }
 0x250   : > { %5033 = vmatpush.msk.msrb.mxu2 %vm5834_vm7, %v6280_v3  ;;  %5045 = vmatpush.msk.msrb.mxu3 %vm10044_vm12, %v6337_v63  ;;  %v1417_v26 = vpop.permute.xlu1 %1416  ;;  %v1413_v50 = vpop.permute.xlu0 %1412  ;;  %v10047_v3 = vld [vmem:[#allocation9_spill] sm:$0xff] }
 0x251   : > { %v1421_v9 = vsel %vm10045_vm13, %v1409_v36, %v1417_v26  ;;  %v1425_v42 = vsel %vm10046_vm1, %v1417_v26, %v1409_v36  ;;  %vm10048_vm14 = vnez %v10047_v3  ;;  %vm10052_vm13 = vmmov %vm10046_vm1  ;;  %v1423_v18 = vsel %vm10046_vm1, %v1413_v50, %v6487_v54 }
 0x252   : > { %5034 = vmatpush.msk.msrb.mxu2 %vm5834_vm7, %v6326_v8  ;;  %5046 = vmatpush.msk.msrb.mxu3 %vm10044_vm12, %v6339_v14  ;;  %v1420_v46 = vsel %vm10052_vm13, %v1407_v56, %v6455_v38  ;;  %v1419_v63 = vsel %vm10053_vm3, %v6487_v54, %v1413_v50  ;;  %vm10054_vm13 = vmmov %vm10046_vm1  ;;  %vm10055_vm3 = vcmp.lt.s32.totalorder %v10022_v22, 1  ;;  %vm10061_vm12 = vcmask 261120   ;;  %v1439_v50 = vld [vmem:[%s9748_s3 + $0x28] sm:$0xff] }
 0x253   : > { %4935 = vmatpush.msk.msrb.mxu0 %vm10048_vm14, %v1425_v42  ;;  %4947 = vmatpush.msk.msrb.mxu1 %vm10050_vm11, %v1421_v9  ;;  %vm10062_vm7 = vmmov %vm10061_vm12 }
 0x254   : > { %4919 = vmatmul.msk.f32.gmra.mxu2 %vm9829_vm15, %v4907_v6  ;;  %4931 = vmatmul.msk.f32.gmra.mxu3 %vm9829_vm15, %v4907_v6  ;;  %v4961_v6 = vld [vmem:[%s9748_s3 + $0x90] sm:$0xff] }
 0x255   : > { %4936 = vmatpush.msk.msrb.mxu0 %vm10048_vm14, %v1424_v51  ;;  %4948 = vmatpush.msk.msrb.mxu1 %vm10050_vm11, %v1420_v46  ;;  %v10079_v46 = vld [vmem:[#allocation22_spill] sm:$0xff] }
 0x256   : > { %2487 = vrot.lane.b32.xlu2 %v6326_v8, %s5639_s22  ;;  %v1434_v8 = vld [vmem:[%s9748_s3] sm:$0xff] }
 0x257   : > { %2858 = vperm.xlu1 %5462, %v2820_v13   ;;  %2848 = vperm.xlu0 %5464, %v2818_v44   ;;  %v1870_v14 = vpop.permute.xlu2 %1869 }
 0x258   : > { %4937 = vmatpush.msk.msrb.mxu0 %vm10048_vm14, %v1423_v18  ;;  %4949 = vmatpush.msk.msrb.mxu1 %vm10050_vm11, %v1419_v63  ;;  %v1403_v20 = vpop.permute.xlu1 %1402  ;;  %v1872_v1 = vpop.permute.xlu0 %1871 }
 0x259   : > { %v1422_v35 = vsel %vm10054_vm13, %v1411_v37, %v1403_v20  ;;  %v1418_v15 = vsel %vm10046_vm1, %v1403_v20, %v1411_v37  ;;  %vm10056_vm13 = vmmov %vm10055_vm3  ;;  %vm10058_vm1 = vnez %v10057_v60  ;;  %v1881_v54 = vsel %vm10065_vm9, %v1872_v1, %v6555_v5  ;;  %v4959_v37 = vld [vmem:[%s9748_s3 + $0x80] sm:$0xff] }
 0x25a   : > { %4938 = vmatpush.msk.msrb.mxu0 %vm10048_vm14, %v1422_v35  ;;  %4950 = vmatpush.msk.msrb.mxu1 %vm10050_vm11, %v1418_v15  ;;  %v1877_v17 = vsel %vm10066_vm6, %v6555_v5, %v1872_v1  ;;  %vm10069_vm9 = vmmov %vm10066_vm6 }
 0x25b   : > { %4939 = vmatmul.msk.f32.vlgmr.msrb.gmra.mxu0 %vm9829_vm15, %v1434_v8  ;;  %4951 = vmatmul.msk.f32.vlgmr.msrb.gmra.mxu1 %vm9829_vm15, %v1434_v8  ;;  %v1440_v8 = vld [vmem:[%s9748_s3 + $0x30] sm:$0xff] }
 0x25c   : > { %4920 = vmatmul.msk.f32.gmra.mxu2 %vm9829_vm15, %v4908_v0  ;;  %4932 = vmatmul.msk.f32.gmra.mxu3 %vm9829_vm15, %v4908_v0  ;;  %v4962_v0 = vld [vmem:[%s9748_s3 + $0x98] sm:$0xff] }
 0x25e   : > { %2853 = vperm.xlu2 %5463, %v2819_v53  }
 0x25f   : > { %2843 = vperm.xlu1 %5462, %v2817_v2   ;;  %2833 = vperm.xlu0 %5464, %v2815_v10   ;;  %v6637_v16 = vpop.permute.xlu2 %2336 }
 0x260   : > { %v1862_v25 = vpop.permute.xlu1 %1861  ;;  %v1866_v32 = vpop.permute.xlu0 %1865 }
 0x263   : > { %4940 = vmatmul.msk.f32.gmra.mxu0 %vm9829_vm15, %v1435_v29  ;;  %4952 = vmatmul.msk.f32.gmra.mxu1 %vm9829_vm15, %v1435_v29  ;;  %v4963_v29 = vld [vmem:[%s9748_s3 + $0xa0] sm:$0xff] }
 0x264   : > { %4921 = vmatmul.msk.f32.gmra.mxu2 %vm9829_vm15, %v4909_v30  ;;  %4933 = vmatmul.msk.f32.gmra.mxu3 %vm9829_vm15, %v4909_v30  ;;  %vm10060_vm15 = vnez %v10059_v61  ;;  %v10094_v30 = vld [vmem:[#allocation17_spill] sm:$0xff] }
 0x266   : > { %2838 = vperm.xlu2 %5463, %v2816_v12   ;;  %v10096_v12 = vld [vmem:[#allocation18_spill] sm:$0xff] }
 0x267   : > { %2828 = vperm.xlu1 %5462, %v2814_v31   ;;  %v6655_v38 = vpop.permute.xlu2 %2326 }
 0x268   : > { %v1874_v39 = vpop.permute.xlu1 %1873  ;;  %v1860_v45 = vpop.permute.xlu0 %1859 }
 0x269   : > { %v1878_v4 = vsel %vm10055_vm3, %v1866_v32, %v1874_v39  ;;  %v1882_v33 = vsel %vm10056_vm13, %v1874_v39, %v1866_v32  ;;  %vm10063_vm3 = vmmov %vm10062_vm7 }
 0x26a   : > { %4999 = vmatpush.msk.msra.mxu0 %vm10058_vm1, %v1882_v33  ;;  %5011 = vmatpush.msk.msra.mxu1 %vm10060_vm15, %v1878_v4  ;;  %vm10064_vm13 = vmmov %vm10063_vm3  ;;  %v4991_v33 = vld [vmem:[%s9748_s3 + $0xc0] sm:$0xff] }
 0x26b   : > { %4941 = vmatmul.msk.f32.gmra.mxu0 %vm10061_vm12, %v1436_v47  ;;  %4953 = vmatmul.msk.f32.gmra.mxu1 %vm10062_vm7, %v1436_v47  ;;  %vm10067_vm7 = vmmov %vm10066_vm6 }
 0x26c   : > { %4922 = vmatmul.msk.f32.gmra.mxu2 %vm10063_vm3, %v4910_v24  ;;  %4934 = vmatmul.msk.f32.gmra.mxu3 %vm10064_vm13, %v4910_v24  ;;  %v1880_v56 = vsel %vm10067_vm7, %v1870_v14, %v1862_v25  ;;  %vm10068_vm12 = vmmov %vm10066_vm6 }
 0x26d   : > { %5000 = vmatpush.msk.msra.mxu0 %vm10058_vm1, %v1881_v54  ;;  %5012 = vmatpush.msk.msra.mxu1 %vm10060_vm15, %v1877_v17  ;;  %v1876_v49 = vsel %vm10068_vm12, %v1862_v25, %v1870_v14  ;;  %vm10070_vm13 = vmmov %vm10063_vm3  ;;  %v4964_v17 = vld [vmem:[%s9748_s3 + $0xa8] sm:$0xff] }
 0x26e   : > { %2823 = vperm.xlu2 %5463, %v2813_v21   ;;  %vm10071_vm7 = vmmov %vm10063_vm3 }
 0x26f   : > { %5001 = vmatpush.msk.msra.mxu0 %vm10058_vm1, %v1880_v56  ;;  %5013 = vmatpush.msk.msra.mxu1 %vm10060_vm15, %v1876_v49  ;;  %v6699_v23 = vpop.permute.xlu2 %2173  ;;  %vm10072_vm12 = vmmov %vm10063_vm3 }
 0x270   : > { %v1868_v52 = vpop.permute.xlu1 %1867  ;;  %v2335_v48 = vpop.permute.xlu0 %2334 }
 0x271   : > { %v1879_v28 = vsel %vm10066_vm6, %v1868_v52, %v1860_v45  ;;  %v1875_v43 = vsel %vm10069_vm9, %v1860_v45, %v1868_v52  ;;  %vm10073_vm6 = vmmov %vm10063_vm3  ;;  %v4992_v52 = vld [vmem:[%s9748_s3 + $0xc8] sm:$0xff] }
 0x272   : > { %5002 = vmatpush.msk.msra.mxu0 %vm10058_vm1, %v1879_v28  ;;  %5014 = vmatpush.msk.msra.mxu1 %vm10060_vm15, %v1875_v43  ;;  %vm10074_vm9 = vmmov %vm10063_vm3  ;;  %v4993_v43 = vld [vmem:[%s9748_s3 + $0xd0] sm:$0xff] }
 0x273   : > { %4942 = vmatmul.msk.f32.gmra.mxu0 %vm10063_vm3, %v1437_v19  ;;  %4954 = vmatmul.msk.f32.gmra.mxu1 %vm10070_vm13, %v1437_v19  ;;  %vm10075_vm13 = vmmov %vm10063_vm3 }
 0x274   : > { %4971 = vmatmul.msk.f32.vlgmr.msra.gmra.mxu2 %vm10071_vm7, %v4959_v37  ;;  %4983 = vmatmul.msk.f32.vlgmr.msra.gmra.mxu3 %vm10072_vm12, %v4959_v37  ;;  %vm10076_vm7 = vcmp.lt.s32.totalorder %v10022_v22, 113  ;;  %v4966_v37 = vld [vmem:[%s9748_s3 + $0xb8] sm:$0xff] }
 0x275   : > { %vm10077_vm12 = vmmov %vm10076_vm7 }
 0x276   : > { %vm10084_vm11 = vmmov %vm10077_vm12 }
 0x277   : > { %v2331_v62 = vpop.permute.xlu2 %2330 }
 0x278   : > { %v2329_v7 = vpop.permute.xlu1 %2328  ;;  %v2325_v36 = vpop.permute.xlu0 %2324 }
 0x279   : > { %v2342_v13 = vsel %vm10077_vm12, %v2329_v7, %v6637_v16  ;;  %v2346_v44 = vsel %vm10084_vm11, %v6637_v16, %v2329_v7  ;;  %v1441_v16 = vld [vmem:[%s9748_s3 + $0x38] sm:$0xff] }
 0x27b   : > { %4943 = vmatmul.msk.f32.gmra.mxu0 %vm10073_vm6, %v1438_v40  ;;  %4955 = vmatmul.msk.f32.gmra.mxu1 %vm10074_vm9, %v1438_v40  ;;  %vm10080_vm6 = vnez %v10079_v46  ;;  %vm10081_vm9 = vmmov %vm10063_vm3 }
 0x27c   : > { %4972 = vmatmul.msk.f32.gmra.mxu2 %vm10063_vm3, %v4960_v41  ;;  %4984 = vmatmul.msk.f32.gmra.mxu3 %vm10075_vm13, %v4960_v41  ;;  %vm10082_vm13 = vmmov %vm10063_vm3  ;;  %v4994_v41 = vld [vmem:[%s9748_s3 + $0xd8] sm:$0xff] }
 0x27f   : > { %v2164_v18 = vpop.permute.xlu2 %2163 }
 0x280   : > { %v2166_v5 = vpop.permute.xlu1 %2165  ;;  %v2339_v26 = vpop.permute.xlu0 %2338 }
 0x281   : > { %v2343_v9 = vsel %vm10076_vm7, %v2331_v62, %v2339_v26  ;;  %v2347_v42 = vsel %vm10077_vm12, %v2339_v26, %v2331_v62  ;;  %vm10083_vm7 = vmmov %vm10063_vm3  ;;  %v5023_v62 = vld [vmem:[%s9748_s3 + $0x100] sm:$0xff] }
 0x282   : > { %5095 = vmatpush.msk.msra.mxu2 %vm6000_vm2, %v2343_v9  ;;  %5107 = vmatpush.msk.msra.mxu3 %vm10080_vm6, %v2347_v42  ;;  %vm10089_vm12 = vmmov %vm10083_vm7 }
 0x283   : > { %4944 = vmatmul.msk.f32.gmra.mxu0 %vm10081_vm9, %v1439_v50  ;;  %4956 = vmatmul.msk.f32.gmra.mxu1 %vm10063_vm3, %v1439_v50  ;;  %vm10085_vm9 = vmmov %vm10084_vm11  ;;  %v5156_v50 = vld [vmem:[%s9748_s3 + $0x228] sm:$0xff] }
 0x284   : > { %4973 = vmatmul.msk.f32.gmra.mxu2 %vm10082_vm13, %v4961_v6  ;;  %4985 = vmatmul.msk.f32.gmra.mxu3 %vm10083_vm7, %v4961_v6  ;;  %v2341_v63 = vsel %vm10085_vm9, %v6655_v38, %v2335_v48  ;;  %vm10086_vm3 = vmmov %vm10085_vm9 }
 0x285   : > { %5096 = vmatpush.msk.msra.mxu2 %vm6000_vm2, %v2342_v13  ;;  %5108 = vmatpush.msk.msra.mxu3 %vm10080_vm6, %v2346_v44  ;;  %v2345_v14 = vsel %vm10086_vm3, %v2335_v48, %v6655_v38  ;;  %vm10087_vm11 = vmmov %vm10086_vm3  ;;  %v4965_v48 = vld [vmem:[%s9748_s3 + $0xb0] sm:$0xff] }
 0x286   : > { %vm10088_vm13 = vmmov %vm10086_vm3 }
 0x287   : > { %5097 = vmatpush.msk.msra.mxu2 %vm6000_vm2, %v2341_v63  ;;  %5109 = vmatpush.msk.msra.mxu3 %vm10080_vm6, %v2345_v14  ;;  %vm10090_vm9 = vmmov %vm10083_vm7  ;;  %v2170_v53 = vpop.permute.xlu2 %2169 }
 0x288   : > { %v2333_v20 = vpop.permute.xlu1 %2332  ;;  %v2168_v1 = vpop.permute.xlu0 %2167  ;;  %vm10091_vm3 = vmmov %vm10083_vm7 }
 0x289   : > { %v2340_v35 = vsel %vm10087_vm11, %v2325_v36, %v2333_v20  ;;  %v2344_v15 = vsel %vm10088_vm13, %v2333_v20, %v2325_v36  ;;  %vm10092_vm11 = vcmp.lt.s32.totalorder %v10022_v22, 127 }
 0x28a   : > { %5098 = vmatpush.msk.msra.mxu2 %vm6000_vm2, %v2340_v35  ;;  %5110 = vmatpush.msk.msra.mxu3 %vm10080_vm6, %v2344_v15  ;;  %vm10093_vm13 = vmmov %vm10092_vm11  ;;  %v4995_v15 = vld [vmem:[%s9748_s3 + $0xe0] sm:$0xff] }
 0x28b   : > { %4945 = vmatmul.msk.f32.gmra.mxu0 %vm10083_vm7, %v1440_v8  ;;  %4957 = vmatmul.msk.f32.gmra.mxu1 %vm10089_vm12, %v1440_v8  ;;  %vm10095_vm7 = vnez %v10094_v30  ;;  %vm10097_vm12 = vnez %v10096_v12  ;;  %vm10099_vm6 = vmmov %vm10091_vm3  ;;  %v2179_v31 = vsel %vm10093_vm13, %v2166_v5, %v6699_v23 }
 0x28c   : > { %4974 = vmatmul.msk.f32.gmra.mxu2 %vm10090_vm9, %v4962_v0  ;;  %4986 = vmatmul.msk.f32.gmra.mxu3 %vm10091_vm3, %v4962_v0  ;;  %vm10098_vm9 = vmmov %vm10091_vm3 }
 0x28d   : > { %vm10101_vm2 = vmmov %vm10093_vm13 }
 0x28e   : > { %v2183_v38 = vsel %vm10101_vm2, %v6699_v23, %v2166_v5 }
 0x28f   : > { %v2655_v24 = vpop.permute.xlu2 %2654 }
 0x290   : > { %v2176_v2 = vpop.permute.xlu1 %2175  ;;  %v2172_v10 = vpop.permute.xlu0 %2171 }
 0x291   : > { %v2180_v25 = vsel %vm10092_vm11, %v2168_v1, %v2176_v2  ;;  %v2184_v32 = vsel %vm10093_vm13, %v2176_v2, %v2168_v1  ;;  %vm10100_vm11 = vmmov %vm10091_vm3 }
 0x292   : > { %5063 = vmatpush.msk.msrb.mxu0 %vm10095_vm7, %v2180_v25  ;;  %5075 = vmatpush.msk.msrb.mxu1 %vm10097_vm12, %v2184_v32  ;;  %vm10105_vm13 = vmmov %vm10100_vm11 }
 0x293   : > { %4946 = vmatmul.msk.f32.gmra.mxu0 %vm10098_vm9, %v1441_v16  ;;  %4958 = vmatmul.msk.f32.gmra.mxu1 %vm10091_vm3, %v1441_v16  ;;  %vm10102_vm9 = vmmov %vm10101_vm2  ;;  %v5024_v16 = vld [vmem:[%s9748_s3 + $0x108] sm:$0xff] }
 0x294   : > { %4975 = vmatmul.msk.f32.gmra.mxu2 %vm10099_vm6, %v4963_v29  ;;  %4987 = vmatmul.msk.f32.gmra.mxu3 %vm10100_vm11, %v4963_v29  ;;  %v2178_v39 = vsel %vm10102_vm9, %v2164_v18, %v2172_v10  ;;  %vm10103_vm6 = vmmov %vm10101_vm2 }
 0x295   : > { %5064 = vmatpush.msk.msrb.mxu0 %vm10095_vm7, %v2179_v31  ;;  %5076 = vmatpush.msk.msrb.mxu1 %vm10097_vm12, %v2183_v38  ;;  %v2182_v45 = vsel %vm10103_vm6, %v2172_v10, %v2164_v18  ;;  %vm10104_vm3 = vmmov %vm10101_vm2  ;;  %v10130_v10 = vld [vmem:[#allocation20_spill] sm:$0xff] }
 0x296   : > { %vm10106_vm9 = vmmov %vm10100_vm11 }
 0x297   : > { %5065 = vmatpush.msk.msrb.mxu0 %vm10095_vm7, %v2178_v39  ;;  %5077 = vmatpush.msk.msrb.mxu1 %vm10097_vm12, %v2182_v45  ;;  %vm10107_vm6 = vmmov %vm10106_vm9  ;;  %v2492_v19 = vpop.permute.xlu2 %2491  ;;  %v4996_v39 = vld [vmem:[%s9748_s3 + $0xe8] sm:$0xff] }
 0x298   : > { %v2162_v47 = vpop.permute.xlu1 %2161  ;;  %v2663_v4 = vpop.permute.xlu0 %2662 }
 0x299   : > { %v2177_v21 = vsel %vm10101_vm2, %v2162_v47, %v2170_v53  ;;  %v2181_v54 = vsel %vm10104_vm3, %v2170_v53, %v2162_v47  ;;  %vm10108_vm2 = vmmov %vm10107_vm6 }
 0x29a   : > { %5066 = vmatpush.msk.msrb.mxu0 %vm10095_vm7, %v2177_v21  ;;  %5078 = vmatpush.msk.msrb.mxu1 %vm10097_vm12, %v2181_v54  ;;  %vm10109_vm3 = vmmov %vm10108_vm2 }
 0x29b   : > { %5003 = vmatmul.msk.f32.vlgmr.msra.gmra.mxu0 %vm10100_vm11, %v4991_v33  ;;  %5015 = vmatmul.msk.f32.vlgmr.msra.gmra.mxu1 %vm10105_vm13, %v4991_v33  ;;  %vm10110_vm11 = vmmov %vm10108_vm2  ;;  %v5025_v33 = vld [vmem:[%s9748_s3 + $0x110] sm:$0xff] }
 0x29c   : > { %4976 = vmatmul.msk.f32.gmra.mxu2 %vm10106_vm9, %v4964_v17  ;;  %4988 = vmatmul.msk.f32.gmra.mxu3 %vm10107_vm6, %v4964_v17  ;;  %vm10111_vm13 = vmmov %vm10108_vm2 }
 0x29d   : > { %vm10112_vm9 = vmmov %vm10108_vm2 }
 0x29e   : > { %vm10113_vm6 = vmmov %vm10108_vm2 }
 0x29f   : > { %v2659_v7 = vpop.permute.xlu2 %2658 }
 0x2a0   : > { %v2661_v56 = vpop.permute.xlu1 %2660  ;;  %v2653_v49 = vpop.permute.xlu0 %2652 }
 0x2a3   : > { %5004 = vmatmul.msk.f32.gmra.mxu0 %vm10108_vm2, %v4992_v52  ;;  %5016 = vmatmul.msk.f32.gmra.mxu1 %vm10109_vm3, %v4992_v52  ;;  %vm10114_vm3 = vmmov %vm10108_vm2  ;;  %v5026_v52 = vld [vmem:[%s9748_s3 + $0x118] sm:$0xff] }
 0x2a4   : > { %4977 = vmatmul.msk.f32.gmra.mxu2 %vm10110_vm11, %v4965_v48  ;;  %4989 = vmatmul.msk.f32.gmra.mxu3 %vm10111_vm13, %v4965_v48  ;;  %vm10115_vm11 = vcmp.lt.s32.totalorder %v10022_v22, 111 }
 0x2a5   : > { %vm10116_vm13 = vmmov %vm10115_vm11  ;;  %v2672_v6 = vsel %vm10115_vm11, %v2663_v4, %v2655_v24 }
 0x2a6   : > { %vm10122_vm12 = vmmov %vm10115_vm11 }
 0x2a7   : > { %v2668_v42 = vsel %vm10122_vm12, %v2655_v24, %v2663_v4  ;;  %v2502_v18 = vpop.permute.xlu2 %2501  ;;  %vm10125_vm12 = vcmp.lt.s32.totalorder %v10022_v22, 112 }
 0x2a8   : > { %v2651_v23 = vpop.permute.xlu1 %2650  ;;  %v2500_v28 = vpop.permute.xlu0 %2499 }
 0x2ab   : > { %5005 = vmatmul.msk.f32.gmra.mxu0 %vm10112_vm9, %v4993_v43  ;;  %5017 = vmatmul.msk.f32.gmra.mxu1 %vm10113_vm6, %v4993_v43  ;;  %vm10117_vm9 = vmmov %vm10108_vm2 }
 0x2ac   : > { %4978 = vmatmul.msk.f32.gmra.mxu2 %vm10108_vm2, %v4966_v37  ;;  %4990 = vmatmul.msk.f32.gmra.mxu3 %vm10114_vm3, %v4966_v37  ;;  %vm10118_vm6 = vmmov %vm10108_vm2 }
 0x2ad   : > { %vm10119_vm3 = vmmov %vm10108_vm2 }
 0x2b0   : > { %v2665_v36 = vpop.permute.xlu1 %2664  ;;  %v2657_v40 = vpop.permute.xlu0 %2656 }
 0x2b1   : > { %v2669_v5 = vsel %vm10115_vm11, %v2657_v40, %v2665_v36  ;;  %v2673_v26 = vsel %vm10116_vm13, %v2665_v36, %v2657_v40  ;;  %vm10123_vm13 = vmmov %vm10115_vm11  ;;  %v2488_v24 = vpop.permute.xlu2 %2487  ;;  %v5055_v40 = vld [vmem:[%s9748_s3 + $0x140] sm:$0xff] }
 0x2b2   : > { %v2667_v63 = vsel %vm10123_vm13, %v2653_v49, %v2661_v56  ;;  %vm10132_vm13 = vcmask 261120  }
 0x2b3   : > { %5006 = vmatmul.msk.f32.gmra.mxu0 %vm10117_vm9, %v4994_v41  ;;  %5018 = vmatmul.msk.f32.gmra.mxu1 %vm10118_vm6, %v4994_v41  ;;  %vm10124_vm9 = vmmov %vm10115_vm11  ;;  %vm10131_vm11 = vnez %v10130_v10  ;;  %v5028_v41 = vld [vmem:[%s9748_s3 + $0x128] sm:$0xff] }
 0x2b4   : > { %5035 = vmatmul.msk.f32.vlgmr.msrb.gmra.mxu2 %vm10108_vm2, %v5023_v62  ;;  %5047 = vmatmul.msk.f32.vlgmr.msrb.gmra.mxu3 %vm10119_vm3, %v5023_v62  ;;  %v2671_v14 = vsel %vm10124_vm9, %v2661_v56, %v2653_v49  ;;  %vm10126_vm6 = vmmov %vm10125_vm12  ;;  %v4997_v49 = vld [vmem:[%s9748_s3 + $0xf0] sm:$0xff] }
 0x2b5   : > { %5159 = vmatpush.msk.msrb.mxu2 %vm6078_vm0, %v2669_v5  ;;  %5171 = vmatpush.msk.msrb.mxu3 %vm6087_vm10, %v2673_v26  ;;  %vm10127_vm2 = vmmov %vm10124_vm9 }
 0x2b6   : > { %v6878_v13 = vpop.f32.mrf.mxu2  ;;  %v6880_v44 = vpop.f32.mrf.mxu3  ;;  %v2666_v0 = vsel %vm10127_vm2, %v2651_v23, %v2659_v7  ;;  %vm10128_vm3 = vmmov %vm10127_vm2  ;;  %vm10136_vm2 = vcmp.lt.s32.totalorder %v10022_v22, 112 }
 0x2b7   : > { %5160 = vmatpush.msk.msrb.mxu2 %vm6078_vm0, %v2668_v42  ;;  %5172 = vmatpush.msk.msrb.mxu3 %vm6087_vm10, %v2672_v6  ;;  %v2670_v53 = vsel %vm10128_vm3, %v2659_v7, %v2651_v23  ;;  %vm10133_vm9 = vmmov %vm10132_vm13  ;;  %v2505_v25 = vsel %vm10136_vm2, %v2492_v19, %v2500_v28  ;;  %v4998_v23 = vld [vmem:[%s9748_s3 + $0xf8] sm:$0xff]  ;;  %v5056_v6 = vld [vmem:[%s9748_s3 + $0x148] sm:$0xff] }
 0x2b8   : > { %v2494_v20 = vpop.permute.xlu1 %2493  ;;  %v2490_v1 = vpop.permute.xlu0 %2489  ;;  %vm10137_vm3 = vmmov %vm10136_vm2 }
 0x2b9   : > { %5161 = vmatpush.msk.msrb.mxu2 %vm6078_vm0, %v2667_v63  ;;  %5173 = vmatpush.msk.msrb.mxu3 %vm6087_vm10, %v2671_v14  ;;  %v2506_v8 = vsel %vm10125_vm12, %v2494_v20, %v2502_v18  ;;  %v2510_v35 = vsel %vm10126_vm6, %v2502_v18, %v2494_v20  ;;  %vm10134_vm12 = vmmov %vm10133_vm9  ;;  %v2509_v32 = vsel %vm10137_vm3, %v2500_v28, %v2492_v19  ;;  %v5027_v28 = vld [vmem:[%s9748_s3 + $0x120] sm:$0xff]  ;;  %v5029_v18 = vld [vmem:[%s9748_s3 + $0x130] sm:$0xff] }
 0x2ba   : > { %5127 = vmatpush.msk.msra.mxu0 %vm5984_vm4, %v2506_v8  ;;  %5139 = vmatpush.msk.msra.mxu1 %vm10131_vm11, %v2510_v35  ;;  %vm10135_vm6 = vmmov %vm10133_vm9  ;;  %v5057_v8 = vld [vmem:[%s9748_s3 + $0x150] sm:$0xff]  ;;  %v5030_v35 = vld [vmem:[%s9748_s3 + $0x138] sm:$0xff] }
 0x2bb   : > { %5162 = vmatpush.msk.msrb.mxu2 %vm6078_vm0, %v2666_v0  ;;  %5174 = vmatpush.msk.msrb.mxu3 %vm6087_vm10, %v2670_v53 }
 0x2bc   : > { %5007 = vmatmul.msk.f32.gmra.mxu0 %vm10132_vm13, %v4995_v15  ;;  %5019 = vmatmul.msk.f32.gmra.mxu1 %vm10133_vm9, %v4995_v15  ;;  %vm10138_vm13 = vmmov %vm10136_vm2 }
 0x2bd   : > { %5036 = vmatmul.msk.f32.gmra.mxu2 %vm10134_vm12, %v5024_v16  ;;  %5048 = vmatmul.msk.f32.gmra.mxu3 %vm10135_vm6, %v5024_v16  ;;  %vm10139_vm9 = vmmov %vm10136_vm2 }
 0x2be   : > { %5128 = vmatpush.msk.msra.mxu0 %vm5984_vm4, %v2505_v25  ;;  %5140 = vmatpush.msk.msra.mxu1 %vm10131_vm11, %v2509_v32  ;;  %v6928_v29 = vpop.f32.mrf.mxu2  ;;  %v6930_v31 = vpop.f32.mrf.mxu3  ;;  %vm10140_vm12 = vmmov %vm10135_vm6  ;;  %v5058_v25 = vld [vmem:[%s9748_s3 + $0x158] sm:$0xff]  ;;  %v5087_v32 = vld [vmem:[%s9748_s3 + $0x180] sm:$0xff] }
 0x2bf   : > { %vm10141_vm2 = vmmov %vm10135_vm6 }
 0x2c0   : > { %vm10142_vm3 = vmmov %vm10141_vm2 }
 0x2c1   : > { %v2498_v38 = vpop.permute.xlu1 %2497  ;;  %v2496_v45 = vpop.permute.xlu0 %2495 }
 0x2c2   : > { %v2504_v47 = vsel %vm10138_vm13, %v2490_v1, %v2498_v38  ;;  %v2508_v4 = vsel %vm10139_vm9, %v2498_v38, %v2490_v1  ;;  %vm10143_vm13 = vmmov %vm10139_vm9  ;;  %v2507_v54 = vsel %vm10139_vm9, %v2496_v45, %v2488_v24 }
 0x2c3   : > { %5129 = vmatpush.msk.msra.mxu0 %vm5984_vm4, %v2504_v47  ;;  %5141 = vmatpush.msk.msra.mxu1 %vm10131_vm11, %v2508_v4  ;;  %v2503_v21 = vsel %vm10143_vm13, %v2488_v24, %v2496_v45  ;;  %vm10147_vm13 = vmmov %vm10141_vm2 }
 0x2c4   : > { %5008 = vmatmul.msk.f32.gmra.mxu0 %vm10140_vm12, %v4996_v39  ;;  %5020 = vmatmul.msk.f32.gmra.mxu1 %vm10135_vm6, %v4996_v39  ;;  %vm10144_vm12 = vmmov %vm10141_vm2 }
 0x2c5   : > { %5037 = vmatmul.msk.f32.gmra.mxu2 %vm10141_vm2, %v5025_v33  ;;  %5049 = vmatmul.msk.f32.gmra.mxu3 %vm10142_vm3, %v5025_v33  ;;  %vm10145_vm6 = vmmov %vm10141_vm2 }
 0x2c6   : > { %5130 = vmatpush.msk.msra.mxu0 %vm5984_vm4, %v2503_v21  ;;  %5142 = vmatpush.msk.msra.mxu1 %vm10131_vm11, %v2507_v54  ;;  %v6958_v17 = vpop.f32.mrf.mxu2  ;;  %v6960_v56 = vpop.f32.mrf.mxu3  ;;  %vm10146_vm3 = vmmov %vm10141_vm2  ;;  %v5059_v54 = vld [vmem:[%s9748_s3 + $0x160] sm:$0xff] }
 0x2c7   : > { %vm10148_vm9 = vmmov %vm10141_vm2 }
 0x2cc   : > { %5009 = vmatmul.msk.f32.gmra.mxu0 %vm10144_vm12, %v4997_v49  ;;  %5021 = vmatmul.msk.f32.gmra.mxu1 %vm10145_vm6, %v4997_v49  ;;  %vm10149_vm12 = vmmov %vm10141_vm2  ;;  %v5088_v49 = vld [vmem:[%s9748_s3 + $0x188] sm:$0xff] }
 0x2cd   : > { %5038 = vmatmul.msk.f32.gmra.mxu2 %vm10141_vm2, %v5026_v52  ;;  %5050 = vmatmul.msk.f32.gmra.mxu3 %vm10146_vm3, %v5026_v52  ;;  %vm10150_vm6 = vmmov %vm10141_vm2 }
 0x2ce   : > { %v6972_v48 = vpop.f32.mrf.mxu2  ;;  %v6974_v19 = vpop.f32.mrf.mxu3  ;;  %vm10151_vm3 = vmmov %vm10141_vm2 }
 0x2d4   : > { %5010 = vmatmul.msk.f32.gmra.mxu0 %vm10147_vm13, %v4998_v23  ;;  %5022 = vmatmul.msk.f32.gmra.mxu1 %vm10148_vm9, %v4998_v23  ;;  %vm10152_vm13 = vmmov %vm10141_vm2 }
 0x2d5   : > { %5039 = vmatmul.msk.f32.gmra.mxu2 %vm10149_vm12, %v5027_v28  ;;  %5051 = vmatmul.msk.f32.gmra.mxu3 %vm10150_vm6, %v5027_v28  ;;  %vm10153_vm9 = vmmov %vm10141_vm2 }
 0x2d6   : > { %vm10154_vm12 = vmmov %vm10141_vm2 }
 0x2d7   : > { %v6986_v43 = vpop.f32.mrf.mxu2  ;;  %v6988_v37 = vpop.f32.mrf.mxu3  ;;  %vm10155_vm6 = vmmov %vm10141_vm2 }
 0x2d8   : > { %v1631_v7 = vpop.f32.mrf.mxu0  ;;  %v1672_v36 = vpop.f32.mrf.mxu1 }
 0x2d9   : > { %v1632_v38 = vadd.f32 %v1631_v7, %v6878_v13  ;;  %v1673_v39 = vadd.f32 %v1672_v36, %v6880_v44 }
 0x2dc   : > { %5067 = vmatmul.msk.f32.vlgmr.msrb.gmra.mxu0 %vm10141_vm2, %v5055_v40  ;;  %5079 = vmatmul.msk.f32.vlgmr.msrb.gmra.mxu1 %vm10151_vm3, %v5055_v40  ;;  %vm10156_vm3 = vmmov %vm10141_vm2 }
 0x2dd   : > { %5040 = vmatmul.msk.f32.gmra.mxu2 %vm10152_vm13, %v5028_v41  ;;  %5052 = vmatmul.msk.f32.gmra.mxu3 %vm10153_vm9, %v5028_v41  ;;  %vm10157_vm13 = vmmov %vm10141_vm2  ;;  %v5060_v41 = vld [vmem:[%s9748_s3 + $0x168] sm:$0xff] }
 0x2de   : > { %vm10158_vm9 = vmmov %vm10141_vm2 }
 0x2df   : > { %v7000_v62 = vpop.f32.mrf.mxu2  ;;  %v7002_v5 = vpop.f32.mrf.mxu3 }
 0x2e0   : > { %v1634_v26 = vpop.f32.mrf.mxu0  ;;  %v1675_v42 = vpop.f32.mrf.mxu1 }
 0x2e1   : > { %v1635_v13 = vadd.f32 %v1634_v26, %v6928_v29  ;;  %v1676_v44 = vadd.f32 %v1675_v42, %v6930_v31 }
 0x2e4   : > { %5068 = vmatmul.msk.f32.gmra.mxu0 %vm10154_vm12, %v5056_v6  ;;  %5080 = vmatmul.msk.f32.gmra.mxu1 %vm10155_vm6, %v5056_v6  ;;  %vm10159_vm12 = vmmov %vm10141_vm2  ;;  %v5089_v6 = vld [vmem:[%s9748_s3 + $0x190] sm:$0xff] }
 0x2e5   : > { %5041 = vmatmul.msk.f32.gmra.mxu2 %vm10141_vm2, %v5029_v18  ;;  %5053 = vmatmul.msk.f32.gmra.mxu3 %vm10156_vm3, %v5029_v18  ;;  %vm10160_vm6 = vmmov %vm10141_vm2 }
 0x2e6   : > { %vm10161_vm3 = vmmov %vm10141_vm2 }
 0x2e7   : > { %v7014_v63 = vpop.f32.mrf.mxu2  ;;  %v7016_v14 = vpop.f32.mrf.mxu3 }
 0x2e8   : > { %v1637_v20 = vpop.f32.mrf.mxu0  ;;  %v1678_v1 = vpop.f32.mrf.mxu1 }
 0x2e9   : > { %v1638_v29 = vadd.f32 %v1637_v20, %v6958_v17  ;;  %v1679_v31 = vadd.f32 %v1678_v1, %v6960_v56 }
 0x2ec   : > { %5069 = vmatmul.msk.f32.gmra.mxu0 %vm10157_vm13, %v5057_v8  ;;  %5081 = vmatmul.msk.f32.gmra.mxu1 %vm10158_vm9, %v5057_v8  ;;  %vm10162_vm13 = vmmov %vm10141_vm2 }
 0x2ed   : > { %5042 = vmatmul.msk.f32.gmra.mxu2 %vm10159_vm12, %v5030_v35  ;;  %5054 = vmatmul.msk.f32.gmra.mxu3 %vm10160_vm6, %v5030_v35  ;;  %vm10163_vm9 = vmmov %vm10141_vm2 }
 0x2ee   : > { %vm10164_vm12 = vmmov %vm10141_vm2 }
 0x2ef   : > { %v7028_v15 = vpop.f32.mrf.mxu2  ;;  %v7030_v0 = vpop.f32.mrf.mxu3  ;;  %vm10165_vm6 = vmmov %vm10141_vm2 }
 0x2f0   : > { %v1640_v53 = vpop.f32.mrf.mxu0  ;;  %v1681_v16 = vpop.f32.mrf.mxu1 }
 0x2f1   : > { %v1641_v17 = vadd.f32 %v1640_v53, %v6972_v48  ;;  %v1682_v56 = vadd.f32 %v1681_v16, %v6974_v19 }
 0x2f4   : > { %5070 = vmatmul.msk.f32.gmra.mxu0 %vm10141_vm2, %v5058_v25  ;;  %5082 = vmatmul.msk.f32.gmra.mxu1 %vm10161_vm3, %v5058_v25  ;;  %vm10166_vm3 = vmmov %vm10141_vm2 }
 0x2f5   : > { %5099 = vmatmul.msk.f32.vlgmr.msra.gmra.mxu2 %vm10162_vm13, %v5087_v32  ;;  %5111 = vmatmul.msk.f32.vlgmr.msra.gmra.mxu3 %vm10163_vm9, %v5087_v32  ;;  %vm10167_vm13 = vmmov %vm10141_vm2  ;;  %v5061_v32 = vld [vmem:[%s9748_s3 + $0x170] sm:$0xff] }
 0x2f6   : > { %vm10168_vm9 = vmmov %vm10141_vm2 }
 0x2f7   : > { %v1778_v45 = vpop.f32.mrf.mxu2  ;;  %v1819_v47 = vpop.f32.mrf.mxu3 }
 0x2f8   : > { %v7044_v4 = vadd.f32 %v1778_v45, %v1632_v38  ;;  %v7046_v33 = vadd.f32 %v1819_v47, %v1673_v39  ;;  %v1643_v24 = vpop.f32.mrf.mxu0  ;;  %v1684_v21 = vpop.f32.mrf.mxu1  ;;  %v5090_v38 = vld [vmem:[%s9748_s3 + $0x198] sm:$0xff] }
 0x2f9   : > { %v1644_v48 = vadd.f32 %v1643_v24, %v6986_v43  ;;  %v1685_v19 = vadd.f32 %v1684_v21, %v6988_v37  ;;  %v5092_v43 = vld [vmem:[%s9748_s3 + $0x1a8] sm:$0xff] }
 0x2fc   : > { %5071 = vmatmul.msk.f32.gmra.mxu0 %vm10164_vm12, %v5059_v54  ;;  %5083 = vmatmul.msk.f32.gmra.mxu1 %vm10165_vm6, %v5059_v54  ;;  %vm10169_vm12 = vmmov %vm10141_vm2 }
 0x2fd   : > { %5100 = vmatmul.msk.f32.gmra.mxu2 %vm10141_vm2, %v5088_v49  ;;  %5112 = vmatmul.msk.f32.gmra.mxu3 %vm10166_vm3, %v5088_v49  ;;  %vm10170_vm6 = vmmov %vm10141_vm2  ;;  %v5062_v49 = vld [vmem:[%s9748_s3 + $0x178] sm:$0xff] }
 0x2fe   : > { %vm10171_vm3 = vmmov %vm10141_vm2 }
 0x2ff   : > { %v1781_v52 = vpop.f32.mrf.mxu2  ;;  %v1822_v23 = vpop.f32.mrf.mxu3 }
 0x300   : > { %v7060_v28 = vadd.f32 %v1781_v52, %v1635_v13  ;;  %v7062_v7 = vadd.f32 %v1822_v23, %v1676_v44  ;;  %v1646_v36 = vpop.f32.mrf.mxu0  ;;  %v1687_v40 = vpop.f32.mrf.mxu1  ;;  %v5091_v13 = vld [vmem:[%s9748_s3 + $0x1a0] sm:$0xff] }
 0x301   : > { %v1647_v37 = vadd.f32 %v1646_v36, %v7000_v62  ;;  %v1688_v24 = vadd.f32 %v1687_v40, %v7002_v5  ;;  %v5093_v62 = vld [vmem:[%s9748_s3 + $0x1b0] sm:$0xff] }
 0x304   : > { %5072 = vmatmul.msk.f32.gmra.mxu0 %vm10167_vm13, %v5060_v41  ;;  %5084 = vmatmul.msk.f32.gmra.mxu1 %vm10168_vm9, %v5060_v41  ;;  %vm10172_vm13 = vmmov %vm10141_vm2 }
 0x305   : > { %5101 = vmatmul.msk.f32.gmra.mxu2 %vm10169_vm12, %v5089_v6  ;;  %5113 = vmatmul.msk.f32.gmra.mxu3 %vm10170_vm6, %v5089_v6  ;;  %vm10173_vm9 = vmmov %vm10141_vm2  ;;  %v5119_v6 = vld [vmem:[%s9748_s3 + $0x1c0] sm:$0xff] }
 0x306   : > { %vm10174_vm12 = vmmov %vm10141_vm2 }
 0x307   : > { %v1784_v26 = vpop.f32.mrf.mxu2  ;;  %v1825_v42 = vpop.f32.mrf.mxu3  ;;  %vm10175_vm6 = vmmov %vm10141_vm2 }
 0x308   : > { %v7076_v18 = vadd.f32 %v1784_v26, %v1638_v29  ;;  %v7078_v8 = vadd.f32 %v1825_v42, %v1679_v31  ;;  %v1649_v35 = vpop.f32.mrf.mxu0  ;;  %v1690_v25 = vpop.f32.mrf.mxu1 }
 0x309   : > { %v1650_v5 = vadd.f32 %v1649_v35, %v7014_v63  ;;  %v1691_v36 = vadd.f32 %v1690_v25, %v7016_v14  ;;  %v5094_v63 = vld [vmem:[%s9748_s3 + $0x1b8] sm:$0xff] }
 0x30c   : > { %5073 = vmatmul.msk.f32.gmra.mxu0 %vm10141_vm2, %v5061_v32  ;;  %5085 = vmatmul.msk.f32.gmra.mxu1 %vm10171_vm3, %v5061_v32  ;;  %vm10176_vm3 = vmmov %vm10141_vm2 }
 0x30d   : > { %5102 = vmatmul.msk.f32.gmra.mxu2 %vm10172_vm13, %v5090_v38  ;;  %5114 = vmatmul.msk.f32.gmra.mxu3 %vm10173_vm9, %v5090_v38  ;;  %vm10177_vm13 = vmmov %vm10141_vm2  ;;  %v5120_v38 = vld [vmem:[%s9748_s3 + $0x1c8] sm:$0xff] }
 0x30e   : > { %vm10178_vm9 = vmmov %vm10141_vm2 }
 0x30f   : > { %v1787_v20 = vpop.f32.mrf.mxu2  ;;  %v1828_v1 = vpop.f32.mrf.mxu3 }
 0x310   : > { %v7092_v39 = vadd.f32 %v1787_v20, %v1641_v17  ;;  %v7094_v45 = vadd.f32 %v1828_v1, %v1682_v56  ;;  %v1652_v47 = vpop.f32.mrf.mxu0  ;;  %v1693_v54 = vpop.f32.mrf.mxu1 }
 0x311   : > { %v1653_v14 = vadd.f32 %v1652_v47, %v7028_v15  ;;  %v1694_v35 = vadd.f32 %v1693_v54, %v7030_v0  ;;  %v5151_v15 = vld [vmem:[%s9748_s3 + $0x200] sm:$0xff] }
 0x314   : > { %5074 = vmatmul.msk.f32.gmra.mxu0 %vm10174_vm12, %v5062_v49  ;;  %5086 = vmatmul.msk.f32.gmra.mxu1 %vm10175_vm6, %v5062_v49  ;;  %vm10179_vm12 = vmmov %vm10141_vm2 }
 0x315   : > { %5103 = vmatmul.msk.f32.gmra.mxu2 %vm10141_vm2, %v5091_v13  ;;  %5115 = vmatmul.msk.f32.gmra.mxu3 %vm10176_vm3, %v5091_v13  ;;  %vm10180_vm6 = vmmov %vm10141_vm2  ;;  %v5121_v13 = vld [vmem:[%s9748_s3 + $0x1d0] sm:$0xff] }
 0x316   : > { %vm10181_vm3 = vmmov %vm10141_vm2 }
 0x317   : > { %v1790_v53 = vpop.f32.mrf.mxu2  ;;  %v1831_v16 = vpop.f32.mrf.mxu3 }
 0x318   : > { %v7108_v44 = vadd.f32 %v1790_v53, %v1644_v48  ;;  %v7110_v52 = vadd.f32 %v1831_v16, %v1685_v19  ;;  %v7112_v23 = vpop.f32.mrf.mxu0  ;;  %v7114_v41 = vpop.f32.mrf.mxu1 }
 0x31c   : > { %5131 = vmatmul.msk.f32.vlgmr.msra.gmra.mxu0 %vm10177_vm13, %v5119_v6  ;;  %5143 = vmatmul.msk.f32.vlgmr.msra.gmra.mxu1 %vm10178_vm9, %v5119_v6  ;;  %vm10182_vm13 = vmmov %vm10141_vm2 }
 0x31d   : > { %5104 = vmatmul.msk.f32.gmra.mxu2 %vm10179_vm12, %v5092_v43  ;;  %5116 = vmatmul.msk.f32.gmra.mxu3 %vm10180_vm6, %v5092_v43  ;;  %vm10183_vm9 = vmmov %vm10141_vm2  ;;  %v5122_v43 = vld [vmem:[%s9748_s3 + $0x1d8] sm:$0xff] }
 0x31e   : > { %vm10184_vm12 = vmmov %vm10141_vm2 }
 0x31f   : > { %v1793_v21 = vpop.f32.mrf.mxu2  ;;  %v1834_v29 = vpop.f32.mrf.mxu3  ;;  %vm10185_vm6 = vmmov %vm10141_vm2 }
 0x320   : > { %v7128_v31 = vadd.f32 %v1793_v21, %v1647_v37  ;;  %v7130_v26 = vadd.f32 %v1834_v29, %v1688_v24  ;;  %v7132_v42 = vpop.f32.mrf.mxu0  ;;  %v7134_v32 = vpop.f32.mrf.mxu1  ;;  %v5123_v24 = vld [vmem:[%s9748_s3 + $0x1e0] sm:$0xff]  ;;  %v5152_v21 = vld [vmem:[%s9748_s3 + $0x208] sm:$0xff] }
 0x324   : > { %5132 = vmatmul.msk.f32.gmra.mxu0 %vm10141_vm2, %v5120_v38  ;;  %5144 = vmatmul.msk.f32.gmra.mxu1 %vm10181_vm3, %v5120_v38  ;;  %vm10186_vm3 = vmmov %vm10141_vm2 }
 0x325   : > { %5105 = vmatmul.msk.f32.gmra.mxu2 %vm10182_vm13, %v5093_v62  ;;  %5117 = vmatmul.msk.f32.gmra.mxu3 %vm10183_vm9, %v5093_v62  ;;  %vm10188_vm13 = vmmov %vm10141_vm2 }
 0x326   : > { %vm10189_vm9 = vmmov %vm10141_vm2 }
 0x327   : > { %v1796_v40 = vpop.f32.mrf.mxu2  ;;  %v1837_v17 = vpop.f32.mrf.mxu3 }
 0x328   : > { %v7148_v56 = vadd.f32 %v1796_v40, %v1650_v5  ;;  %v7150_v20 = vadd.f32 %v1837_v17, %v1691_v36  ;;  %v7152_v1 = vpop.f32.mrf.mxu0  ;;  %v7154_v49 = vpop.f32.mrf.mxu1  ;;  %v5124_v36 = vld [vmem:[%s9748_s3 + $0x1e8] sm:$0xff]  ;;  %v5153_v40 = vld [vmem:[%s9748_s3 + $0x210] sm:$0xff] }
 0x32c   : > { %5133 = vmatmul.msk.f32.gmra.mxu0 %vm10184_vm12, %v5121_v13  ;;  %5145 = vmatmul.msk.f32.gmra.mxu1 %vm10185_vm6, %v5121_v13  ;;  %vm10190_vm12 = vmmov %vm10141_vm2 }
 0x32d   : > { %5106 = vmatmul.msk.f32.gmra.mxu2 %vm10141_vm2, %v5094_v63  ;;  %5118 = vmatmul.msk.f32.gmra.mxu3 %vm10186_vm3, %v5094_v63  ;;  %vm10191_vm6 = vmmov %vm10141_vm2 }
 0x32e   : > { %vm10192_vm3 = vmmov %vm10141_vm2 }
 0x32f   : > { %v1799_v25 = vpop.f32.mrf.mxu2  ;;  %v1840_v48 = vpop.f32.mrf.mxu3 }
 0x330   : > { %v7168_v19 = vadd.f32 %v1799_v25, %v1653_v14  ;;  %v7170_v53 = vadd.f32 %v1840_v48, %v1694_v35  ;;  %v7172_v16 = vpop.f32.mrf.mxu0  ;;  %v7174_v6 = vpop.f32.mrf.mxu1  ;;  %v5125_v35 = vld [vmem:[%s9748_s3 + $0x1f0] sm:$0xff]  ;;  %v5154_v25 = vld [vmem:[%s9748_s3 + $0x218] sm:$0xff] }
 0x332   : > { %10187 = vst [vmem:[#allocation31_spill] sm:$0xff] %v7170_v53 }
 0x334   : > { %5134 = vmatmul.msk.f32.gmra.mxu0 %vm10188_vm13, %v5122_v43  ;;  %5146 = vmatmul.msk.f32.gmra.mxu1 %vm10189_vm9, %v5122_v43  ;;  %vm10193_vm13 = vmmov %vm10141_vm2 }
 0x335   : > { %5163 = vmatmul.msk.f32.vlgmr.msrb.gmra.mxu2 %vm10190_vm12, %v5151_v15  ;;  %5175 = vmatmul.msk.f32.vlgmr.msrb.gmra.mxu3 %vm10191_vm6, %v5151_v15  ;;  %vm10194_vm9 = vmmov %vm10141_vm2 }
 0x336   : > { %vm10196_vm12 = vmmov %vm10141_vm2 }
 0x337   : > { %v7186_v0 = vpop.f32.mrf.mxu2  ;;  %v7188_v47 = vpop.f32.mrf.mxu3  ;;  %vm10197_vm6 = vmmov %vm10141_vm2 }
 0x339   : > { %v7190_v54 = vpop.f32.mrf.mxu0  ;;  %v7192_v37 = vpop.f32.mrf.mxu1 }
 0x33c   : > { %5135 = vmatmul.msk.f32.gmra.mxu0 %vm10141_vm2, %v5123_v24  ;;  %5147 = vmatmul.msk.f32.gmra.mxu1 %vm10192_vm3, %v5123_v24  ;;  %vm10198_vm3 = vmmov %vm10141_vm2 }
 0x33d   : > { %5164 = vmatmul.msk.f32.gmra.mxu2 %vm10193_vm13, %v5152_v21  ;;  %5176 = vmatmul.msk.f32.gmra.mxu3 %vm10194_vm9, %v5152_v21  ;;  %vm10199_vm13 = vmmov %vm10141_vm2  ;;  %v5126_v21 = vld [vmem:[%s9748_s3 + $0x1f8] sm:$0xff] }
 0x33e   : > { %vm10200_vm9 = vmmov %vm10141_vm2 }
 0x340   : > { %v7204_v29 = vpop.f32.mrf.mxu2  ;;  %v7206_v38 = vpop.f32.mrf.mxu3 }
 0x341   : > { %10195 = vst [vmem:[#allocation26_spill] sm:$0xff] %v7206_v38  ;;  %v7208_v62 = vpop.f32.mrf.mxu0  ;;  %v7210_v5 = vpop.f32.mrf.mxu1 }
 0x344   : > { %5136 = vmatmul.msk.f32.gmra.mxu0 %vm10196_vm12, %v5124_v36  ;;  %5148 = vmatmul.msk.f32.gmra.mxu1 %vm10197_vm6, %v5124_v36  ;;  %vm10201_vm12 = vmmov %vm10141_vm2  ;;  %v5155_v36 = vld [vmem:[%s9748_s3 + $0x220] sm:$0xff] }
 0x345   : > { %5165 = vmatmul.msk.f32.gmra.mxu2 %vm10141_vm2, %v5153_v40  ;;  %5177 = vmatmul.msk.f32.gmra.mxu3 %vm10198_vm3, %v5153_v40  ;;  %vm10202_vm6 = vmmov %vm10141_vm2 }
 0x346   : > { %vm10204_vm3 = vmmov %vm10141_vm2 }
 0x348   : > { %v7222_v17 = vpop.f32.mrf.mxu2  ;;  %v7224_v13 = vpop.f32.mrf.mxu3 }
 0x349   : > { %v7226_v63 = vpop.f32.mrf.mxu0  ;;  %v7228_v14 = vpop.f32.mrf.mxu1 }
 0x34c   : > { %5137 = vmatmul.msk.f32.gmra.mxu0 %vm10199_vm13, %v5125_v35  ;;  %5149 = vmatmul.msk.f32.gmra.mxu1 %vm10200_vm9, %v5125_v35  ;;  %vm10205_vm13 = vmmov %vm10141_vm2 }
 0x34d   : > { %5166 = vmatmul.msk.f32.gmra.mxu2 %vm10201_vm12, %v5154_v25  ;;  %5178 = vmatmul.msk.f32.gmra.mxu3 %vm10202_vm6, %v5154_v25  ;;  %vm10206_vm9 = vmmov %vm10141_vm2 }
 0x34e   : > { %vm10211_vm12 = vmmov %vm10141_vm2 }
 0x34f   : > { %vm10212_vm6 = vmmov %vm10141_vm2 }
 0x350   : > { %v7240_v48 = vpop.f32.mrf.mxu2  ;;  %v7242_v43 = vpop.f32.mrf.mxu3 }
 0x351   : > { %v7244_v15 = vpop.f32.mrf.mxu0  ;;  %v7246_v24 = vpop.f32.mrf.mxu1 }
 0x352   : > { %10203 = vst [vmem:[#allocation33_spill] sm:$0xff] %v7246_v24 }
 0x354   : > { %5138 = vmatmul.msk.f32.gmra.mxu0 %vm10141_vm2, %v5126_v21  ;;  %5150 = vmatmul.msk.f32.gmra.mxu1 %vm10204_vm3, %v5126_v21  ;;  %vm10215_vm3 = vmmov %vm10141_vm2 }
 0x355   : > { %5167 = vmatmul.msk.f32.gmra.mxu2 %vm10205_vm13, %v5155_v36  ;;  %5179 = vmatmul.msk.f32.gmra.mxu3 %vm10206_vm9, %v5155_v36  ;;  %vm10216_vm13 = vmmov %vm10141_vm2 }
 0x356   : > { %vm10217_vm9 = vmmov %vm10141_vm2 }
 0x358   : > { %v7258_v40 = vpop.f32.mrf.mxu2  ;;  %v7260_v35 = vpop.f32.mrf.mxu3 }
 0x359   : > { %10207 = vst [vmem:[#allocation25_spill] sm:$0xff] %v7258_v40  ;;  %v7262_v25 = vpop.f32.mrf.mxu0  ;;  %v7264_v9 = vpop.f32.mrf.mxu1 }
 0x35a   : > { %10208 = vst [vmem:[#allocation34_spill] sm:$0xff] %v7260_v35 }
 0x35b   : > { %10209 = vst [vmem:[#allocation28_spill] sm:$0xff] %v7262_v25 }
 0x35c   : > { %10210 = vst [vmem:[#allocation27_spill] sm:$0xff] %v7264_v9 }
 0x35d   : > { %5168 = vmatmul.msk.f32.gmra.mxu2 %vm10211_vm12, %v5156_v50  ;;  %5180 = vmatmul.msk.f32.gmra.mxu3 %vm10212_vm6, %v5156_v50 }
 0x360   : > { %v7271_v21 = vpop.f32.mrf.mxu2  ;;  %v7273_v46 = vpop.f32.mrf.mxu3 }
 0x361   : > { %v7275_v36 = vpop.f32.mrf.mxu0  ;;  %v7277_v51 = vpop.f32.mrf.mxu1 }
 0x362   : > { %10213 = vst [vmem:[#allocation30_spill] sm:$0xff] %v7275_v36 }
 0x363   : > { %10214 = vst [vmem:[#allocation29_spill] sm:$0xff] %v7277_v51 }
 0x365   : > { %5169 = vmatmul.msk.f32.gmra.mxu2 %vm10141_vm2, %v5157_v55  ;;  %5181 = vmatmul.msk.f32.gmra.mxu3 %vm10215_vm3, %v5157_v55 }
 0x368   : > { %v7284_v59 = vpop.f32.mrf.mxu2  ;;  %v7286_v10 = vpop.f32.mrf.mxu3 }
 0x369   : > { %v7288_v50 = vpop.f32.mrf.mxu0  ;;  %v7290_v2 = vpop.f32.mrf.mxu1 }
 0x36d   : > { %5170 = vmatmul.msk.f32.gmra.mxu2 %vm10216_vm13, %v5158_v58  ;;  %5182 = vmatmul.msk.f32.gmra.mxu3 %vm10217_vm9, %v5158_v58 }
 0x370   : > { %v7297_v11 = vpop.f32.mrf.mxu2  ;;  %v7299_v12 = vpop.f32.mrf.mxu3 }
 0x371   : > { %10218 = vst [vmem:[#allocation32_spill] sm:$0xff] %v7297_v11  ;;  %v7301_v55 = vpop.f32.mrf.mxu0  ;;  %v7303_v30 = vpop.f32.mrf.mxu1 }
 0x372   : > { %10219 = vst [vmem:[#allocation35_spill] sm:$0xff] %v7299_v12 }
 0x373   : > { %10220 = vst [vmem:[#allocation36_spill] sm:$0xff] %v7301_v55 }
 0x374   : > { %10221 = vst [vmem:[#allocation37_spill] sm:$0xff] %v7303_v30 }
 0x378   : > { %v7305_v34 = vpop.f32.mrf.mxu2  ;;  %v7307_v3 = vpop.f32.mrf.mxu3 }
 0x379   : > { %10222 = vst [vmem:[#allocation38_spill] sm:$0xff] %v7305_v34  ;;  %v7309_v61 = vpop.f32.mrf.mxu0  ;;  %v7311_v60 = vpop.f32.mrf.mxu1 }
 0x37a   : > { %10223 = vst [vmem:[#allocation39_spill] sm:$0xff] %v7307_v3 }
 0x37b   : > { %10224 = vst [vmem:[#allocation40_spill] sm:$0xff] %v7309_v61 }
 0x37c   : > { %10225 = vst [vmem:[#allocation41_spill] sm:$0xff] %v7311_v60 }
 0x380   : > { %v7313_v27 = vpop.f32.mrf.mxu2  ;;  %v7315_v57 = vpop.f32.mrf.mxu3 }
 0x381   : > { %10226 = vst [vmem:[#allocation42_spill] sm:$0xff] %v7313_v27  ;;  %v2258_v58 = vpop.f32.mrf.mxu0  ;;  %v2299_v22 = vpop.f32.mrf.mxu1 }
 0x382   : > { %10227 = vst [vmem:[#allocation43_spill] sm:$0xff] %v7315_v57 }
 0x388   : > { %v7317_v51 = vpop.f32.mrf.mxu2  ;;  %v7319_v36 = vpop.f32.mrf.mxu3 }
 0x389   : > { %v7325_v34 = vpop.f32.mrf.mxu0  ;;  %v7327_v3 = vpop.f32.mrf.mxu1 }
 0x38a   : > { %10230 = vst [vmem:[#allocation46_spill] sm:$0xff] %v7327_v3 }
 0x390   : > { %v7321_v38 = vpop.f32.mrf.mxu2  ;;  %v7323_v9 = vpop.f32.mrf.mxu3 }
 0x391   : > { %10228 = vst [vmem:[#allocation44_spill] sm:$0xff] %v7321_v38  ;;  %v7333_v27 = vpop.f32.mrf.mxu0  ;;  %v7335_v57 = vpop.f32.mrf.mxu1 }
 0x392   : > { %10229 = vst [vmem:[#allocation45_spill] sm:$0xff] %v7323_v9 }
 0x393   : > { %10233 = vst [vmem:[#allocation49_spill] sm:$0xff] %v7333_v27 }
 0x394   : > { %10234 = vst [vmem:[#allocation50_spill] sm:$0xff] %v7335_v57 }
 0x398   : > { %v7329_v61 = vpop.f32.mrf.mxu2  ;;  %v7331_v60 = vpop.f32.mrf.mxu3 }
 0x399   : > { %10231 = vst [vmem:[#allocation47_spill] sm:$0xff] %v7329_v61  ;;  %v7337_v11 = vpop.f32.mrf.mxu0  ;;  %v7339_v35 = vpop.f32.mrf.mxu1 }
 0x39a   : > { %10232 = vst [vmem:[#allocation48_spill] sm:$0xff] %v7331_v60 }
 0x39b   : > { %10235 = vst [vmem:[#allocation51_spill] sm:$0xff] %v7337_v11 }
 0x39c   : > { %10236 = vst [vmem:[#allocation52_spill] sm:$0xff] %v7339_v35 }
 0x3a0   : > { %v2421_v25 = vpop.f32.mrf.mxu2  ;;  %v2462_v12 = vpop.f32.mrf.mxu3 }
 0x3a1   : > { %v7345_v40 = vpop.f32.mrf.mxu0  ;;  %v7347_v30 = vpop.f32.mrf.mxu1 }
 0x3a2   : > { %10239 = vst [vmem:[#allocation55_spill] sm:$0xff] %v7345_v40 }
 0x3a3   : > { %10240 = vst [vmem:[#allocation56_spill] sm:$0xff] %v7347_v30 }
 0x3a8   : > { %v7341_v38 = vpop.f32.mrf.mxu2  ;;  %v7343_v9 = vpop.f32.mrf.mxu3 }
 0x3a9   : > { %10237 = vst [vmem:[#allocation53_spill] sm:$0xff] %v7341_v38  ;;  %v2575_v55 = vpop.f32.mrf.mxu0  ;;  %v2616_v11 = vpop.f32.mrf.mxu1 }
 0x3aa   : > { %10238 = vst [vmem:[#allocation54_spill] sm:$0xff] %v7343_v9 }
 0x3b0   : > { %v7349_v61 = vpop.f32.mrf.mxu2  ;;  %v7351_v60 = vpop.f32.mrf.mxu3 }
 0x3b1   : > { %10241 = vst [vmem:[#allocation57_spill] sm:$0xff] %v7349_v61  ;;  %v7361_v38 = vpop.f32.mrf.mxu0  ;;  %v7363_v9 = vpop.f32.mrf.mxu1 }
 0x3b2   : > { %10242 = vst [vmem:[#allocation58_spill] sm:$0xff] %v7351_v60 }
 0x3b3   : > { %10247 = vst [vmem:[#allocation63_spill] sm:$0xff] %v7361_v38 }
 0x3b4   : > { %10248 = vst [vmem:[#allocation64_spill] sm:$0xff] %v7363_v9 }
 0x3b8   : > { %v7353_v27 = vpop.f32.mrf.mxu2  ;;  %v7355_v57 = vpop.f32.mrf.mxu3 }
 0x3b9   : > { %10243 = vst [vmem:[#allocation59_spill] sm:$0xff] %v7353_v27  ;;  %v7365_v53 = vpop.f32.mrf.mxu0  ;;  %v7367_v61 = vpop.f32.mrf.mxu1 }
 0x3ba   : > { %10244 = vst [vmem:[#allocation60_spill] sm:$0xff] %v7355_v57  ;;  %v2016_v57 = vadd.f32 %v7208_v62, %v7128_v31  ;;  %v2006_v31 = vadd.f32 %v7112_v23, %v7044_v4  ;;  %v2008_v62 = vadd.f32 %v7132_v42, %v7060_v28  ;;  %v2012_v4 = vadd.f32 %v7172_v16, %v7092_v39 }
 0x3bb   : > { %10249 = vst [vmem:[#allocation65_spill] sm:$0xff] %v7365_v53  ;;  %v2010_v53 = vadd.f32 %v7152_v1, %v7076_v18 }
 0x3bc   : > { %10250 = vst [vmem:[#allocation66_spill] sm:$0xff] %v7367_v61  ;;  %v2011_v61 = vadd.f32 %v7154_v49, %v7078_v8  ;;  %v2145_v23 = vadd.f32 %v7186_v0, %v2006_v31 }
 0x3bd   : > { %v2149_v18 = vadd.f32 %v7222_v17, %v2010_v53 }
 0x3be   : > { %v2150_v8 = vadd.f32 %v7224_v13, %v2011_v61  ;;  %v2019_v61 = vadd.f32 %v7228_v14, %v7150_v20 }
 0x3c0   : > { %v7357_v24 = vpop.f32.mrf.mxu2  ;;  %v7359_v35 = vpop.f32.mrf.mxu3 }
 0x3c1   : > { %10245 = vst [vmem:[#allocation61_spill] sm:$0xff] %v7357_v24  ;;  %v2584_v24 = vpop.f32.mrf.mxu0  ;;  %v2625_v38 = vpop.f32.mrf.mxu1 }
 0x3c2   : > { %10246 = vst [vmem:[#allocation62_spill] sm:$0xff] %v7359_v35  ;;  %v2017_v35 = vadd.f32 %v7210_v5, %v7130_v26  ;;  %v2007_v26 = vadd.f32 %v7114_v41, %v7046_v33  ;;  %v7395_v5 = vadd.f32 %v7134_v32, %v7062_v7  ;;  %v2013_v33 = vadd.f32 %v7174_v6, %v7094_v45  ;;  %v2854_v6 = vpop.permute.xlu2 %2853 }
 0x3c3   : > { %v2312_v7 = vadd.f32 %v7288_v50, %v2149_v18  ;;  %v2313_v41 = vadd.f32 %v7290_v2, %v2150_v8  ;;  %v10262_v18 = vld [vmem:[#allocation44_spill] sm:$0xff] }
 0x3c4   : > { %v2146_v28 = vadd.f32 %v7188_v47, %v2007_v26  ;;  %v10261_v26 = vld [vmem:[#allocation34_spill] sm:$0xff] }
 0x3c5   : > { %v2475_v39 = vadd.f32 %v7317_v51, %v2312_v7  ;;  %v2476_v45 = vadd.f32 %v7319_v36, %v2313_v41 }
 0x3c7   : > { %v2638_v0 = vadd.f32 %v2575_v55, %v2475_v39  ;;  %v2639_v20 = vadd.f32 %v2616_v11, %v2476_v45  ;;  %v10254_v11 = vld [vmem:[#allocation31_spill] sm:$0xff]  ;;  %v10260_v55 = vld [vmem:[#allocation54_spill] sm:$0xff]  ;;  %v10267_v39 = vld [vmem:[#allocation64_spill] sm:$0xff] }
 0x3c8   : > { %v2738_v40 = vpop.f32.mrf.mxu2  ;;  %v2779_v30 = vpop.f32.mrf.mxu3 }
 0x3c9   : > { %v2587_v13 = vpop.f32.mrf.mxu0 }
 0x3d0   : > { %v7369_v60 = vpop.f32.mrf.mxu2  ;;  %v7371_v27 = vpop.f32.mrf.mxu3 }
 0x3d1   : > { %10251 = vst [vmem:[#allocation67_spill] sm:$0xff] %v7369_v60  ;;  %v2156_v60 = vadd.f32 %v7273_v46, %v2017_v35  ;;  %v2849_v46 = vpop.permute.xlu0 %2848 }
 0x3d2   : > { %10252 = vst [vmem:[#allocation68_spill] sm:$0xff] %v7371_v27  ;;  %v2155_v27 = vadd.f32 %v7271_v21, %v2016_v57  ;;  %v10257_v21 = vld [vmem:[#allocation37_spill] sm:$0xff] }
 0x3d3   : > { %v2319_v1 = vadd.f32 %v2299_v22, %v2156_v60  ;;  %v2014_v22 = vadd.f32 %v7190_v54, %v7108_v44  ;;  %v2018_v60 = vadd.f32 %v7226_v63, %v7148_v56  ;;  %v2151_v44 = vadd.f32 %v7240_v48, %v2012_v4 }
 0x3d4   : > { %v2318_v57 = vadd.f32 %v2258_v58, %v2155_v27  ;;  %v2015_v27 = vadd.f32 %v7192_v37, %v7110_v52  ;;  %v2158_v52 = vadd.f32 %v7286_v10, %v2019_v61  ;;  %v2152_v54 = vadd.f32 %v7242_v43, %v2013_v33 }
 0x3d5   : > { %v2482_v32 = vadd.f32 %v2462_v12, %v2319_v1  ;;  %v7418_v12 = vadd.f32 %v7204_v29, %v2008_v62  ;;  %v2157_v53 = vadd.f32 %v7284_v59, %v2018_v60  ;;  %v2020_v37 = vadd.f32 %v7244_v15, %v7168_v19  ;;  %v2628_v59 = vpop.f32.mrf.mxu1  ;;  %v10258_v19 = vld [vmem:[#allocation53_spill] sm:$0xff] }
 0x3d6   : > { %v2481_v42 = vadd.f32 %v2421_v25, %v2318_v57  ;;  %v2801_v63 = vadd.f32 %v2738_v40, %v2638_v0  ;;  %v2802_v10 = vadd.f32 %v2779_v30, %v2639_v20  ;;  %v10256_v25 = vld [vmem:[#allocation36_spill] sm:$0xff]  ;;  %v2315_v36 = vadd.f32 %v10257_v21, %v2152_v54  ;;  %v10263_v57 = vld [vmem:[#allocation45_spill] sm:$0xff]  ;;  %v2859_v20 = vpop.permute.xlu1 %2858  ;;  %v10271_v54 = vld [vmem:[#allocation50_spill] sm:$0xff] }
 0x3d7   : > { %v2645_v2 = vadd.f32 %v2625_v38, %v2482_v32  ;;  %v2320_v29 = vadd.f32 %v7325_v34, %v2157_v53  ;;  %v10253_v38 = vld [vmem:[#allocation46_spill] sm:$0xff]  ;;  %v2314_v43 = vadd.f32 %v10256_v25, %v2151_v44  ;;  %v10259_v34 = vld [vmem:[#allocation25_spill] sm:$0xff]  ;;  %v2154_v62 = vadd.f32 %v10261_v26, %v2015_v27  ;;  %v10266_v27 = vld [vmem:[#allocation63_spill] sm:$0xff] }
 0x3d8   : > { %v7377_v3 = vpop.f32.mrf.mxu2  ;;  %v7379_v9 = vpop.f32.mrf.mxu3  ;;  %v2644_v49 = vadd.f32 %v2584_v24, %v2481_v42  ;;  %v2321_v17 = vadd.f32 %v10253_v38, %v2158_v52  ;;  %v10255_v24 = vld [vmem:[#allocation33_spill] sm:$0xff]  ;;  %v2153_v50 = vadd.f32 %v10259_v34, %v2014_v22  ;;  %v2478_v1 = vadd.f32 %v10263_v57, %v2315_v36  ;;  %v10264_v42 = vld [vmem:[#allocation32_spill] sm:$0xff]  ;;  %v10265_v22 = vld [vmem:[#allocation35_spill] sm:$0xff] }
 0x3d9   : > { %v2021_v35 = vadd.f32 %v10255_v24, %v10254_v11  ;;  %v2483_v15 = vadd.f32 %v10258_v19, %v2320_v29  ;;  %v2834_v31 = vpop.permute.xlu0 %2833  ;;  %v2477_v8 = vadd.f32 %v10262_v18, %v2314_v43  ;;  %v2159_v32 = vadd.f32 %v10264_v42, %v2020_v37  ;;  %v10268_v44 = vld [vmem:[#allocation28_spill] sm:$0xff]  ;;  %v10269_v52 = vld [vmem:[#allocation27_spill] sm:$0xff]  ;;  %v10274_v11 = vld [vmem:[#allocation38_spill] sm:$0xff] }
 0x3da   : > { %v2484_v58 = vadd.f32 %v10260_v55, %v2321_v17  ;;  %v7444_v4 = vadd.f32 %v2834_v31, %v2801_v63  ;;  %v7446_v33 = vadd.f32 %v2834_v31, %v2802_v10  ;;  %v2641_v45 = vadd.f32 %v10267_v39, %v2478_v1  ;;  %v10272_v29 = vld [vmem:[#allocation67_spill] sm:$0xff]  ;;  %v10273_v17 = vld [vmem:[#allocation68_spill] sm:$0xff]  ;;  %v10277_v36 = vld [vmem:[#allocation41_spill] sm:$0xff] }
 0x3db   : > { %v2160_v60 = vadd.f32 %v10265_v22, %v2021_v35  ;;  %v2640_v61 = vadd.f32 %v10266_v27, %v2477_v8  ;;  %v2308_v53 = vadd.f32 %v10268_v44, %v2145_v23  ;;  %v10275_v35 = vld [vmem:[#allocation39_spill] sm:$0xff]  ;;  %v10276_v43 = vld [vmem:[#allocation40_spill] sm:$0xff]  ;;  %v2317_v19 = vadd.f32 %v10277_v36, %v2154_v62  ;;  %v10278_v55 = vld [vmem:[#allocation57_spill] sm:$0xff] }
 0x3dc   : > { %v2647_v7 = vadd.f32 %v2628_v59, %v2484_v58  ;;  %v2839_v59 = vpop.permute.xlu2 %2838  ;;  %v2881_v63 = vmax.f32 %v7444_v4, 0.0  ;;  %v2882_v23 = vmax.f32 %v7446_v33, 0.0  ;;  %v2316_v21 = vadd.f32 %v10276_v43, %v2153_v50  ;;  %v10279_v31 = vld [vmem:[#allocation58_spill] sm:$0xff]  ;;  %v10281_v1 = vld [vmem:[#allocation48_spill] sm:$0xff]  ;;  %v10283_v27 = vld [vmem:[#allocation51_spill] sm:$0xff] }
 0x3dd   : > { %v2323_v37 = vadd.f32 %v10271_v54, %v2160_v60  ;;  %v2803_v38 = vadd.f32 %v10272_v29, %v2640_v61  ;;  %v2471_v24 = vadd.f32 %v10274_v11, %v2308_v53  ;;  %v2631_v34 = vpop.f32.mrf.mxu1  ;;  %v10282_v22 = vld [vmem:[#allocation26_spill] sm:$0xff]  ;;  %v10284_v39 = vld [vmem:[#allocation52_spill] sm:$0xff] }
 0x3de   : > { %v5490_v42 = vpack.i.bf16 %v2882_v23, %v2881_v63  ;;  %v2148_v60 = vadd.f32 %v10282_v22, %v7395_v5  ;;  %v10288_v54 = vld [vmem:[#allocation60_spill] sm:$0xff]  ;;  %v2844_v11 = vpop.permute.xlu1 %2843  ;;  %v10296_v22 = vld [vmem:[#allocation62_spill] sm:$0xff] }
 0x3df   : > { %v2486_v26 = vadd.f32 %v10279_v31, %v2323_v37  ;;  %v2634_v61 = vadd.f32 %v10283_v27, %v2471_v24  ;;  %v10289_v24 = vld [vmem:[#allocation30_spill] sm:$0xff] }
 0x3e0   : > { %v2747_v16 = vpop.f32.mrf.mxu2  ;;  %v2788_v56 = vpop.f32.mrf.mxu3 }
 0x3e1   : > { %v2807_v47 = vadd.f32 %v2747_v16, %v2644_v49  ;;  %v2808_v51 = vadd.f32 %v2788_v56, %v2645_v2  ;;  %v2309_v16 = vadd.f32 %v10269_v52, %v2146_v28  ;;  %v2649_v62 = vadd.f32 %v2631_v34, %v2486_v26  ;;  %v10286_v52 = vld [vmem:[#allocation66_spill] sm:$0xff] }
 0x3e3   : > { %v7428_v14 = vadd.f32 %v2849_v46, %v2807_v47  ;;  %v7430_v48 = vadd.f32 %v2849_v46, %v2808_v51  ;;  %v2646_v46 = vadd.f32 %v2587_v13, %v2483_v15  ;;  %v10270_v47 = vld [vmem:[#allocation49_spill] sm:$0xff]  ;;  %v2804_v13 = vadd.f32 %v10273_v17, %v2641_v45  ;;  %v2590_v15 = vpop.f32.mrf.mxu0 }
 0x3e4   : > { %v2322_v51 = vadd.f32 %v10270_v47, %v2159_v32  ;;  %v2472_v25 = vadd.f32 %v10275_v35, %v2309_v16  ;;  %v10287_v47 = vld [vmem:[#allocation59_spill] sm:$0xff]  ;;  %v2310_v35 = vadd.f32 %v10289_v24, %v7418_v12 }
 0x3e5   : > { %v2887_v40 = vmax.f32 %v7428_v14, 0.0  ;;  %v2888_v30 = vmax.f32 %v7430_v48, 0.0 }
 0x3e6   : > { %v2485_v58 = vadd.f32 %v10278_v55, %v2322_v51  ;;  %v2635_v45 = vadd.f32 %v10284_v39, %v2472_v25  ;;  %v2797_v51 = vadd.f32 %v10287_v47, %v2634_v61  ;;  %v10290_v25 = vld [vmem:[#allocation29_spill] sm:$0xff]  ;;  %v2829_v39 = vpop.permute.xlu1 %2828 }
 0x3e7   : > { %v5465_v41 = vpack.i.bf16 %v2888_v30, %v2887_v40  ;;  %v2311_v43 = vadd.f32 %v10290_v25, %v2148_v60 }
 0x3e8   : > { %v2750_v49 = vpop.f32.mrf.mxu2  ;;  %v2791_v2 = vpop.f32.mrf.mxu3  ;;  %v2648_v50 = vadd.f32 %v2590_v15, %v2485_v58  ;;  %v2798_v5 = vadd.f32 %v10288_v54, %v2635_v45  ;;  %v10291_v15 = vld [vmem:[#allocation42_spill] sm:$0xff] }
 0x3e9   : > { %v2809_v56 = vadd.f32 %v2750_v49, %v2646_v46  ;;  %v2810_v0 = vadd.f32 %v2791_v2, %v2647_v7  ;;  %5466 = vrot.lane.b32.xlu2 %v5465_v41, %s5637_s20  ;;  %v2480_v46 = vadd.f32 %v10281_v1, %v2317_v19  ;;  %v7479_v7 = vadd.f32 %v2839_v59, %v2803_v38  ;;  %v10285_v49 = vld [vmem:[#allocation65_spill] sm:$0xff]  ;;  %v10294_v1 = vld [vmem:[#allocation56_spill] sm:$0xff] }
 0x3ea   : > { %v7481_v41 = vadd.f32 %v2839_v59, %v2804_v13  ;;  %v2473_v34 = vadd.f32 %v10291_v15, %v2310_v35 }
 0x3eb   : > { %v7465_v10 = vadd.f32 %v2854_v6, %v2809_v56  ;;  %v7467_v28 = vadd.f32 %v2854_v6, %v2810_v0  ;;  %v10280_v6 = vld [vmem:[#allocation47_spill] sm:$0xff]  ;;  %v2643_v16 = vadd.f32 %v10286_v52, %v2480_v46  ;;  %v2883_v37 = vmax.f32 %v7479_v7, 0.0 }
 0x3ec   : > { %v2479_v57 = vadd.f32 %v10280_v6, %v2316_v21  ;;  %v2884_v29 = vmax.f32 %v7481_v41, 0.0  ;;  %v2824_v21 = vpop.permute.xlu2 %2823  ;;  %v10293_v6 = vld [vmem:[#allocation55_spill] sm:$0xff] }
 0x3ed   : > { %v2889_v18 = vmax.f32 %v7465_v10, 0.0  ;;  %v2890_v8 = vmax.f32 %v7467_v28, 0.0  ;;  %v2806_v17 = vadd.f32 %v7379_v9, %v2643_v16  ;;  %v7516_v9 = vadd.f32 %v2824_v21, %v2797_v51  ;;  %v10297_v51 = vld [vmem:[#allocation2_spill] sm:$0xff] }
 0x3ee   : > { %v2642_v2 = vadd.f32 %v10285_v49, %v2479_v57  ;;  %v7518_v58 = vadd.f32 %v2824_v21, %v2798_v5  ;;  %v5485_v26 = vpack.i.bf16 %v2884_v29, %v2883_v37  ;;  %v2636_v57 = vadd.f32 %v10293_v6, %v2473_v34 }
 0x3ef   : > { %v5470_v32 = vpack.i.bf16 %v2890_v8, %v2889_v18  ;;  %v7522_v31 = vadd.f32 %v2844_v11, %v2806_v17  ;;  %vm10298_vm12 = vcmp.lt.s32.totalorder %v10297_v51, 127 }
 0x3f0   : > { %v2753_v44 = vpop.f32.mrf.mxu2  ;;  %v2794_v53 = vpop.f32.mrf.mxu3  ;;  %v2805_v38 = vadd.f32 %v7377_v3, %v2642_v2  ;;  %v10292_v3 = vld [vmem:[#allocation43_spill] sm:$0xff]  ;;  %vm10299_vm6 = vmmov %vm10298_vm12 }
 0x3f1   : > { %v2811_v56 = vadd.f32 %v2753_v44, %v2648_v50  ;;  %v2812_v0 = vadd.f32 %v2794_v53, %v2649_v62  ;;  %5491 = vrot.lane.b32.xlu2 %v5490_v42, %s5637_s20  ;;  %5471 = vrot.lane.b32.xlu1 %v5470_v32, %s5637_s20  ;;  %v2474_v55 = vadd.f32 %v10292_v3, %v2311_v43  ;;  %v2877_v50 = vmax.f32 %v7516_v9, 0.0  ;;  %v10295_v42 = vld [vmem:[#allocation61_spill] sm:$0xff]  ;;  %vm10300_vm2 = vmmov %vm10299_vm6 }
 0x3f2   : > { %v2878_v62 = vmax.f32 %v7518_v58, 0.0  ;;  %v2799_v32 = vadd.f32 %v10295_v42, %v2636_v57  ;;  %v2886_v61 = vmax.f32 %v7522_v31, 0.0  ;;  %vm10301_vm3 = vmmov %vm10300_vm2 }
 0x3f3   : > { %v7505_v13 = vadd.f32 %v2859_v20, %v2811_v56  ;;  %v7507_v59 = vadd.f32 %v2859_v20, %v2812_v0  ;;  %v7520_v20 = vadd.f32 %v2844_v11, %v2805_v38  ;;  %v2637_v46 = vadd.f32 %v10294_v1, %v2474_v55  ;;  %vm10302_vm13 = vmmov %vm10300_vm2 }
 0x3f4   : > { %v7542_v45 = vadd.f32 %v2829_v39, %v2799_v32  ;;  %v5500_v44 = vpack.i.bf16 %v2878_v62, %v2877_v50  ;;  %vm10303_vm9 = vmmov %vm10300_vm2 }
 0x3f5   : > { %v2891_v36 = vmax.f32 %v7505_v13, 0.0  ;;  %v2892_v19 = vmax.f32 %v7507_v59, 0.0  ;;  %v2800_v60 = vadd.f32 %v10296_v22, %v2637_v46  ;;  %v2885_v27 = vmax.f32 %v7520_v20, 0.0 }
 0x3f6   : > { %v2879_v53 = vmax.f32 %v7542_v45, 0.0 }
 0x3f7   : > { %v5475_v12 = vpack.i.bf16 %v2892_v19, %v2891_v36  ;;  %v7544_v49 = vadd.f32 %v2829_v39, %v2800_v60  ;;  %v5480_v2 = vpack.i.bf16 %v2886_v61, %v2885_v27 }
 0x3f9   : > { %5476 = vrot.lane.b32.xlu0 %v5475_v12, %s5637_s20  ;;  %5486 = vrot.lane.b32.xlu1 %v5485_v26, %s5637_s20  ;;  %v2880_v52 = vmax.f32 %v7544_v49, 0.0 }
 0x3fb   : > { %v5495_v16 = vpack.i.bf16 %v2880_v52, %v2879_v53 }
 0x401   : > { %5481 = vrot.lane.b32.xlu0 %v5480_v2, %s5637_s20  ;;  %5501 = vrot.lane.b32.xlu1 %v5500_v44, %s5637_s20 }
 0x409   : > { %5496 = vrot.lane.b32.xlu0 %v5495_v16, %s5637_s20 }
 0x443   : > { %v5467_v56 = vpop.permute.xlu2 %5466 }
 0x444   : > { %v5469_v0 = vunpack.i.h.bf16 %v5467_v56  ;;  %v5468_v47 = vunpack.i.l.bf16 %v5467_v56 }
 0x446   : > { %v2938_v54 = vsel %vm10298_vm12, %v5468_v47, %v5469_v0  ;;  %v2946_v5 = vsel %vm10299_vm6, %v5469_v0, %v5468_v47  ;;  %vm10304_vm12 = vmmov %vm10300_vm2 }
 0x447   : > { %v7569_v38 = vmax.f32 %v2887_v40, %v2938_v54  ;;  %v7573_v17 = vmax.f32 %v2888_v30, %v2946_v5  ;;  %vm10305_vm6 = vmmov %vm10300_vm2 }
 0x449   : > { %v5505_v11 = vpack.i.bf16 %v7573_v17, %v7569_v38 }
 0x44b   : > { %v5492_v24 = vpop.permute.xlu2 %5491  ;;  %5506 = vrot.lane.b32.xlu1 %v5505_v11, %s5636_s19 }
 0x44c   : > { %v5494_v35 = vunpack.i.h.bf16 %v5492_v24  ;;  %v5493_v25 = vunpack.i.l.bf16 %v5492_v24 }
 0x44e   : > { %v2935_v43 = vsel %vm10300_vm2, %v5493_v25, %v5494_v35  ;;  %v2943_v14 = vsel %vm10301_vm3, %v5494_v35, %v5493_v25  ;;  %vm10306_vm3 = vmmov %vm10300_vm2  ;;  %v10313_v35 = vld [vmem:[#allocation6_spill] sm:$0xff] }
 0x44f   : > { %v7584_v40 = vmax.f32 %v2881_v63, %v2935_v43  ;;  %v7588_v48 = vmax.f32 %v2882_v23, %v2943_v14  ;;  %v2894_v25 = vand.u32 1, %v10313_v35 }
 0x451   : > { %v5530_v30 = vpack.i.bf16 %v7588_v48, %v7584_v40 }
 0x453   : > { %5531 = vrot.lane.b32.xlu1 %v5530_v30, %s5636_s19 }
 0x463   : > { %v5472_v21 = vpop.permute.xlu1 %5471 }
 0x464   : > { %v5474_v15 = vunpack.i.h.bf16 %v5472_v21  ;;  %v5473_v34 = vunpack.i.l.bf16 %v5472_v21 }
 0x466   : > { %v2939_v3 = vsel %vm10302_vm13, %v5473_v34, %v5474_v15  ;;  %v2947_v4 = vsel %vm10303_vm9, %v5474_v15, %v5473_v34  ;;  %vm10307_vm13 = vmmov %vm10300_vm2 }
 0x467   : > { %v7599_v63 = vmax.f32 %v2889_v18, %v2939_v3  ;;  %v7603_v33 = vmax.f32 %v2890_v8, %v2947_v4  ;;  %vm10308_vm9 = vmmov %vm10300_vm2 }
 0x469   : > { %v5510_v23 = vpack.i.bf16 %v7603_v33, %v7599_v63 }
 0x46b   : > { %v5477_v55 = vpop.permute.xlu0 %5476  ;;  %5511 = vrot.lane.b32.xlu0 %v5510_v23, %s5636_s19  ;;  %v5487_v12 = vpop.permute.xlu1 %5486 }
 0x46c   : > { %v5479_v26 = vunpack.i.h.bf16 %v5477_v55  ;;  %v5478_v6 = vunpack.i.l.bf16 %v5477_v55  ;;  %v5489_v57 = vunpack.i.h.bf16 %v5487_v12  ;;  %v5488_v1 = vunpack.i.l.bf16 %v5487_v12 }
 0x46e   : > { %v2940_v10 = vsel %vm10304_vm12, %v5478_v6, %v5479_v26  ;;  %v2948_v18 = vsel %vm10305_vm6, %v5479_v26, %v5478_v6  ;;  %v2936_v28 = vsel %vm10300_vm2, %v5488_v1, %v5489_v57  ;;  %v2944_v8 = vsel %vm10306_vm3, %v5489_v57, %v5488_v1  ;;  %vm10309_vm12 = vmmov %vm10300_vm2 }
 0x46f   : > { %v7618_v46 = vmax.f32 %v2891_v36, %v2940_v10  ;;  %v7622_v42 = vmax.f32 %v2892_v19, %v2948_v18  ;;  %v7626_v32 = vmax.f32 %v2883_v37, %v2936_v28  ;;  %v7630_v22 = vmax.f32 %v2884_v29, %v2944_v8  ;;  %vm10310_vm6 = vmmov %vm10300_vm2 }
 0x470   : > { %vm10311_vm3 = vmmov %vm10300_vm2 }
 0x471   : > { %v5515_v60 = vpack.i.bf16 %v7622_v42, %v7618_v46  ;;  %v5525_v13 = vpack.i.bf16 %v7630_v22, %v7626_v32 }
 0x473   : > { %v5482_v36 = vpop.permute.xlu0 %5481  ;;  %5516 = vrot.lane.b32.xlu2 %v5515_v60, %s5636_s19  ;;  %5526 = vrot.lane.b32.xlu0 %v5525_v13, %s5636_s19  ;;  %v5502_v59 = vpop.permute.xlu1 %5501 }
 0x474   : > { %v5484_v19 = vunpack.i.h.bf16 %v5482_v36  ;;  %v5483_v7 = vunpack.i.l.bf16 %v5482_v36  ;;  %v5504_v37 = vunpack.i.h.bf16 %v5502_v59  ;;  %v5503_v39 = vunpack.i.l.bf16 %v5502_v59 }
 0x476   : > { %v2937_v41 = vsel %vm10307_vm13, %v5483_v7, %v5484_v19  ;;  %v2945_v29 = vsel %vm10308_vm9, %v5484_v19, %v5483_v7  ;;  %v2933_v2 = vsel %vm10309_vm12, %v5503_v39, %v5504_v37  ;;  %v2941_v44 = vsel %vm10310_vm6, %v5504_v37, %v5503_v39 }
 0x477   : > { %v2957_v16 = vmax.f32 %v2885_v27, %v2937_v41  ;;  %v2958_v56 = vmax.f32 %v2886_v61, %v2945_v29  ;;  %v7652_v0 = vmax.f32 %v2877_v50, %v2933_v2  ;;  %v7656_v47 = vmax.f32 %v2878_v62, %v2941_v44  ;;  %v10312_v61 = vld [vmem:[#allocation5_spill] sm:$0xff] }
 0x478   : > { %v2893_v24 = vand.u32 1, %v10312_v61  ;;  %vm7677_vm9 = vcmp.eq.s32.totalorder %v2894_v25, 0  ;;  %vm10318_vm12 = vcmp.lt.s32.totalorder %v10297_v51, 1 }
 0x479   : > { %v5520_v54 = vpack.i.bf16 %v2958_v56, %v2957_v16  ;;  %v5540_v5 = vpack.i.bf16 %v7656_v47, %v7652_v0  ;;  %vm10319_vm6 = vmmov %vm10318_vm12 }
 0x47a   : > { %vm7673_vm13 = vcmp.eq.s32.totalorder %v2893_v24, 0 }
 0x47b   : > { %v5497_v11 = vpop.permute.xlu0 %5496  ;;  %5521 = vrot.lane.b32.xlu2 %v5520_v54, %s5636_s19  ;;  %5541 = vrot.lane.b32.xlu0 %v5540_v5, %s5636_s19 }
 0x47c   : > { %v5499_v20 = vunpack.i.h.bf16 %v5497_v11  ;;  %v5498_v31 = vunpack.i.l.bf16 %v5497_v11 }
 0x47e   : > { %v2934_v9 = vsel %vm10300_vm2, %v5498_v31, %v5499_v20  ;;  %v2942_v50 = vsel %vm10311_vm3, %v5499_v20, %v5498_v31  ;;  %vm10320_vm2 = vmmov %vm10319_vm6 }
 0x47f   : > { %v2951_v58 = vmax.f32 %v2879_v53, %v2934_v9  ;;  %v2952_v62 = vmax.f32 %v2880_v52, %v2942_v50  ;;  %vm10321_vm3 = vmmov %vm10320_vm2 }
 0x481   : > { %v5535_v27 = vpack.i.bf16 %v2952_v62, %v2951_v58 }
 0x483   : > { %5536 = vrot.lane.b32.xlu2 %v5535_v27, %s5636_s19 }
 0x4bd   : > { %v5507_v43 = vpop.permute.xlu1 %5506 }
 0x4be   : > { %v5509_v45 = vunpack.i.h.bf16 %v5507_v43  ;;  %v5508_v53 = vunpack.i.l.bf16 %v5507_v43 }
 0x4c0   : > { %v3002_v49 = vsel %vm10318_vm12, %v5508_v53, %v5509_v45  ;;  %v3010_v52 = vsel %vm10319_vm6, %v5509_v45, %v5508_v53  ;;  %vm10322_vm12 = vmmov %vm10320_vm2 }
 0x4c1   : > { %v7688_v21 = vsel %vm7673_vm13, %v7569_v38, %v3010_v52  ;;  %v7693_v15 = vsel %vm7677_vm9, %v7573_v17, %v3002_v49  ;;  %vm10323_vm6 = vmmov %vm10320_vm2 }
 0x4c2   : > { %v5545_v34 = vpack.i.bf16 %v7693_v15, %v7688_v21 }
 0x4c4   : > { %5546 = vrot.lane.b32.xlu0 %v5545_v34, %s5639_s22 }
 0x4c5   : > { %v5532_v3 = vpop.permute.xlu1 %5531 }
 0x4c6   : > { %v5534_v4 = vunpack.i.h.bf16 %v5532_v3  ;;  %v5533_v23 = vunpack.i.l.bf16 %v5532_v3 }
 0x4c8   : > { %v2999_v55 = vsel %vm10320_vm2, %v5533_v23, %v5534_v4  ;;  %v3007_v38 = vsel %vm10321_vm3, %v5534_v4, %v5533_v23  ;;  %vm10324_vm3 = vmmov %vm10320_vm2 }
 0x4c9   : > { %v7705_v12 = vsel %vm7673_vm13, %v7584_v40, %v3007_v38  ;;  %v7710_v17 = vsel %vm7677_vm9, %v7588_v48, %v2999_v55 }
 0x4ca   : > { %v5570_v26 = vpack.i.bf16 %v7710_v17, %v7705_v12 }
 0x4cc   : > { %5571 = vrot.lane.b32.xlu0 %v5570_v26, %s5639_s22 }
 0x4cd   : > { %v5517_v6 = vpop.permute.xlu2 %5516 }
 0x4ce   : > { %v5519_v57 = vunpack.i.h.bf16 %v5517_v6  ;;  %v5518_v1 = vunpack.i.l.bf16 %v5517_v6 }
 0x4d0   : > { %v3004_v10 = vsel %vm10322_vm12, %v5518_v1, %v5519_v57  ;;  %v3012_v40 = vsel %vm10323_vm6, %v5519_v57, %v5518_v1  ;;  %vm10325_vm12 = vmmov %vm10320_vm2 }
 0x4d1   : > { %v7722_v18 = vsel %vm7673_vm13, %v7618_v46, %v3012_v40  ;;  %v7727_v48 = vsel %vm7677_vm9, %v7622_v42, %v3004_v10  ;;  %vm10326_vm6 = vmmov %vm10320_vm2 }
 0x4d2   : > { %v5555_v28 = vpack.i.bf16 %v7727_v48, %v7722_v18 }
 0x4d4   : > { %5556 = vrot.lane.b32.xlu1 %v5555_v28, %s5639_s22 }
 0x4d5   : > { %v5522_v8 = vpop.permute.xlu2 %5521 }
 0x4d6   : > { %v5524_v60 = vunpack.i.h.bf16 %v5522_v8  ;;  %v5523_v13 = vunpack.i.l.bf16 %v5522_v8 }
 0x4d8   : > { %v3001_v36 = vsel %vm10320_vm2, %v5523_v13, %v5524_v60  ;;  %v3009_v46 = vsel %vm10324_vm3, %v5524_v60, %v5523_v13  ;;  %vm10327_vm3 = vmmov %vm10320_vm2 }
 0x4d9   : > { %v7738_v59 = vsel %vm7673_vm13, %v2957_v16, %v3009_v46  ;;  %v7742_v42 = vsel %vm7677_vm9, %v2958_v56, %v3001_v36 }
 0x4da   : > { %v5560_v19 = vpack.i.bf16 %v7742_v42, %v7738_v59 }
 0x4dc   : > { %5561 = vrot.lane.b32.xlu1 %v5560_v19, %s5639_s22 }
 0x4dd   : > { %v5512_v7 = vpop.permute.xlu0 %5511  ;;  %v5537_v37 = vpop.permute.xlu2 %5536 }
 0x4de   : > { %v5514_v39 = vunpack.i.h.bf16 %v5512_v7  ;;  %v5513_v41 = vunpack.i.l.bf16 %v5512_v7  ;;  %v5539_v29 = vunpack.i.h.bf16 %v5537_v37  ;;  %v5538_v2 = vunpack.i.l.bf16 %v5537_v37 }
 0x4e0   : > { %v3003_v44 = vsel %vm10325_vm12, %v5513_v41, %v5514_v39  ;;  %v3011_v16 = vsel %vm10326_vm6, %v5514_v39, %v5513_v41  ;;  %v2998_v56 = vsel %vm10320_vm2, %v5538_v2, %v5539_v29  ;;  %v3006_v54 = vsel %vm10327_vm3, %v5539_v29, %v5538_v2  ;;  %vm10328_vm12 = vmmov %vm10320_vm2 }
 0x4e1   : > { %v7758_v5 = vsel %vm7673_vm13, %v7599_v63, %v3011_v16  ;;  %v7763_v11 = vsel %vm7677_vm9, %v7603_v33, %v3003_v44  ;;  %v7767_v20 = vsel %vm7673_vm13, %v2951_v58, %v3006_v54  ;;  %v7771_v31 = vsel %vm7677_vm9, %v2952_v62, %v2998_v56  ;;  %vm10329_vm6 = vmmov %vm10320_vm2 }
 0x4e2   : > { %v5550_v9 = vpack.i.bf16 %v7763_v11, %v7758_v5  ;;  %v5575_v63 = vpack.i.bf16 %v7771_v31, %v7767_v20  ;;  %vm10330_vm3 = vmmov %vm10320_vm2 }
 0x4e4   : > { %5551 = vrot.lane.b32.xlu2 %v5550_v9, %s5639_s22  ;;  %5576 = vrot.lane.b32.xlu1 %v5575_v63, %s5639_s22 }
 0x4e5   : > { %v5527_v33 = vpop.permute.xlu0 %5526 }
 0x4e6   : > { %v5529_v50 = vunpack.i.h.bf16 %v5527_v33  ;;  %v5528_v27 = vunpack.i.l.bf16 %v5527_v33 }
 0x4e8   : > { %v3000_v58 = vsel %vm10328_vm12, %v5528_v27, %v5529_v50  ;;  %v3008_v62 = vsel %vm10329_vm6, %v5529_v50, %v5528_v27  ;;  %vm10331_vm12 = vcmp.lt.s32.totalorder %v10297_v51, 112 }
 0x4e9   : > { %v3023_v61 = vsel %vm7673_vm13, %v7626_v32, %v3008_v62  ;;  %v3024_v24 = vsel %vm7677_vm9, %v7630_v22, %v3000_v58  ;;  %vm10332_vm6 = vmmov %vm10331_vm12 }
 0x4ea   : > { %v5565_v35 = vpack.i.bf16 %v3024_v24, %v3023_v61 }
 0x4ec   : > { %5566 = vrot.lane.b32.xlu2 %v5565_v35, %s5639_s22  ;;  %v3673_v35 = vld [vmem:[%s9751_s6] sm:$0xff] }
 0x4ed   : > { %v5542_v25 = vpop.permute.xlu0 %5541 }
 0x4ee   : > { %v5544_v43 = vunpack.i.h.bf16 %v5542_v25  ;;  %v5543_v45 = vunpack.i.l.bf16 %v5542_v25 }
 0x4f0   : > { %v2997_v53 = vsel %vm10320_vm2, %v5543_v45, %v5544_v43  ;;  %v3005_v49 = vsel %vm10330_vm3, %v5544_v43, %v5543_v45  ;;  %vm10333_vm2 = vmmov %vm10332_vm6 }
 0x4f1   : > { %v3017_v32 = vsel %vm7673_vm13, %v7652_v0, %v3005_v49  ;;  %v3018_v22 = vsel %vm7677_vm9, %v7656_v47, %v2997_v53  ;;  %vm10334_vm3 = vmmov %vm10333_vm2 }
 0x4f2   : > { %v5580_v52 = vpack.i.bf16 %v3018_v22, %v3017_v32 }
 0x4f4   : > { %5581 = vrot.lane.b32.xlu2 %v5580_v52, %s5639_s22 }
 0x536   : > { %v5547_v34 = vpop.permute.xlu0 %5546 }
 0x537   : > { %v5549_v38 = vunpack.i.h.bf16 %v5547_v34  ;;  %v5548_v26 = vunpack.i.l.bf16 %v5547_v34 }
 0x539   : > { %v3070_v10 = vsel %vm10333_vm2, %v5548_v26, %v5549_v38  ;;  %v3078_v40 = vsel %vm10334_vm3, %v5549_v38, %v5548_v26  ;;  %vm10337_vm3 = vmmov %vm10333_vm2  ;;  %v3676_v38 = vld [vmem:[%s9751_s6 + $0x18] sm:$0xff]  ;;  %v3675_v26 = vld [vmem:[%s9751_s6 + $0x10] sm:$0xff] }
 0x53e   : > { %v5552_v3 = vpop.permute.xlu2 %5551  ;;  %v5572_v4 = vpop.permute.xlu0 %5571 }
 0x53f   : > { %v5574_v23 = vunpack.i.h.bf16 %v5572_v4  ;;  %v5573_v55 = vunpack.i.l.bf16 %v5572_v4  ;;  %v5554_v36 = vunpack.i.h.bf16 %v5552_v3  ;;  %v5553_v46 = vunpack.i.l.bf16 %v5552_v3 }
 0x541   : > { %v3067_v6 = vsel %vm10331_vm12, %v5573_v55, %v5574_v23  ;;  %v3075_v0 = vsel %vm10332_vm6, %v5574_v23, %v5573_v55  ;;  %vm10335_vm12 = vmmov %vm10333_vm2  ;;  %v3079_v29 = vsel %vm10337_vm3, %v5554_v36, %v5553_v46 }
 0x542   : > { %v7806_v57 = vmax.f32 %v7705_v12, %v3067_v6  ;;  %v7809_v47 = vmax.f32 %v7710_v17, %v3075_v0  ;;  %v7819_v12 = vmax.f32 %v7688_v21, %v3070_v10  ;;  %v7822_v17 = vmax.f32 %v7693_v15, %v3078_v40  ;;  %vm10336_vm6 = vmmov %vm10333_vm2  ;;  %v3679_v0 = vld [vmem:[%s9751_s6 + $0x30] sm:$0xff]  ;;  %v3680_v10 = vld [vmem:[%s9751_s6 + $0x38] sm:$0xff] }
 0x543   : > { %v3071_v15 = vsel %vm10333_vm2, %v5553_v46, %v5554_v36  ;;  %v7846_v33 = vmax.f32 %v7763_v11, %v3079_v29  ;;  %vm10340_vm3 = vmmov %vm10333_vm2  ;;  %v10344_v36 = vld [vmem:[#allocation3_spill] sm:$0xff] }
 0x544   : > { %v5585_v1 = vpack.i.bf16 %v7809_v47, %v7806_v57  ;;  %v5600_v21 = vpack.i.bf16 %v7822_v17, %v7819_v12  ;;  %v7843_v63 = vmax.f32 %v7758_v5, %v3071_v15  ;;  %v2897_v46 = vand.u32 1, %v10344_v36  ;;  %v5201_v36 = vld [vmem:[%s9750_s5 + $0x50] sm:$0xff] }
 0x546   : > { %v5567_v28 = vpop.permute.xlu2 %5566  ;;  %v5557_v8 = vpop.permute.xlu1 %5556  ;;  %5586 = vrot.lane.b32.xlu2 %v5585_v1, %s5634_s17  ;;  %v5605_v5 = vpack.i.bf16 %v7846_v33, %v7843_v63  ;;  %v3677_v1 = vld [vmem:[%s9751_s6 + $0x20] sm:$0xff] }
 0x547   : > { %v5569_v60 = vunpack.i.h.bf16 %v5567_v28  ;;  %v5568_v13 = vunpack.i.l.bf16 %v5567_v28  ;;  %v5559_v54 = vunpack.i.h.bf16 %v5557_v8  ;;  %v5558_v9 = vunpack.i.l.bf16 %v5557_v8 }
 0x549   : > { %v3068_v19 = vsel %vm10335_vm12, %v5568_v13, %v5569_v60  ;;  %v3076_v7 = vsel %vm10336_vm6, %v5569_v60, %v5568_v13  ;;  %vm10338_vm12 = vmmov %vm10333_vm2 }
 0x54a   : > { %v7828_v37 = vmax.f32 %v3023_v61, %v3068_v19  ;;  %v7830_v39 = vmax.f32 %v3024_v24, %v3076_v7  ;;  %vm10339_vm6 = vmmov %vm10333_vm2  ;;  %v10345_v19 = vld [vmem:[#allocation4_spill] sm:$0xff] }
 0x54b   : > { %v2898_v7 = vand.u32 1, %v10345_v19  ;;  %v5202_v19 = vld [vmem:[%s9750_s5 + $0x58] sm:$0xff] }
 0x54c   : > { %v5590_v41 = vpack.i.bf16 %v7830_v39, %v7828_v37 }
 0x54e   : > { %v5582_v2 = vpop.permute.xlu2 %5581  ;;  %5591 = vrot.lane.b32.xlu1 %v5590_v41, %s5634_s17  ;;  %v5562_v44 = vpop.permute.xlu1 %5561  ;;  %5601 = vrot.lane.b32.xlu2 %v5600_v21, %s5634_s17 }
 0x54f   : > { %v5564_v16 = vunpack.i.h.bf16 %v5562_v44  ;;  %v5563_v56 = vunpack.i.l.bf16 %v5562_v44  ;;  %v5584_v50 = vunpack.i.h.bf16 %v5582_v2  ;;  %v5583_v27 = vunpack.i.l.bf16 %v5582_v2 }
 0x551   : > { %v3069_v58 = vsel %vm10338_vm12, %v5563_v56, %v5564_v16  ;;  %v3077_v62 = vsel %vm10339_vm6, %v5564_v16, %v5563_v56  ;;  %v3065_v25 = vsel %vm10333_vm2, %v5583_v27, %v5584_v50  ;;  %vm10341_vm12 = vmmov %vm10333_vm2 }
 0x552   : > { %v7853_v61 = vmax.f32 %v7738_v59, %v3069_v58  ;;  %v7856_v24 = vmax.f32 %v7742_v42, %v3077_v62  ;;  %v3073_v59 = vsel %vm10340_vm3, %v5584_v50, %v5583_v27  ;;  %v3072_v42 = vsel %vm10341_vm12, %v5558_v9, %v5559_v54  ;;  %vm10342_vm6 = vmmov %vm10333_vm2 }
 0x553   : > { %v3080_v43 = vsel %vm10342_vm6, %v5559_v54, %v5558_v9  ;;  %v7875_v53 = vmax.f32 %v3017_v32, %v3065_v25  ;;  %v7877_v49 = vmax.f32 %v3018_v22, %v3073_v59  ;;  %v3095_v52 = vmax.f32 %v7722_v18, %v3072_v42  ;;  %vm10343_vm3 = vmmov %vm10333_vm2 }
 0x554   : > { %v5595_v11 = vpack.i.bf16 %v7856_v24, %v7853_v61  ;;  %v3096_v34 = vmax.f32 %v7727_v48, %v3080_v43  ;;  %vm7921_vm12 = vcmp.eq.s32.totalorder %v2897_v46, 0  ;;  %vm7925_vm6 = vcmp.eq.s32.totalorder %v2898_v7, 0  ;;  %v3167_v46 = vld [vmem:[%s9750_s5 + $0x10] sm:$0xff]  ;;  %v3168_v7 = vld [vmem:[%s9750_s5 + $0x18] sm:$0xff] }
 0x555   : > { %v5620_v23 = vpack.i.bf16 %v7877_v49, %v7875_v53 }
 0x556   : > { %5606 = vrot.lane.b32.xlu1 %v5605_v5, %s5634_s17  ;;  %v5577_v45 = vpop.permute.xlu1 %5576  ;;  %5596 = vrot.lane.b32.xlu0 %v5595_v11, %s5634_s17  ;;  %v5610_v55 = vpack.i.bf16 %v3096_v34, %v3095_v52 }
 0x557   : > { %3683 = vperm.xlu2 %5463, %v3673_v35   ;;  %v5579_v3 = vunpack.i.h.bf16 %v5577_v45  ;;  %v5578_v4 = vunpack.i.l.bf16 %v5577_v45 }
 0x559   : > { %v3066_v32 = vsel %vm10333_vm2, %v5578_v4, %v5579_v3  ;;  %v3074_v22 = vsel %vm10343_vm3, %v5579_v3, %v5578_v4  ;;  %vm10350_vm2 = vcmp.lt.s32.totalorder %v10297_v51, 16 }
 0x55a   : > { %v7893_v18 = vmax.f32 %v7767_v20, %v3066_v32  ;;  %v7896_v48 = vmax.f32 %v7771_v31, %v3074_v22  ;;  %v3678_v20 = vld [vmem:[%s9751_s6 + $0x28] sm:$0xff]  ;;  %vm10351_vm3 = vmmov %vm10350_vm2 }
 0x55b   : > { %v3674_v31 = vld [vmem:[%s9751_s6 + $0x8] sm:$0xff]  ;;  %vm10352_vm10 = vmmov %vm10350_vm2 }
 0x55c   : > { %v5615_v6 = vpack.i.bf16 %v7896_v48, %v7893_v18  ;;  %vm10353_vm0 = vmmov %vm10350_vm2 }
 0x55e   : > { %5621 = vrot.lane.b32.xlu1 %v5620_v23, %s5634_s17  ;;  %5611 = vrot.lane.b32.xlu0 %v5610_v55, %s5634_s17 }
 0x55f   : > { %3698 = vperm.xlu2 %5463, %v3676_v38  }
 0x566   : > { %3693 = vperm.xlu1 %5462, %v3675_v26   ;;  %5616 = vrot.lane.b32.xlu0 %v5615_v6, %s5634_s17 }
 0x567   : > { %3713 = vperm.xlu2 %5463, %v3679_v0  }
 0x56e   : > { %3708 = vperm.xlu1 %5462, %v3678_v20   ;;  %3688 = vperm.xlu0 %5464, %v3674_v31  }
 0x576   : > { %3703 = vperm.xlu0 %5464, %v3677_v1  }
 0x57e   : > { %3718 = vperm.xlu0 %5464, %v3680_v10  }
 0x5a0   : > { %v5587_v28 = vpop.permute.xlu2 %5586 }
 0x5a1   : > { %v5588_v3 = vunpack.i.l.bf16 %v5587_v28 }
 0x5a8   : > { %v5602_v13 = vpop.permute.xlu2 %5601 }
 0x5a9   : > { %v5604_v29 = vunpack.i.h.bf16 %v5602_v13  ;;  %v5603_v2 = vunpack.i.l.bf16 %v5602_v13 }
 0x5c0   : > { %v5592_v40 = vpop.permute.xlu1 %5591 }
 0x5c1   : > { %v5594_v25 = vunpack.i.h.bf16 %v5592_v40  ;;  %v5593_v59 = vunpack.i.l.bf16 %v5592_v40 }
 0x5c8   : > { %v5597_v8 = vpop.permute.xlu0 %5596  ;;  %v5607_v60 = vpop.permute.xlu1 %5606 }
 0x5c9   : > { %v5609_v41 = vunpack.i.h.bf16 %v5607_v60  ;;  %v5608_v21 = vunpack.i.l.bf16 %v5607_v60  ;;  %v5599_v56 = vunpack.i.h.bf16 %v5597_v8  ;;  %v5598_v54 = vunpack.i.l.bf16 %v5597_v8 }
 0x5cb   : > { %v3143_v62 = vsel %vm10352_vm10, %v5609_v41, %v5608_v21  ;;  %v3135_v5 = vsel %vm10353_vm0, %v5608_v21, %v5609_v41  ;;  %vm10355_vm10 = vmmov %vm10353_vm0  ;;  %v3141_v4 = vsel %vm10353_vm0, %v5599_v56, %v5598_v54  ;;  %v5203_v41 = vld [vmem:[%s9750_s5 + $0x60] sm:$0xff] }
 0x5cc   : > { %v3134_v43 = vsel %vm10355_vm10, %v5603_v2, %v5604_v29  ;;  %v7956_v45 = vsel %vm7921_vm12, %v7843_v63, %v3143_v62  ;;  %vm10358_vm10 = vmmov %vm10353_vm0  ;;  %v3169_v21 = vld [vmem:[%s9750_s5 + $0x20] sm:$0xff]  ;;  %v5224_v62 = vld [vmem:[%s9750_s5 + $0x88] sm:$0xff] }
 0x5cd   : > { %v3160_v38 = vsel %vm7925_vm6, %v7822_v17, %v3134_v43  ;;  %v3132_v6 = vsel %vm10358_vm10, %v5593_v59, %v5594_v25  ;;  %vm10361_vm10 = vmmov %vm10353_vm0  ;;  %v5252_v43 = vld [vmem:[%s9750_s5 + $0xe8] sm:$0xff] }
 0x5d0   : > { %v5612_v15 = vpop.permute.xlu0 %5611  ;;  %v5622_v55 = vpop.permute.xlu1 %5621 }
 0x5d1   : > { %v5614_v44 = vunpack.i.h.bf16 %v5612_v15  ;;  %v5613_v16 = vunpack.i.l.bf16 %v5612_v15  ;;  %v5624_v0 = vunpack.i.h.bf16 %v5622_v55  ;;  %v5623_v20 = vunpack.i.l.bf16 %v5622_v55  ;;  %v5204_v15 = vld [vmem:[%s9750_s5 + $0x68] sm:$0xff] }
 0x5d3   : > { %v3144_v27 = vsel %vm10350_vm2, %v5614_v44, %v5613_v16  ;;  %v3136_v58 = vsel %vm10351_vm3, %v5613_v16, %v5614_v44  ;;  %vm10354_vm2 = vmmov %vm10353_vm0  ;;  %v3171_v44 = vld [vmem:[%s9750_s5 + $0x30] sm:$0xff]  ;;  %v5206_v16 = vld [vmem:[%s9750_s5 + $0x78] sm:$0xff] }
 0x5d4   : > { %v7939_v11 = vsel %vm7921_vm12, %v3095_v52, %v3144_v27  ;;  %v7943_v35 = vsel %vm7925_vm6, %v3096_v34, %v3136_v58  ;;  %v3142_v42 = vsel %vm10354_vm2, %v5604_v29, %v5603_v2  ;;  %v7961_v52 = vsel %vm7925_vm6, %v7846_v33, %v3135_v5  ;;  %vm10356_vm3 = vmmov %vm10353_vm0  ;;  %v3170_v29 = vld [vmem:[%s9750_s5 + $0x28] sm:$0xff]  ;;  %v5205_v2 = vld [vmem:[%s9750_s5 + $0x70] sm:$0xff] }
 0x5d5   : > { %3206 = vmatpush.msrb.mxu0 %v7939_v11  ;;  %3247 = vmatpush.msrb.mxu1 %v7943_v35  ;;  %v5589_v34 = vunpack.i.h.bf16 %v5587_v28  ;;  %v3133_v23 = vsel %vm10356_vm3, %v5598_v54, %v5599_v56  ;;  %v3159_v33 = vsel %vm7921_vm12, %v7819_v12, %v3142_v42  ;;  %vm10357_vm2 = vmmov %vm10353_vm0  ;;  %v3157_v12 = vsel %vm7921_vm12, %v7853_v61, %v3141_v4  ;;  %v3172_v56 = vld [vmem:[%s9750_s5 + $0x38] sm:$0xff]  ;;  %v5247_v54 = vld [vmem:[%s9750_s5 + $0xc0] sm:$0xff] }
 0x5d6   : > { %3321 = vmatpush.msra.mxu2 %v7939_v11  ;;  %3362 = vmatpush.msra.mxu3 %v7943_v35  ;;  %v3140_v26 = vsel %vm10357_vm2, %v5594_v25, %v5593_v59  ;;  %v3158_v17 = vsel %vm7925_vm6, %v7856_v24, %v3133_v23  ;;  %vm10359_vm3 = vmmov %vm10353_vm0  ;;  %v3156_v24 = vsel %vm7925_vm6, %v7830_v39, %v3132_v6  ;;  %v5223_v27 = vld [vmem:[%s9750_s5 + $0x80] sm:$0xff]  ;;  %v5248_v58 = vld [vmem:[%s9750_s5 + $0xc8] sm:$0xff] }
 0x5d7   : > { %3207 = vmatpush.msrb.mxu0 %v7956_v45  ;;  %3248 = vmatpush.msrb.mxu1 %v7961_v52  ;;  %v3139_v31 = vsel %vm10353_vm0, %v5589_v34, %v5588_v3  ;;  %v3131_v1 = vsel %vm10359_vm3, %v5588_v3, %v5589_v34  ;;  %v3155_v61 = vsel %vm7921_vm12, %v7828_v37, %v3140_v26  ;;  %vm10360_vm2 = vmmov %vm10353_vm0  ;;  %v5249_v5 = vld [vmem:[%s9750_s5 + $0xd0] sm:$0xff]  ;;  %v5226_v25 = vld [vmem:[%s9750_s5 + $0x98] sm:$0xff] }
 0x5d8   : > { %3322 = vmatpush.msra.mxu2 %v7956_v45  ;;  %3363 = vmatpush.msra.mxu3 %v7961_v52  ;;  %v5617_v63 = vpop.permute.xlu0 %5616  ;;  %v3153_v28 = vsel %vm7921_vm12, %v7806_v57, %v3139_v31  ;;  %v3154_v37 = vsel %vm7925_vm6, %v7809_v47, %v3131_v1  ;;  %v3137_v39 = vsel %vm10353_vm0, %v5624_v0, %v5623_v20  ;;  %vm10362_vm3 = vmmov %vm10353_vm0  ;;  %v5251_v59 = vld [vmem:[%s9750_s5 + $0xe0] sm:$0xff]  ;;  %v5229_v34 = vld [vmem:[%s9750_s5 + $0xb0] sm:$0xff] }
 0x5d9   : > { %v5619_v32 = vunpack.i.h.bf16 %v5617_v63  ;;  %v5618_v22 = vunpack.i.l.bf16 %v5617_v63  ;;  %3208 = vmatpush.msrb.mxu0 %v3159_v33  ;;  %3249 = vmatpush.msrb.mxu1 %v3160_v38  ;;  %v3129_v8 = vsel %vm10362_vm3, %v5623_v20, %v5624_v0  ;;  %v3149_v47 = vsel %vm7921_vm12, %v7875_v53, %v3137_v39  ;;  %v3165_v53 = vld [vmem:[%s9750_s5] sm:$0xff]  ;;  %v5254_v3 = vld [vmem:[%s9750_s5 + $0xf8] sm:$0xff] }
 0x5da   : > { %3323 = vmatpush.msra.mxu2 %v3159_v33  ;;  %3364 = vmatpush.msra.mxu3 %v3160_v38  ;;  %v3150_v13 = vsel %vm7925_vm6, %v7877_v49, %v3129_v8  ;;  %v5200_v49 = vld [vmem:[%s9750_s5 + $0x48] sm:$0xff]  ;;  %v5227_v42 = vld [vmem:[%s9750_s5 + $0xa0] sm:$0xff]  ;;  %v5230_v4 = vld [vmem:[%s9750_s5 + $0xb8] sm:$0xff] }
 0x5db   : > { %3209 = vmatpush.msrb.mxu0 %v3157_v12  ;;  %3250 = vmatpush.msrb.mxu1 %v3158_v17  ;;  %v3138_v10 = vsel %vm10360_vm2, %v5619_v32, %v5618_v22  ;;  %v3130_v40 = vsel %vm10361_vm10, %v5618_v22, %v5619_v32  ;;  %vm9865_vm2 = vcmask 523264   ;;  %vm10377_vm10 = vcmp.lt.s32.totalorder %v10297_v51, 17 }
 0x5dc   : > { %3324 = vmatpush.msra.mxu2 %v3157_v12  ;;  %3365 = vmatpush.msra.mxu3 %v3158_v17  ;;  %v3151_v60 = vsel %vm7921_vm12, %v7893_v18, %v3138_v10  ;;  %v3152_v57 = vsel %vm7925_vm6, %v7896_v48, %v3130_v40  ;;  %v5199_v18 = vld [vmem:[%s9750_s5 + $0x40] sm:$0xff]  ;;  %v3166_v48 = vld [vmem:[%s9750_s5 + $0x8] sm:$0xff]  ;;  %vm10378_vm0 = vmmov %vm10377_vm10 }
 0x5dd   : > { %3210 = vmatpush.msrb.mxu0 %v3155_v61  ;;  %3251 = vmatpush.msrb.mxu1 %v3156_v24 }
 0x5de   : > { %3325 = vmatpush.msra.mxu2 %v3155_v61  ;;  %3366 = vmatpush.msra.mxu3 %v3156_v24 }
 0x5df   : > { %3211 = vmatpush.msrb.mxu0 %v3153_v28  ;;  %3252 = vmatpush.msrb.mxu1 %v3154_v37 }
 0x5e0   : > { %3326 = vmatpush.msra.mxu2 %v3153_v28  ;;  %3367 = vmatpush.msra.mxu3 %v3154_v37 }
 0x5e1   : > { %3212 = vmatpush.msrb.mxu0 %v3151_v60  ;;  %3253 = vmatpush.msrb.mxu1 %v3152_v57 }
 0x5e2   : > { %3327 = vmatpush.msra.mxu2 %v3151_v60  ;;  %3368 = vmatpush.msra.mxu3 %v3152_v57 }
 0x5e3   : > { %3213 = vmatpush.msrb.mxu0 %v3149_v47  ;;  %3254 = vmatpush.msrb.mxu1 %v3150_v13 }
 0x5e4   : > { %3328 = vmatpush.msra.mxu2 %v3149_v47  ;;  %3369 = vmatpush.msra.mxu3 %v3150_v13 }
 0x5e5   : > { %5207 = vmatmul.msk.f32.vlgmr.msra.gmra.mxu2 %vm9865_vm2, %v5199_v18  ;;  %5215 = vmatmul.msk.f32.vlgmr.msra.gmra.mxu3 %vm9865_vm2, %v5199_v18 }
 0x5e6   : > { %3436 = vmatpush.msra.mxu0 %v7939_v11  ;;  %3477 = vmatpush.msra.mxu1 %v7943_v35 }
 0x5e7   : > { %3551 = vmatpush.msrb.mxu2 %v7939_v11  ;;  %3592 = vmatpush.msrb.mxu3 %v7943_v35  ;;  %v5225_v11 = vld [vmem:[%s9750_s5 + $0x90] sm:$0xff]  ;;  %v5250_v35 = vld [vmem:[%s9750_s5 + $0xd8] sm:$0xff] }
 0x5e8   : > { %3437 = vmatpush.msra.mxu0 %v7956_v45  ;;  %3478 = vmatpush.msra.mxu1 %v7961_v52 }
 0x5e9   : > { %3552 = vmatpush.msrb.mxu2 %v7956_v45  ;;  %3593 = vmatpush.msrb.mxu3 %v7961_v52  ;;  %v5228_v45 = vld [vmem:[%s9750_s5 + $0xa8] sm:$0xff]  ;;  %v5253_v52 = vld [vmem:[%s9750_s5 + $0xf0] sm:$0xff] }
 0x5ea   : > { %3438 = vmatpush.msra.mxu0 %v3159_v33  ;;  %3479 = vmatpush.msra.mxu1 %v3160_v38 }
 0x5eb   : > { %3553 = vmatpush.msrb.mxu2 %v3159_v33  ;;  %3594 = vmatpush.msrb.mxu3 %v3160_v38 }
 0x5ec   : > { %5183 = vmatmul.msk.f32.vlgmr.msrb.gmra.mxu0 %vm9865_vm2, %v3165_v53  ;;  %5191 = vmatmul.msk.f32.vlgmr.msrb.gmra.mxu1 %vm9865_vm2, %v3165_v53 }
 0x5ed   : > { %3439 = vmatpush.msra.mxu0 %v3157_v12  ;;  %3480 = vmatpush.msra.mxu1 %v3158_v17 }
 0x5ee   : > { %3554 = vmatpush.msrb.mxu2 %v3157_v12  ;;  %3595 = vmatpush.msrb.mxu3 %v3158_v17 }
 0x5ef   : > { %5208 = vmatmul.msk.f32.gmra.mxu2 %vm9865_vm2, %v5200_v49  ;;  %5216 = vmatmul.msk.f32.gmra.mxu3 %vm9865_vm2, %v5200_v49 }
 0x5f0   : > { %3440 = vmatpush.msra.mxu0 %v3155_v61  ;;  %3481 = vmatpush.msra.mxu1 %v3156_v24 }
 0x5f1   : > { %3555 = vmatpush.msrb.mxu2 %v3155_v61  ;;  %3596 = vmatpush.msrb.mxu3 %v3156_v24 }
 0x5f2   : > { %3441 = vmatpush.msra.mxu0 %v3153_v28  ;;  %3482 = vmatpush.msra.mxu1 %v3154_v37 }
 0x5f3   : > { %3556 = vmatpush.msrb.mxu2 %v3153_v28  ;;  %3597 = vmatpush.msrb.mxu3 %v3154_v37 }
 0x5f4   : > { %3442 = vmatpush.msra.mxu0 %v3151_v60  ;;  %3483 = vmatpush.msra.mxu1 %v3152_v57 }
 0x5f5   : > { %3557 = vmatpush.msrb.mxu2 %v3151_v60  ;;  %3598 = vmatpush.msrb.mxu3 %v3152_v57 }
 0x5f6   : > { %5184 = vmatmul.msk.f32.gmra.mxu0 %vm9865_vm2, %v3166_v48  ;;  %5192 = vmatmul.msk.f32.gmra.mxu1 %vm9865_vm2, %v3166_v48 }
 0x5f7   : > { %3443 = vmatpush.msra.mxu0 %v3149_v47  ;;  %3484 = vmatpush.msra.mxu1 %v3150_v13 }
 0x5f8   : > { %3558 = vmatpush.msrb.mxu2 %v3149_v47  ;;  %3599 = vmatpush.msrb.mxu3 %v3150_v13 }
 0x5f9   : > { %5209 = vmatmul.msk.f32.gmra.mxu2 %vm9865_vm2, %v5201_v36  ;;  %5217 = vmatmul.msk.f32.gmra.mxu3 %vm9865_vm2, %v5201_v36 }
 0x5fe   : > { %5185 = vmatmul.msk.f32.gmra.mxu0 %vm9865_vm2, %v3167_v46  ;;  %5193 = vmatmul.msk.f32.gmra.mxu1 %vm9865_vm2, %v3167_v46 }
 0x601   : > { %5210 = vmatmul.msk.f32.gmra.mxu2 %vm9865_vm2, %v5202_v19  ;;  %5218 = vmatmul.msk.f32.gmra.mxu3 %vm9865_vm2, %v5202_v19 }
 0x606   : > { %5186 = vmatmul.msk.f32.gmra.mxu0 %vm9865_vm2, %v3168_v7  ;;  %5194 = vmatmul.msk.f32.gmra.mxu1 %vm9865_vm2, %v3168_v7 }
 0x609   : > { %5211 = vmatmul.msk.f32.gmra.mxu2 %vm9865_vm2, %v5203_v41  ;;  %5219 = vmatmul.msk.f32.gmra.mxu3 %vm9865_vm2, %v5203_v41 }
 0x60e   : > { %5187 = vmatmul.msk.f32.gmra.mxu0 %vm9865_vm2, %v3169_v21  ;;  %5195 = vmatmul.msk.f32.gmra.mxu1 %vm9865_vm2, %v3169_v21 }
 0x611   : > { %5212 = vmatmul.msk.f32.gmra.mxu2 %vm9865_vm2, %v5204_v15  ;;  %5220 = vmatmul.msk.f32.gmra.mxu3 %vm9865_vm2, %v5204_v15 }
 0x616   : > { %5188 = vmatmul.msk.f32.gmra.mxu0 %vm9865_vm2, %v3170_v29  ;;  %5196 = vmatmul.msk.f32.gmra.mxu1 %vm9865_vm2, %v3170_v29 }
 0x619   : > { %5213 = vmatmul.msk.f32.gmra.mxu2 %vm9865_vm2, %v5205_v2  ;;  %5221 = vmatmul.msk.f32.gmra.mxu3 %vm9865_vm2, %v5205_v2 }
 0x61e   : > { %5189 = vmatmul.msk.f32.gmra.mxu0 %vm9865_vm2, %v3171_v44  ;;  %5197 = vmatmul.msk.f32.gmra.mxu1 %vm9865_vm2, %v3171_v44 }
 0x621   : > { %5214 = vmatmul.msk.f32.gmra.mxu2 %vm9865_vm2, %v5206_v16  ;;  %5222 = vmatmul.msk.f32.gmra.mxu3 %vm9865_vm2, %v5206_v16 }
 0x626   : > { %5190 = vmatmul.msk.f32.gmra.mxu0 %vm9865_vm2, %v3172_v56  ;;  %5198 = vmatmul.msk.f32.gmra.mxu1 %vm9865_vm2, %v3172_v56 }
 0x629   : > { %5255 = vmatmul.msk.f32.vlgmr.msrb.gmra.mxu2 %vm9865_vm2, %v5247_v54  ;;  %5263 = vmatmul.msk.f32.vlgmr.msrb.gmra.mxu3 %vm9865_vm2, %v5247_v54 }
 0x62e   : > { %5231 = vmatmul.msk.f32.vlgmr.msra.gmra.mxu0 %vm9865_vm2, %v5223_v27  ;;  %5239 = vmatmul.msk.f32.vlgmr.msra.gmra.mxu1 %vm9865_vm2, %v5223_v27 }
 0x631   : > { %5256 = vmatmul.msk.f32.gmra.mxu2 %vm9865_vm2, %v5248_v58  ;;  %5264 = vmatmul.msk.f32.gmra.mxu3 %vm9865_vm2, %v5248_v58 }
 0x636   : > { %5232 = vmatmul.msk.f32.gmra.mxu0 %vm9865_vm2, %v5224_v62  ;;  %5240 = vmatmul.msk.f32.gmra.mxu1 %vm9865_vm2, %v5224_v62 }
 0x639   : > { %5257 = vmatmul.msk.f32.gmra.mxu2 %vm9865_vm2, %v5249_v5  ;;  %5265 = vmatmul.msk.f32.gmra.mxu3 %vm9865_vm2, %v5249_v5 }
 0x63e   : > { %5233 = vmatmul.msk.f32.gmra.mxu0 %vm9865_vm2, %v5225_v11  ;;  %5241 = vmatmul.msk.f32.gmra.mxu1 %vm9865_vm2, %v5225_v11 }
 0x641   : > { %5258 = vmatmul.msk.f32.gmra.mxu2 %vm9865_vm2, %v5250_v35  ;;  %5266 = vmatmul.msk.f32.gmra.mxu3 %vm9865_vm2, %v5250_v35 }
 0x646   : > { %5234 = vmatmul.msk.f32.gmra.mxu0 %vm9865_vm2, %v5226_v25  ;;  %5242 = vmatmul.msk.f32.gmra.mxu1 %vm9865_vm2, %v5226_v25 }
 0x649   : > { %5259 = vmatmul.msk.f32.gmra.mxu2 %vm9865_vm2, %v5251_v59  ;;  %5267 = vmatmul.msk.f32.gmra.mxu3 %vm9865_vm2, %v5251_v59 }
 0x64e   : > { %5235 = vmatmul.msk.f32.gmra.mxu0 %vm9865_vm2, %v5227_v42  ;;  %5243 = vmatmul.msk.f32.gmra.mxu1 %vm9865_vm2, %v5227_v42 }
 0x651   : > { %5260 = vmatmul.msk.f32.gmra.mxu2 %vm9865_vm2, %v5252_v43  ;;  %5268 = vmatmul.msk.f32.gmra.mxu3 %vm9865_vm2, %v5252_v43 }
 0x656   : > { %5236 = vmatmul.msk.f32.gmra.mxu0 %vm9865_vm2, %v5228_v45  ;;  %5244 = vmatmul.msk.f32.gmra.mxu1 %vm9865_vm2, %v5228_v45  ;;  %v3684_v45 = vpop.permute.xlu2 %3683 }
 0x659   : > { %5261 = vmatmul.msk.f32.gmra.mxu2 %vm9865_vm2, %v5253_v52  ;;  %5269 = vmatmul.msk.f32.gmra.mxu3 %vm9865_vm2, %v5253_v52 }
 0x65e   : > { %5237 = vmatmul.msk.f32.gmra.mxu0 %vm9865_vm2, %v5229_v34  ;;  %5245 = vmatmul.msk.f32.gmra.mxu1 %vm9865_vm2, %v5229_v34 }
 0x661   : > { %5262 = vmatmul.msk.f32.gmra.mxu2 %vm9865_vm2, %v5254_v3  ;;  %5270 = vmatmul.msk.f32.gmra.mxu3 %vm9865_vm2, %v5254_v3 }
 0x666   : > { %5238 = vmatmul.msk.f32.gmra.mxu0 %vm9865_vm2, %v5230_v4  ;;  %5246 = vmatmul.msk.f32.gmra.mxu1 %vm9865_vm2, %v5230_v4 }
 0x668   : > { %v3330_v23 = vpop.f32.mrf.mxu2  ;;  %v3371_v55 = vpop.f32.mrf.mxu3 }
 0x669   : > { %v3215_v63 = vpop.f32.mrf.mxu0  ;;  %v3256_v33 = vpop.f32.mrf.mxu1 }
 0x66a   : > { %v3625_v38 = vsel %vm7673_vm13, %v3215_v63, %v3330_v23  ;;  %v3626_v32 = vsel %vm7677_vm9, %v3256_v33, %v3371_v55 }
 0x672   : > { %v8195_v22 = vpop.f32.mrf.mxu2  ;;  %v8197_v26 = vpop.f32.mrf.mxu3 }
 0x673   : > { %v8199_v6 = vpop.f32.mrf.mxu0  ;;  %v8201_v12 = vpop.f32.mrf.mxu1 }
 0x674   : > { %v3627_v17 = vsel %vm7673_vm13, %v8199_v6, %v8195_v22  ;;  %v3628_v0 = vsel %vm7677_vm9, %v8201_v12, %v8197_v26 }
 0x67b   : > { %v8211_v20 = vpop.f32.mrf.mxu0  ;;  %v8213_v31 = vpop.f32.mrf.mxu1 }
 0x67c   : > { %v8215_v1 = vpop.f32.mrf.mxu2  ;;  %v8217_v61 = vpop.f32.mrf.mxu3 }
 0x67d   : > { %v3629_v24 = vsel %vm7673_vm13, %v8211_v20, %v8215_v1 }
 0x683   : > { %v8227_v40 = vpop.f32.mrf.mxu0  ;;  %v8229_v28 = vpop.f32.mrf.mxu1 }
 0x684   : > { %v8231_v37 = vpop.f32.mrf.mxu2  ;;  %v8233_v39 = vpop.f32.mrf.mxu3 }
 0x68b   : > { %v8243_v57 = vpop.f32.mrf.mxu0  ;;  %v8245_v47 = vpop.f32.mrf.mxu1 }
 0x68c   : > { %v8247_v13 = vpop.f32.mrf.mxu2  ;;  %v8249_v18 = vpop.f32.mrf.mxu3 }
 0x693   : > { %v8259_v48 = vpop.f32.mrf.mxu0  ;;  %v8261_v36 = vpop.f32.mrf.mxu1 }
 0x694   : > { %v8263_v46 = vpop.f32.mrf.mxu2  ;;  %v8265_v19 = vpop.f32.mrf.mxu3 }
 0x69b   : > { %v8275_v21 = vpop.f32.mrf.mxu0  ;;  %v8277_v15 = vpop.f32.mrf.mxu1 }
 0x69c   : > { %v8279_v29 = vpop.f32.mrf.mxu2  ;;  %v8281_v2 = vpop.f32.mrf.mxu3 }
 0x69d   : > { %v3637_v44 = vsel %vm7673_vm13, %v8275_v21, %v8279_v29  ;;  %v3638_v16 = vsel %vm7677_vm9, %v8277_v15, %v8281_v2 }
 0x6a3   : > { %v8291_v56 = vpop.f32.mrf.mxu0  ;;  %v8293_v54 = vpop.f32.mrf.mxu1 }
 0x6a4   : > { %v8295_v27 = vpop.f32.mrf.mxu2  ;;  %v8297_v58 = vpop.f32.mrf.mxu3 }
 0x6a5   : > { %v3639_v62 = vsel %vm7673_vm13, %v8291_v56, %v8295_v27  ;;  %v3640_v5 = vsel %vm7677_vm9, %v8293_v54, %v8297_v58 }
 0x6ab   : > { %v3445_v11 = vpop.f32.mrf.mxu0  ;;  %v3486_v35 = vpop.f32.mrf.mxu1 }
 0x6ac   : > { %v3560_v25 = vpop.f32.mrf.mxu2  ;;  %v3601_v59 = vpop.f32.mrf.mxu3 }
 0x6ad   : > { %v3641_v42 = vsel %vm7673_vm13, %v3445_v11, %v3560_v25  ;;  %v3642_v43 = vsel %vm7677_vm9, %v3486_v35, %v3601_v59 }
 0x6ae   : > { %v3657_v52 = vsel %vm7921_vm12, %v3625_v38, %v3641_v42  ;;  %v3658_v34 = vsel %vm7925_vm6, %v3626_v32, %v3642_v43 }
 0x6af   : > { %v3721_v3 = vadd.f32 %v3684_v45, %v3657_v52  ;;  %v3722_v4 = vadd.f32 %v3684_v45, %v3658_v34 }
 0x6b1   : > { %v8315_v23 = vmax.f32 %v3721_v3, 0.0  ;;  %v8317_v55 = vmax.f32 %v3722_v4, 0.0  ;;  %v3689_v3 = vpop.permute.xlu0 %3688 }
 0x6b3   : > { %10363 = vst [vmem:[#allocation46_spill] sm:$0xff] %v8315_v23  ;;  %3818 = vrot.lane.b32.xlu2 %v8315_v23, %s5634_s17  ;;  %3753 = vrot.lane.b32.xlu1 %v8315_v23, %s5633_s16  ;;  %v3448_v63 = vpop.f32.mrf.mxu0  ;;  %v3489_v33 = vpop.f32.mrf.mxu1 }
 0x6b4   : > { %10364 = vst [vmem:[#allocation31_spill] sm:$0xff] %v8317_v55  ;;  %3769 = vrot.lane.b32.xlu0 %v8317_v55, %s5633_s16  ;;  %v3563_v38 = vpop.f32.mrf.mxu2  ;;  %v3604_v11 = vpop.f32.mrf.mxu3 }
 0x6b5   : > { %v3643_v34 = vsel %vm7673_vm13, %v3448_v63, %v3563_v38  ;;  %v3644_v6 = vsel %vm7677_vm9, %v3489_v33, %v3604_v11 }
 0x6b6   : > { %v3659_v4 = vsel %vm7921_vm12, %v3627_v17, %v3643_v34  ;;  %v8376_v34 = vpop.permute.xlu2 %3698  ;;  %v3660_v49 = vsel %vm7925_vm6, %v3628_v0, %v3644_v6 }
 0x6b7   : > { %v3723_v22 = vadd.f32 %v3689_v3, %v3659_v4  ;;  %v3724_v26 = vadd.f32 %v3689_v3, %v3660_v49 }
 0x6b9   : > { %v8374_v17 = vmax.f32 %v3723_v22, 0.0  ;;  %v8399_v12 = vmax.f32 %v3724_v26, 0.0  ;;  %v8401_v0 = vpop.permute.xlu0 %3703 }
 0x6bb   : > { %3986 = vrot.lane.b32.xlu2 %v8317_v55, %s5635_s18  ;;  %3834 = vrot.lane.b32.xlu1 %v8317_v55, %s5634_s17  ;;  %v3451_v32 = vpop.f32.mrf.mxu0  ;;  %v8329_v35 = vpop.f32.mrf.mxu1  ;;  %10365 = vst [vmem:[#allocation33_spill] sm:$0xff] %v8374_v17 }
 0x6bc   : > { %3970 = vrot.lane.b32.xlu0 %v8315_v23, %s5635_s18  ;;  %v3566_v25 = vpop.f32.mrf.mxu2  ;;  %v8333_v59 = vpop.f32.mrf.mxu3  ;;  %10366 = vst [vmem:[#allocation36_spill] sm:$0xff] %v8399_v12 }
 0x6bd   : > { %v3646_v56 = vsel %vm7677_vm9, %v8329_v35, %v8333_v59 }
 0x6be   : > { %v3714_v26 = vpop.permute.xlu2 %3713 }
 0x6c3   : > { %4271 = vrot.lane.b32.xlu2 %v8317_v55, %s5637_s20  ;;  %4081 = vrot.lane.b32.xlu1 %v8315_v23, %s5636_s19  ;;  %v8339_v42 = vpop.f32.mrf.mxu0  ;;  %v8341_v43 = vpop.f32.mrf.mxu1 }
 0x6c4   : > { %4097 = vrot.lane.b32.xlu0 %v8317_v55, %s5636_s19  ;;  %v8345_v45 = vpop.f32.mrf.mxu2  ;;  %v8347_v52 = vpop.f32.mrf.mxu3 }
 0x6cb   : > { %4382 = vrot.lane.b32.xlu2 %v8317_v55, %s5638_s21  ;;  %4255 = vrot.lane.b32.xlu1 %v8315_v23, %s5637_s20  ;;  %v8362_v41 = vpop.f32.mrf.mxu0  ;;  %v8364_v7 = vpop.f32.mrf.mxu1 }
 0x6cc   : > { %4477 = vrot.lane.b32.xlu0 %v8315_v23, %s5639_s22  ;;  %v8368_v63 = vpop.f32.mrf.mxu2  ;;  %v8370_v38 = vpop.f32.mrf.mxu3 }
 0x6d3   : > { %3755 = vrot.lane.b32.xlu2 %v8374_v17, %s5633_s16  ;;  %4366 = vrot.lane.b32.xlu1 %v8315_v23, %s5638_s21  ;;  %v8389_v4 = vpop.f32.mrf.mxu0  ;;  %v8391_v33 = vpop.f32.mrf.mxu1 }
 0x6d4   : > { %3820 = vrot.lane.b32.xlu0 %v8374_v17, %s5634_s17  ;;  %v8395_v11 = vpop.f32.mrf.mxu2  ;;  %v8397_v22 = vpop.f32.mrf.mxu3 }
 0x6db   : > { %3836 = vrot.lane.b32.xlu2 %v8399_v12, %s5634_s17  ;;  %3771 = vrot.lane.b32.xlu1 %v8399_v12, %s5633_s16  ;;  %v3463_v6 = vpop.f32.mrf.mxu0  ;;  %v3504_v53 = vpop.f32.mrf.mxu1 }
 0x6dc   : > { %3988 = vrot.lane.b32.xlu0 %v8399_v12, %s5635_s18  ;;  %v3578_v8 = vpop.f32.mrf.mxu2  ;;  %v3619_v60 = vpop.f32.mrf.mxu3 }
 0x6dd   : > { %v3653_v49 = vsel %vm7673_vm13, %v3463_v6, %v3578_v8  ;;  %v3654_v3 = vsel %vm7677_vm9, %v3504_v53, %v3619_v60  ;;  %v3645_v53 = vsel %vm7673_vm13, %v3451_v32, %v3566_v25 }
 0x6de   : > { %v3669_v10 = vsel %vm7921_vm12, %v3637_v44, %v3653_v49  ;;  %v3670_v8 = vsel %vm7925_vm6, %v3638_v16, %v3654_v3  ;;  %v3661_v21 = vsel %vm7921_vm12, %v3629_v24, %v3645_v53  ;;  %v3694_v44 = vpop.permute.xlu1 %3693  ;;  %v3719_v24 = vpop.permute.xlu0 %3718 }
 0x6df   : > { %v8427_v6 = vadd.f32 %v3714_v26, %v3669_v10  ;;  %v8429_v60 = vadd.f32 %v3714_v26, %v3670_v8  ;;  %v3725_v16 = vadd.f32 %v3694_v44, %v3661_v21  ;;  %v10376_v21 = vsel %vm7677_vm9, %v8245_v47, %v8249_v18 }
 0x6e1   : > { %v8472_v27 = vmax.f32 %v3725_v16, 0.0 }
 0x6e3   : > { %4083 = vrot.lane.b32.xlu2 %v8374_v17, %s5636_s19  ;;  %3972 = vrot.lane.b32.xlu1 %v8374_v17, %s5635_s18  ;;  %v3466_v10 = vpop.f32.mrf.mxu0  ;;  %v3507_v15 = vpop.f32.mrf.mxu1  ;;  %10367 = vst [vmem:[#allocation37_spill] sm:$0xff] %v8472_v27 }
 0x6e4   : > { %4479 = vrot.lane.b32.xlu0 %v8374_v17, %s5639_s22  ;;  %v3581_v29 = vpop.f32.mrf.mxu2  ;;  %v3622_v2 = vpop.f32.mrf.mxu3 }
 0x6e5   : > { %v3655_v20 = vsel %vm7673_vm13, %v3466_v10, %v3581_v29  ;;  %v3656_v1 = vsel %vm7677_vm9, %v3507_v15, %v3622_v2 }
 0x6e6   : > { %v3671_v32 = vsel %vm7921_vm12, %v3639_v62, %v3655_v20  ;;  %v3672_v25 = vsel %vm7925_vm6, %v3640_v5, %v3656_v1  ;;  %v10368_v62 = vsel %vm7677_vm9, %v8213_v31, %v8217_v61  ;;  %v3648_v31 = vsel %vm7677_vm9, %v8341_v43, %v8347_v52  ;;  %v8564_v53 = vpop.permute.xlu1 %3708 }
 0x6e7   : > { %v8464_v49 = vadd.f32 %v3719_v24, %v3671_v32  ;;  %v8466_v3 = vadd.f32 %v3719_v24, %v3672_v25  ;;  %v3662_v54 = vsel %vm7925_vm6, %v10368_v62, %v3646_v56  ;;  %v10370_v61 = vsel %vm7677_vm9, %v8229_v28, %v8233_v39 }
 0x6e8   : > { %v3726_v58 = vadd.f32 %v3694_v44, %v3662_v54  ;;  %v3664_v35 = vsel %vm7925_vm6, %v10370_v61, %v3648_v31  ;;  %v3647_v43 = vsel %vm7673_vm13, %v8339_v42, %v8345_v45  ;;  %v10372_v39 = vsel %vm7673_vm13, %v8227_v40, %v8231_v37 }
 0x6e9   : > { %v3728_v59 = vadd.f32 %v8376_v34, %v3664_v35  ;;  %v3663_v52 = vsel %vm7921_vm12, %v10372_v39, %v3647_v43  ;;  %v3649_v37 = vsel %vm7673_vm13, %v8362_v41, %v8368_v63 }
 0x6ea   : > { %v8487_v5 = vmax.f32 %v3726_v58, 0.0  ;;  %v3727_v45 = vadd.f32 %v8376_v34, %v3663_v52  ;;  %v10374_v34 = vsel %vm7673_vm13, %v8243_v57, %v8247_v13  ;;  %v3650_v57 = vsel %vm7677_vm9, %v8364_v7, %v8370_v38 }
 0x6eb   : > { %4273 = vrot.lane.b32.xlu2 %v8399_v12, %s5637_s20  ;;  %4099 = vrot.lane.b32.xlu1 %v8399_v12, %s5636_s19  ;;  %v8523_v28 = vmax.f32 %v3728_v59, 0.0  ;;  %v3665_v8 = vsel %vm7921_vm12, %v10374_v34, %v3649_v37  ;;  %v3666_v10 = vsel %vm7925_vm6, %v10376_v21, %v3650_v57 }
 0x6ec   : > { %3757 = vrot.lane.b32.xlu0 %v8472_v27, %s5633_s16  ;;  %10369 = vst [vmem:[#allocation53_spill] sm:$0xff] %v8487_v5  ;;  %v8539_v26 = vmax.f32 %v3727_v45, 0.0  ;;  %v3729_v63 = vadd.f32 %v8401_v0, %v3665_v8  ;;  %v3730_v15 = vadd.f32 %v8401_v0, %v3666_v10  ;;  %v3651_v8 = vsel %vm7673_vm13, %v8389_v4, %v8395_v11 }
 0x6ed   : > { %10371 = vst [vmem:[#allocation25_spill] sm:$0xff] %v8523_v28  ;;  %v10402_v10 = vsel %vm7677_vm9, %v8261_v36, %v8265_v19 }
 0x6ee   : > { %10373 = vst [vmem:[#allocation54_spill] sm:$0xff] %v8539_v26  ;;  %v8571_v13 = vmax.f32 %v3729_v63, 0.0  ;;  %v8595_v2 = vmax.f32 %v3730_v15, 0.0 }
 0x6f0   : > { %10375 = vst [vmem:[#allocation34_spill] sm:$0xff] %v8571_v13 }
 0x6f1   : > { %10379 = vst [vmem:[#allocation44_spill] sm:$0xff] %v8595_v2 }
 0x6f3   : > { %4384 = vrot.lane.b32.xlu2 %v8399_v12, %s5638_s21  ;;  %4257 = vrot.lane.b32.xlu1 %v8374_v17, %s5637_s20 }
 0x6f4   : > { %3838 = vrot.lane.b32.xlu0 %v8487_v5, %s5634_s17 }
 0x6fb   : > { %4368 = vrot.lane.b32.xlu1 %v8374_v17, %s5638_s21  ;;  %3773 = vrot.lane.b32.xlu2 %v8487_v5, %s5633_s16 }
 0x6fc   : > { %4085 = vrot.lane.b32.xlu0 %v8472_v27, %s5636_s19 }
 0x703   : > { %4495 = vrot.lane.b32.xlu1 %v8399_v12, %s5639_s22  ;;  %3974 = vrot.lane.b32.xlu2 %v8472_v27, %s5635_s18 }
 0x704   : > { %4481 = vrot.lane.b32.xlu0 %v8472_v27, %s5639_s22 }
 0x70b   : > { %3822 = vrot.lane.b32.xlu1 %v8472_v27, %s5634_s17  ;;  %4101 = vrot.lane.b32.xlu2 %v8487_v5, %s5636_s19 }
 0x70c   : > { %3775 = vrot.lane.b32.xlu0 %v8523_v28, %s5633_s16 }
 0x70d   : > { %v3819_v42 = vpop.permute.xlu2 %3818 }
 0x713   : > { %3990 = vrot.lane.b32.xlu1 %v8487_v5, %s5635_s18  ;;  %4275 = vrot.lane.b32.xlu2 %v8487_v5, %s5637_s20 }
 0x714   : > { %3976 = vrot.lane.b32.xlu0 %v8539_v26, %s5635_s18 }
 0x715   : > { %v3987_v40 = vpop.permute.xlu2 %3986 }
 0x71b   : > { %4259 = vrot.lane.b32.xlu1 %v8472_v27, %s5637_s20  ;;  %4386 = vrot.lane.b32.xlu2 %v8487_v5, %s5638_s21 }
 0x71c   : > { %4483 = vrot.lane.b32.xlu0 %v8539_v26, %s5639_s22 }
 0x71d   : > { %v4272_v41 = vpop.permute.xlu2 %4271 }
 0x723   : > { %4370 = vrot.lane.b32.xlu1 %v8472_v27, %s5638_s21  ;;  %3824 = vrot.lane.b32.xlu2 %v8539_v26, %s5634_s17 }
 0x724   : > { %3826 = vrot.lane.b32.xlu0 %v8571_v13, %s5634_s17 }
 0x725   : > { %v3754_v7 = vpop.permute.xlu1 %3753  ;;  %v4383_v38 = vpop.permute.xlu2 %4382 }
 0x726   : > { %v3770_v29 = vpop.permute.xlu0 %3769 }
 0x727   : > { %v8589_v47 = vsel %vm10377_vm10, %v3754_v7, %v3770_v29  ;;  %v8593_v18 = vsel %vm10378_vm0, %v3770_v29, %v3754_v7  ;;  %vm10380_vm10 = vmmov %vm10362_vm3  ;;  %vm10381_vm0 = vcmp.lt.s32.totalorder %v10297_v51, 15 }
 0x728   : > { %vm10383_vm2 = vmmov %vm10381_vm0 }
 0x72b   : > { %4497 = vrot.lane.b32.xlu1 %v8487_v5, %s5639_s22  ;;  %3992 = vrot.lane.b32.xlu2 %v8523_v28, %s5635_s18 }
 0x72c   : > { %3994 = vrot.lane.b32.xlu0 %v8595_v2, %s5635_s18 }
 0x72d   : > { %v3756_v0 = vpop.permute.xlu2 %3755  ;;  %v3835_v44 = vpop.permute.xlu1 %3834 }
 0x72e   : > { %v8605_v20 = vsel %vm10362_vm3, %v3819_v42, %v3835_v44  ;;  %v8609_v1 = vsel %vm10380_vm10, %v3835_v44, %v3819_v42  ;;  %v3971_v24 = vpop.permute.xlu0 %3970  ;;  %vm10385_vm3 = vcmp.lt.s32.totalorder %v10297_v51, 1 }
 0x72f   : > { %v8613_v16 = vsel %vm10381_vm0, %v3971_v24, %v3987_v40  ;;  %v8617_v32 = vsel %vm10383_vm2, %v3987_v40, %v3971_v24  ;;  %vm10386_vm10 = vmmov %vm10385_vm3  ;;  %vm10387_vm2 = vcmp.lt.s32.totalorder %v10297_v51, 127 }
 0x730   : > { %10382 = vst [vmem:[#allocation45_spill] sm:$0xff] %v8613_v16  ;;  %vm10389_vm0 = vmmov %vm10387_vm2 }
 0x731   : > { %10384 = vst [vmem:[#allocation32_spill] sm:$0xff] %v8617_v32  ;;  %v8938_v32 = vmax.f32 %v8464_v49, 0.0 }
 0x733   : > { %3759 = vrot.lane.b32.xlu1 %v8539_v26, %s5633_s16  ;;  %4277 = vrot.lane.b32.xlu2 %v8523_v28, %s5637_s20  ;;  %10455 = vst [vmem:[#allocation29_spill] sm:$0xff] %v8938_v32 }
 0x734   : > { %4105 = vrot.lane.b32.xlu0 %v8595_v2, %s5636_s19 }
 0x735   : > { %v4082_v25 = vpop.permute.xlu1 %4081  ;;  %v3837_v56 = vpop.permute.xlu2 %3836 }
 0x736   : > { %v4098_v62 = vpop.permute.xlu0 %4097 }
 0x737   : > { %v8627_v54 = vsel %vm10385_vm3, %v4082_v25, %v4098_v62  ;;  %v8631_v58 = vsel %vm10386_vm10, %v4098_v62, %v4082_v25  ;;  %vm10392_vm3 = vcmp.lt.s32.totalorder %v10297_v51, 113 }
 0x738   : > { %vm10394_vm10 = vmmov %vm10392_vm3 }
 0x73b   : > { %4388 = vrot.lane.b32.xlu2 %v8523_v28, %s5638_s21  ;;  %3840 = vrot.lane.b32.xlu1 %v8523_v28, %s5634_s17 }
 0x73c   : > { %4279 = vrot.lane.b32.xlu0 %v8595_v2, %s5637_s20 }
 0x73d   : > { %v4256_v31 = vpop.permute.xlu1 %4255  ;;  %v4084_v61 = vpop.permute.xlu2 %4083 }
 0x73e   : > { %v8641_v35 = vsel %vm10387_vm2, %v4256_v31, %v4272_v41  ;;  %v8645_v59 = vsel %vm10389_vm0, %v4272_v41, %v4256_v31  ;;  %v8647_v43 = vpop.permute.xlu0 %4477  ;;  %vm10396_vm2 = vcmp.lt.s32.totalorder %v10297_v51, 16  ;;  %v10398_v41 = vsel %vm7673_vm13, %v8259_v48, %v8263_v46 }
 0x73f   : > { %10388 = vst [vmem:[#allocation35_spill] sm:$0xff] %v8641_v35  ;;  %vm10397_vm0 = vmmov %vm10396_vm2  ;;  %v3667_v63 = vsel %vm7921_vm12, %v10398_v41, %v3651_v8  ;;  %v3652_v46 = vsel %vm7677_vm9, %v8391_v33, %v8397_v22  ;;  %vm10403_vm12 = vcmp.lt.s32.totalorder %v10297_v51, 15 }
 0x740   : > { %10390 = vst [vmem:[#allocation63_spill] sm:$0xff] %v8645_v59  ;;  %v3731_v4 = vadd.f32 %v8564_v53, %v3667_v63  ;;  %v3668_v7 = vsel %vm7925_vm6, %v10402_v10, %v3652_v46  ;;  %vm10405_vm9 = vmmov %vm10403_vm12  ;;  %vm10408_vm6 = vcmp.lt.s32.totalorder %v10297_v51, 1 }
 0x741   : > { %10391 = vst [vmem:[#allocation64_spill] sm:$0xff] %v8647_v43 }
 0x742   : > { %v8701_v11 = vmax.f32 %v3731_v4, 0.0 }
 0x743   : > { %3761 = vrot.lane.b32.xlu2 %v8571_v13, %s5633_s16  ;;  %4087 = vrot.lane.b32.xlu1 %v8539_v26, %s5636_s19 }
 0x744   : > { %4374 = vrot.lane.b32.xlu0 %v8571_v13, %s5638_s21  ;;  %10401 = vst [vmem:[#allocation49_spill] sm:$0xff] %v8701_v11 }
 0x745   : > { %v4367_v39 = vpop.permute.xlu1 %4366  ;;  %v4274_v52 = vpop.permute.xlu2 %4273 }
 0x746   : > { %v8657_v42 = vsel %vm10392_vm3, %v4367_v39, %v4383_v38  ;;  %v8661_v45 = vsel %vm10394_vm10, %v4383_v38, %v4367_v39  ;;  %v3821_v40 = vpop.permute.xlu0 %3820  ;;  %vm10399_vm3 = vcmp.lt.s32.totalorder %v10297_v51, 17  ;;  %v3732_v38 = vadd.f32 %v8564_v53, %v3668_v7  ;;  %vm10409_vm10 = vmmov %vm10408_vm6 }
 0x747   : > { %10393 = vst [vmem:[#allocation28_spill] sm:$0xff] %v8657_v42  ;;  %v8665_v37 = vsel %vm10396_vm2, %v3821_v40, %v3837_v56  ;;  %v8669_v34 = vsel %vm10397_vm0, %v3837_v56, %v3821_v40  ;;  %vm10400_vm13 = vmmov %vm10399_vm3 }
 0x748   : > { %10395 = vst [vmem:[#allocation27_spill] sm:$0xff] %v8661_v45  ;;  %v8725_v19 = vmax.f32 %v3732_v38, 0.0  ;;  %vm10410_vm2 = vmmov %vm10399_vm3 }
 0x749   : > { %vm10411_vm0 = vmmov %vm10410_vm2 }
 0x74a   : > { %10407 = vst [vmem:[#allocation68_spill] sm:$0xff] %v8725_v19 }
 0x74b   : > { %4103 = vrot.lane.b32.xlu1 %v8523_v28, %s5636_s19  ;;  %3842 = vrot.lane.b32.xlu2 %v8595_v2, %s5634_s17 }
 0x74c   : > { %4501 = vrot.lane.b32.xlu0 %v8595_v2, %s5639_s22 }
 0x74d   : > { %v4385_v57 = vpop.permute.xlu2 %4384  ;;  %v3772_v21 = vpop.permute.xlu1 %3771 }
 0x74e   : > { %v3989_v14 = vpop.permute.xlu0 %3988  ;;  %v8691_v48 = vsel %vm10399_vm3, %v3756_v0, %v3772_v21  ;;  %v8695_v9 = vsel %vm10400_vm13, %v3772_v21, %v3756_v0  ;;  %vm10412_vm3 = vcmp.lt.s32.totalorder %v10297_v51, 127 }
 0x74f   : > { %vm10414_vm13 = vmmov %vm10412_vm3 }
 0x753   : > { %4261 = vrot.lane.b32.xlu1 %v8539_v26, %s5637_s20  ;;  %4089 = vrot.lane.b32.xlu2 %v8571_v13, %s5636_s19 }
 0x754   : > { %3763 = vrot.lane.b32.xlu0 %v8701_v11, %s5633_s16 }
 0x755   : > { %v3973_v33 = vpop.permute.xlu1 %3972  ;;  %v3774_v22 = vpop.permute.xlu2 %3773 }
 0x756   : > { %v4480_v30 = vpop.permute.xlu0 %4479  ;;  %v8719_v36 = vsel %vm10403_vm12, %v3973_v33, %v3989_v14  ;;  %v8723_v50 = vsel %vm10405_vm9, %v3989_v14, %v3973_v33  ;;  %vm10416_vm12 = vcmp.lt.s32.totalorder %v10297_v51, 113 }
 0x757   : > { %10404 = vst [vmem:[#allocation50_spill] sm:$0xff] %v8719_v36  ;;  %vm10418_vm9 = vmmov %vm10416_vm12 }
 0x758   : > { %10406 = vst [vmem:[#allocation67_spill] sm:$0xff] %v8723_v50 }
 0x75b   : > { %4372 = vrot.lane.b32.xlu1 %v8539_v26, %s5638_s21  ;;  %4263 = vrot.lane.b32.xlu2 %v8571_v13, %s5637_s20 }
 0x75c   : > { %3844 = vrot.lane.b32.xlu0 %v8725_v19, %s5634_s17 }
 0x75d   : > { %v4100_v53 = vpop.permute.xlu1 %4099  ;;  %v3975_v15 = vpop.permute.xlu2 %3974 }
 0x75e   : > { %v3758_v29 = vpop.permute.xlu0 %3757  ;;  %v8735_v0 = vsel %vm10408_vm6, %v4084_v61, %v4100_v53  ;;  %v8739_v44 = vsel %vm10409_vm10, %v4100_v53, %v4084_v61  ;;  %vm10420_vm10 = vmmov %vm10408_vm6 }
 0x75f   : > { %v8743_v24 = vsel %vm10410_vm2, %v3758_v29, %v3774_v22  ;;  %v8747_v25 = vsel %vm10411_vm0, %v3774_v22, %v3758_v29  ;;  %vm10421_vm2 = vcmp.lt.s32.totalorder %v10297_v51, 112 }
 0x760   : > { %vm10423_vm0 = vmmov %vm10421_vm2 }
 0x763   : > { %4499 = vrot.lane.b32.xlu1 %v8523_v28, %s5639_s22  ;;  %4485 = vrot.lane.b32.xlu2 %v8571_v13, %s5639_s22 }
 0x764   : > { %4091 = vrot.lane.b32.xlu0 %v8701_v11, %s5636_s19 }
 0x765   : > { %v4258_v56 = vpop.permute.xlu1 %4257  ;;  %v4102_v62 = vpop.permute.xlu2 %4101 }
 0x766   : > { %v8757_v31 = vsel %vm10412_vm3, %v4258_v56, %v4274_v52  ;;  %v8761_v61 = vsel %vm10414_vm13, %v4274_v52, %v4258_v56  ;;  %v3839_v39 = vpop.permute.xlu0 %3838  ;;  %vm10425_vm3 = vcmp.lt.s32.totalorder %v10297_v51, 16 }
 0x767   : > { %10413 = vst [vmem:[#allocation38_spill] sm:$0xff] %v8757_v31  ;;  %vm10426_vm13 = vmmov %vm10425_vm3 }
 0x768   : > { %10415 = vst [vmem:[#allocation39_spill] sm:$0xff] %v8761_v61 }
 0x76b   : > { %3777 = vrot.lane.b32.xlu1 %v8595_v2, %s5633_s16  ;;  %3779 = vrot.lane.b32.xlu2 %v8725_v19, %s5633_s16 }
 0x76c   : > { %4265 = vrot.lane.b32.xlu0 %v8701_v11, %s5637_s20 }
 0x76d   : > { %v4369_v40 = vpop.permute.xlu1 %4368  ;;  %v4276_v8 = vpop.permute.xlu2 %4275 }
 0x76e   : > { %v8771_v41 = vsel %vm10416_vm12, %v4369_v40, %v4385_v57  ;;  %v8775_v52 = vsel %vm10418_vm9, %v4385_v57, %v4369_v40  ;;  %v4086_v63 = vpop.permute.xlu0 %4085  ;;  %vm10427_vm12 = vcmp.lt.s32.totalorder %v10297_v51, 15 }
 0x76f   : > { %10417 = vst [vmem:[#allocation40_spill] sm:$0xff] %v8771_v41  ;;  %v8779_v21 = vsel %vm10408_vm6, %v4086_v63, %v4102_v62  ;;  %v8783_v4 = vsel %vm10420_vm10, %v4102_v62, %v4086_v63  ;;  %vm10429_vm9 = vmmov %vm10427_vm12 }
 0x770   : > { %10419 = vst [vmem:[#allocation41_spill] sm:$0xff] %v8775_v52  ;;  %vm10431_vm6 = vmmov %vm10429_vm9 }
 0x771   : > { %vm10433_vm10 = vmmov %vm10431_vm6 }
 0x773   : > { %3978 = vrot.lane.b32.xlu1 %v8571_v13, %s5635_s18  ;;  %3980 = vrot.lane.b32.xlu2 %v8701_v11, %s5635_s18 }
 0x774   : > { %4376 = vrot.lane.b32.xlu0 %v8701_v11, %s5638_s21 }
 0x775   : > { %v4496_v57 = vpop.permute.xlu1 %4495  ;;  %v4387_v14 = vpop.permute.xlu2 %4386 }
 0x776   : > { %v8793_v46 = vsel %vm10421_vm2, %v4480_v30, %v4496_v57  ;;  %v8797_v10 = vsel %vm10423_vm0, %v4496_v57, %v4480_v30  ;;  %v4482_v7 = vpop.permute.xlu0 %4481  ;;  %vm10436_vm2 = vcmp.lt.s32.totalorder %v10297_v51, 127 }
 0x777   : > { %10422 = vst [vmem:[#allocation57_spill] sm:$0xff] %v8793_v46  ;;  %vm10437_vm0 = vmmov %vm10436_vm2 }
 0x778   : > { %10424 = vst [vmem:[#allocation58_spill] sm:$0xff] %v8797_v10 }
 0x77b   : > { %4390 = vrot.lane.b32.xlu1 %v8595_v2, %s5638_s21  ;;  %4107 = vrot.lane.b32.xlu2 %v8725_v19, %s5636_s19 }
 0x77c   : > { %4503 = vrot.lane.b32.xlu0 %v8725_v19, %s5639_s22 }
 0x77d   : > { %v3823_v33 = vpop.permute.xlu1 %3822  ;;  %v3825_v22 = vpop.permute.xlu2 %3824 }
 0x77e   : > { %v8807_v38 = vsel %vm10425_vm3, %v3823_v33, %v3839_v39  ;;  %v8811_v30 = vsel %vm10426_vm13, %v3839_v39, %v3823_v33  ;;  %v3776_v53 = vpop.permute.xlu0 %3775  ;;  %v8836_v33 = vmax.f32 %v8429_v60, 0.0  ;;  %vm10439_vm3 = vcmp.lt.s32.totalorder %v10297_v51, 113 }
 0x77f   : > { %vm10441_vm13 = vmmov %vm10439_vm3 }
 0x780   : > { %10435 = vst [vmem:[#allocation52_spill] sm:$0xff] %v8836_v33 }
 0x783   : > { %3828 = vrot.lane.b32.xlu1 %v8701_v11, %s5634_s17  ;;  %4487 = vrot.lane.b32.xlu2 %v8701_v11, %s5639_s22 }
 0x784   : > { %4614 = vrot.lane.b32.xlu0 %v8725_v19, %s5640_s23 }
 0x785   : > { %v3991_v29 = vpop.permute.xlu1 %3990  ;;  %v3993_v56 = vpop.permute.xlu2 %3992 }
 0x786   : > { %v8821_v62 = vsel %vm10427_vm12, %v3975_v15, %v3991_v29  ;;  %v8825_v39 = vsel %vm10429_vm9, %v3991_v29, %v3975_v15  ;;  %v3977_v40 = vpop.permute.xlu0 %3976  ;;  %vm10443_vm12 = vcmp.lt.s32.totalorder %v10297_v51, 112 }
 0x787   : > { %10428 = vst [vmem:[#allocation47_spill] sm:$0xff] %v8821_v62  ;;  %v8829_v63 = vsel %vm10431_vm6, %v3977_v40, %v3993_v56  ;;  %v8833_v57 = vsel %vm10433_vm10, %v3993_v56, %v3977_v40  ;;  %v8857_v40 = vmax.f32 %v8427_v6, 0.0  ;;  %vm10445_vm9 = vmmov %vm10443_vm12  ;;  %vm10447_vm6 = vcmp.lt.s32.totalorder %v10297_v51, 17 }
 0x788   : > { %10430 = vst [vmem:[#allocation48_spill] sm:$0xff] %v8825_v39  ;;  %vm10448_vm10 = vmmov %vm10447_vm6 }
 0x789   : > { %10432 = vst [vmem:[#allocation26_spill] sm:$0xff] %v8829_v63 }
 0x78a   : > { %10434 = vst [vmem:[#allocation51_spill] sm:$0xff] %v8833_v57 }
 0x78b   : > { %3996 = vrot.lane.b32.xlu1 %v8725_v19, %s5635_s18  ;;  %4598 = vrot.lane.b32.xlu2 %v8701_v11, %s5640_s23  ;;  %10438 = vst [vmem:[#allocation65_spill] sm:$0xff] %v8857_v40 }
 0x78c   : > { %3781 = vrot.lane.b32.xlu0 %v8836_v33, %s5633_s16 }
 0x78d   : > { %v4260_v15 = vpop.permute.xlu1 %4259  ;;  %v8844_v29 = vpop.permute.xlu2 %4277 }
 0x78e   : > { %v8848_v45 = vsel %vm10436_vm2, %v4260_v15, %v4276_v8  ;;  %v8852_v60 = vsel %vm10437_vm0, %v4276_v8, %v4260_v15  ;;  %v8854_v56 = vpop.permute.xlu0 %4483  ;;  %vm10449_vm2 = vcmp.lt.s32.totalorder %v10297_v51, 16 }
 0x78f   : > { %vm10450_vm0 = vmmov %vm10449_vm2 }
 0x793   : > { %4281 = vrot.lane.b32.xlu1 %v8725_v19, %s5637_s20  ;;  %3830 = vrot.lane.b32.xlu2 %v8857_v40, %s5634_s17 }
 0x794   : > { %3982 = vrot.lane.b32.xlu0 %v8857_v40, %s5635_s18 }
 0x795   : > { %v4371_v42 = vpop.permute.xlu1 %4370  ;;  %v8865_v52 = vpop.permute.xlu2 %4388 }
 0x796   : > { %v8869_v8 = vsel %vm10439_vm3, %v4371_v42, %v4387_v14  ;;  %v8873_v6 = vsel %vm10441_vm13, %v4387_v14, %v4371_v42  ;;  %v3827_v15 = vpop.permute.xlu0 %3826  ;;  %vm10451_vm3 = vmmov %vm10450_vm0 }
 0x797   : > { %10440 = vst [vmem:[#allocation66_spill] sm:$0xff] %v8869_v8  ;;  %vm10452_vm13 = vmmov %vm10450_vm0 }
 0x798   : > { %10442 = vst [vmem:[#allocation59_spill] sm:$0xff] %v8873_v6 }
 0x79b   : > { %4392 = vrot.lane.b32.xlu1 %v8725_v19, %s5638_s21  ;;  %3998 = vrot.lane.b32.xlu2 %v8836_v33, %s5635_s18 }
 0x79c   : > { %4378 = vrot.lane.b32.xlu0 %v8857_v40, %s5638_s21 }
 0x79d   : > { %v4498_v41 = vpop.permute.xlu1 %4497  ;;  %v8881_v43 = vpop.permute.xlu2 %3761 }
 0x79e   : > { %v8885_v8 = vsel %vm10443_vm12, %v4482_v7, %v4498_v41  ;;  %v8889_v42 = vsel %vm10445_vm9, %v4498_v41, %v4482_v7  ;;  %v8891_v14 = vpop.permute.xlu0 %3994  ;;  %vm10453_vm12 = vcmp.lt.s32.totalorder %v10297_v51, 1 }
 0x79f   : > { %10444 = vst [vmem:[#allocation60_spill] sm:$0xff] %v8885_v8  ;;  %vm10454_vm9 = vmmov %vm10453_vm12 }
 0x7a0   : > { %10446 = vst [vmem:[#allocation30_spill] sm:$0xff] %v8889_v42 }
 0x7a3   : > { %3765 = vrot.lane.b32.xlu1 %v8857_v40, %s5633_s16  ;;  %4283 = vrot.lane.b32.xlu2 %v8836_v33, %s5637_s20 }
 0x7a4   : > { %4505 = vrot.lane.b32.xlu0 %v8836_v33, %s5639_s22 }
 0x7a5   : > { %v3760_v6 = vpop.permute.xlu1 %3759  ;;  %v3843_v10 = vpop.permute.xlu2 %3842 }
 0x7a6   : > { %v8901_v46 = vsel %vm10447_vm6, %v3760_v6, %v3776_v53  ;;  %v8905_v41 = vsel %vm10448_vm10, %v3776_v53, %v3760_v6  ;;  %v4106_v7 = vpop.permute.xlu0 %4105  ;;  %v8909_v19 = vsel %vm10449_vm2, %v3827_v15, %v3843_v10  ;;  %v8913_v11 = vsel %vm10450_vm0, %v3843_v10, %v3827_v15  ;;  %vm10458_vm2 = vmmov %vm10454_vm9 }
 0x7a7   : > { %vm10456_vm6 = vcmp.lt.s32.totalorder %v10297_v51, 127  ;;  %vm10459_vm0 = vmmov %vm10458_vm2 }
 0x7a8   : > { %vm10457_vm10 = vmmov %vm10456_vm6 }
 0x7ab   : > { %4489 = vrot.lane.b32.xlu2 %v8857_v40, %s5639_s22  ;;  %3846 = vrot.lane.b32.xlu1 %v8836_v33, %s5634_s17 }
 0x7ac   : > { %4616 = vrot.lane.b32.xlu0 %v8836_v33, %s5640_s23 }
 0x7ad   : > { %v3841_v53 = vpop.permute.xlu1 %3840  ;;  %v4090_v6 = vpop.permute.xlu2 %4089 }
 0x7ae   : > { %v8923_v42 = vsel %vm10451_vm3, %v3825_v22, %v3841_v53  ;;  %v8927_v8 = vsel %vm10452_vm13, %v3841_v53, %v3825_v22  ;;  %v4280_v10 = vpop.permute.xlu0 %4279  ;;  %v8931_v15 = vsel %vm10453_vm12, %v4090_v6, %v4106_v7  ;;  %v8935_v16 = vsel %vm10454_vm9, %v4106_v7, %v4090_v6  ;;  %vm10465_vm12 = vmmov %vm10456_vm6 }
 0x7af   : > { %vm10460_vm3 = vcmp.lt.s32.totalorder %v10297_v51, 112  ;;  %vm10466_vm9 = vmmov %vm10456_vm6 }
 0x7b0   : > { %vm10462_vm13 = vmmov %vm10460_vm3 }
 0x7b3   : > { %4600 = vrot.lane.b32.xlu2 %v8857_v40, %s5640_s23  ;;  %4093 = vrot.lane.b32.xlu1 %v8857_v40, %s5636_s19 }
 0x7b4   : > { %3832 = vrot.lane.b32.xlu0 %v8938_v32, %s5634_s17 }
 0x7b5   : > { %v4088_v22 = vpop.permute.xlu1 %4087  ;;  %v4264_v53 = vpop.permute.xlu2 %4263 }
 0x7b6   : > { %v8946_v36 = vpop.permute.xlu0 %4374  ;;  %v8950_v7 = vsel %vm10456_vm6, %v4264_v53, %v4280_v10  ;;  %v8954_v49 = vsel %vm10457_vm10, %v4280_v10, %v4264_v53  ;;  %vm10467_vm6 = vcmp.lt.s32.totalorder %v10297_v51, 17 }
 0x7b7   : > { %vm10468_vm10 = vmmov %vm10467_vm6 }
 0x7bb   : > { %3767 = vrot.lane.b32.xlu2 %v8938_v32, %s5633_s16  ;;  %4109 = vrot.lane.b32.xlu1 %v8836_v33, %s5636_s19 }
 0x7bc   : > { %4612 = vrot.lane.b32.xlu0 %v8595_v2, %s5640_s23  ;;  %v8979_v2 = vmax.f32 %v8466_v3, 0.0 }
 0x7bd   : > { %v4104_v6 = vpop.permute.xlu1 %4103  ;;  %v4486_v50 = vpop.permute.xlu2 %4485 }
 0x7be   : > { %v8964_v62 = vsel %vm10458_vm2, %v4088_v22, %v4104_v6  ;;  %v8968_v39 = vsel %vm10459_vm0, %v4104_v6, %v4088_v22  ;;  %v4502_v10 = vpop.permute.xlu0 %4501  ;;  %10464 = vst [vmem:[#allocation55_spill] sm:$0xff] %v8979_v2  ;;  %vm10469_vm2 = vcmp.lt.s32.totalorder %v10297_v51, 113 }
 0x7bf   : > { %v8972_v53 = vsel %vm10460_vm3, %v4486_v50, %v4502_v10  ;;  %v8976_v63 = vsel %vm10462_vm13, %v4502_v10, %v4486_v50  ;;  %vm10471_vm0 = vmmov %vm10469_vm2 }
 0x7c0   : > { %10461 = vst [vmem:[#allocation42_spill] sm:$0xff] %v8972_v53  ;;  %vm10474_vm13 = vmmov %vm10460_vm3 }
 0x7c1   : > { %10463 = vst [vmem:[#allocation43_spill] sm:$0xff] %v8976_v63 }
 0x7c3   : > { %4267 = vrot.lane.b32.xlu1 %v8857_v40, %s5637_s20  ;;  %3848 = vrot.lane.b32.xlu2 %v8979_v2, %s5634_s17 }
 0x7c4   : > { %4000 = vrot.lane.b32.xlu0 %v8979_v2, %s5635_s18 }
 0x7c5   : > { %v4262_v22 = vpop.permute.xlu1 %4261  ;;  %v3780_v6 = vpop.permute.xlu2 %3779 }
 0x7c6   : > { %v8990_v53 = vsel %vm10465_vm12, %v4262_v22, %v8844_v29  ;;  %v8995_v3 = vsel %vm10466_vm9, %v8844_v29, %v4262_v22  ;;  %v3764_v50 = vpop.permute.xlu0 %3763  ;;  %vm10476_vm12 = vcmp.lt.s32.totalorder %v10297_v51, 1 }
 0x7c7   : > { %v8999_v10 = vsel %vm10467_vm6, %v3764_v50, %v3780_v6  ;;  %v9003_v40 = vsel %vm10468_vm10, %v3780_v6, %v3764_v50  ;;  %vm10477_vm9 = vmmov %vm10476_vm12 }
 0x7c8   : > { %vm10478_vm10 = vmmov %vm10467_vm6 }
 0x7cb   : > { %4394 = vrot.lane.b32.xlu1 %v8836_v33, %s5638_s21  ;;  %4596 = vrot.lane.b32.xlu2 %v8571_v13, %s5640_s23 }
 0x7cc   : > { %4111 = vrot.lane.b32.xlu0 %v8979_v2, %s5636_s19 }
 0x7cd   : > { %v4373_v29 = vpop.permute.xlu1 %4372  ;;  %v3981_v22 = vpop.permute.xlu2 %3980 }
 0x7ce   : > { %v9014_v63 = vsel %vm10469_vm2, %v4373_v29, %v8865_v52  ;;  %v9019_v6 = vsel %vm10471_vm0, %v8865_v52, %v4373_v29  ;;  %v9021_v50 = vpop.permute.xlu0 %3844  ;;  %vm10479_vm2 = vcmp.lt.s32.totalorder %v10297_v51, 15 }
 0x7cf   : > { %10470 = vst [vmem:[#allocation56_spill] sm:$0xff] %v9014_v63  ;;  %vm10481_vm0 = vmmov %vm10479_vm2 }
 0x7d0   : > { %10472 = vst [vmem:[#allocation61_spill] sm:$0xff] %v9019_v6 }
 0x7d3   : > { %4095 = vrot.lane.b32.xlu2 %v8938_v32, %s5636_s19  ;;  %3783 = vrot.lane.b32.xlu1 %v8979_v2, %s5633_s16 }
 0x7d4   : > { %4285 = vrot.lane.b32.xlu0 %v8979_v2, %s5637_s20 }
 0x7d5   : > { %v4500_v13 = vpop.permute.xlu1 %4499  ;;  %v4108_v33 = vpop.permute.xlu2 %4107 }
 0x7d6   : > { %v9032_v63 = vsel %vm10460_vm3, %v8854_v56, %v4500_v13  ;;  %v9037_v52 = vsel %vm10474_vm13, %v4500_v13, %v8854_v56  ;;  %v4092_v29 = vpop.permute.xlu0 %4091  ;;  %vm10483_vm3 = vcmp.lt.s32.totalorder %v10297_v51, 113 }
 0x7d7   : > { %10473 = vst [vmem:[#allocation62_spill] sm:$0xff] %v9032_v63  ;;  %v9041_v6 = vsel %vm10476_vm12, %v4092_v29, %v4108_v33  ;;  %v9045_v57 = vsel %vm10477_vm9, %v4108_v33, %v4092_v29  ;;  %vm10485_vm13 = vmmov %vm10483_vm3  ;;  %vm10487_vm12 = vcmp.lt.s32.totalorder %v10297_v51, 112 }
 0x7d8   : > { %10475 = vst [vmem:[#allocation2_spill] sm:$0xff] %v9037_v52  ;;  %vm10489_vm9 = vmmov %vm10487_vm12 }
 0x7db   : > { %4269 = vrot.lane.b32.xlu2 %v8938_v32, %s5637_s20  ;;  %3984 = vrot.lane.b32.xlu1 %v8938_v32, %s5635_s18  ;;  %s334_s20 = scalar_lea.vmem %s9754_s9, %s4778_s12 }
 0x7dc   : > { %4380 = vrot.lane.b32.xlu0 %v8938_v32, %s5638_s21 }
 0x7dd   : > { %v3778_v13 = vpop.permute.xlu1 %3777  ;;  %v4488_v56 = vpop.permute.xlu2 %4487 }
 0x7de   : > { %v9056_v52 = vsel %vm10467_vm6, %v8881_v43, %v3778_v13  ;;  %v9061_v33 = vsel %vm10478_vm10, %v3778_v13, %v8881_v43  ;;  %v4266_v29 = vpop.permute.xlu0 %4265  ;;  %vm10491_vm6 = vcmp.lt.s32.totalorder %v10297_v51, 111 }
 0x7df   : > { %vm10493_vm10 = vmmov %vm10491_vm6 }
 0x7e3   : > { %4610 = vrot.lane.b32.xlu2 %v8523_v28, %s5640_s23  ;;  %4493 = vrot.lane.b32.xlu1 %v8317_v55, %s5639_s22 }
 0x7e4   : > { %4507 = vrot.lane.b32.xlu0 %v8979_v2, %s5639_s22 }
 0x7e5   : > { %v3979_v63 = vpop.permute.xlu1 %3978  ;;  %v4599_v59 = vpop.permute.xlu2 %4598 }
 0x7e6   : > { %v9072_v35 = vsel %vm10479_vm2, %v3979_v63, %v8891_v14  ;;  %v9077_v43 = vsel %vm10481_vm0, %v8891_v14, %v3979_v63  ;;  %v4377_v13 = vpop.permute.xlu0 %4376  ;;  %vm10495_vm2 = vmmov %vm10481_vm0 }
 0x7e7   : > { %10480 = vst [vmem:[#allocation5_spill] sm:$0xff] %v9072_v35 }
 0x7e8   : > { %10482 = vst [vmem:[#allocation6_spill] sm:$0xff] %v9077_v43 }
 0x7eb   : > { %4491 = vrot.lane.b32.xlu2 %v8938_v32, %s5639_s22  ;;  %4396 = vrot.lane.b32.xlu1 %v8979_v2, %s5638_s21 }
 0x7ec   : > { %4618 = vrot.lane.b32.xlu0 %v8979_v2, %s5640_s23 }
 0x7ed   : > { %v4391_v28 = vpop.permute.xlu1 %4390  ;;  %v3831_v61 = vpop.permute.xlu2 %3830 }
 0x7ee   : > { %v9088_v35 = vsel %vm10483_vm3, %v8946_v36, %v4391_v28  ;;  %v9093_v63 = vsel %vm10485_vm13, %v4391_v28, %v8946_v36  ;;  %v4504_v14 = vpop.permute.xlu0 %4503  ;;  %vm10498_vm3 = vcmp.lt.s32.totalorder %v10297_v51, 127 }
 0x7ef   : > { %10484 = vst [vmem:[#allocation3_spill] sm:$0xff] %v9088_v35  ;;  %v9097_v43 = vsel %vm10487_vm12, %v4488_v56, %v4504_v14  ;;  %v9101_v2 = vsel %vm10489_vm9, %v4504_v14, %v4488_v56  ;;  %vm10499_vm13 = vmmov %vm10498_vm3 }
 0x7f0   : > { %10486 = vst [vmem:[#allocation4_spill] sm:$0xff] %v9093_v63  ;;  %vm10500_vm12 = vmmov %vm10481_vm0 }
 0x7f1   : > { %10488 = vst [vmem:[#allocation69_spill] sm:$0xff] %v9097_v43  ;;  %vm10501_vm9 = vmmov %vm10481_vm0 }
 0x7f2   : > { %10490 = vst [vmem:[#allocation70_spill] sm:$0xff] %v9101_v2 }
 0x7f3   : > { %4602 = vrot.lane.b32.xlu2 %v8938_v32, %s5640_s23  ;;  %4594 = vrot.lane.b32.xlu1 %v8539_v26, %s5640_s23 }
 0x7f4   : > { %4592 = vrot.lane.b32.xlu0 %v8472_v27, %s5640_s23 }
 0x7f5   : > { %v3829_v28 = vpop.permute.xlu1 %3828  ;;  %v3999_v36 = vpop.permute.xlu2 %3998 }
 0x7f6   : > { %v4615_v63 = vpop.permute.xlu0 %4614 }
 0x7f7   : > { %v9111_v35 = vsel %vm10491_vm6, %v4599_v59, %v4615_v63  ;;  %v9115_v56 = vsel %vm10493_vm10, %v4615_v63, %v4599_v59  ;;  %vm10502_vm6 = vcmp.lt.s32.totalorder %v10297_v51, 113 }
 0x7f8   : > { %10492 = vst [vmem:[#allocation71_spill] sm:$0xff] %v9111_v35  ;;  %vm10504_vm10 = vmmov %vm10502_vm6 }
 0x7f9   : > { %10494 = vst [vmem:[#allocation72_spill] sm:$0xff] %v9115_v56  ;;  %v4699_v56 = vld [vmem:[%s9753_s8] sm:$0x7] }
 0x7fb   : > { %4590 = vrot.lane.b32.xlu2 %v8374_v17, %s5640_s23  ;;  %4608 = vrot.lane.b32.xlu1 %v8487_v5, %s5640_s23 }
 0x7fc   : > { %4606 = vrot.lane.b32.xlu0 %v8399_v12, %s5640_s23 }
 0x7fd   : > { %v3997_v14 = vpop.permute.xlu1 %3996  ;;  %v9123_v27 = vpop.permute.xlu2 %4283 }
 0x7fe   : > { %v9127_v26 = vsel %vm10495_vm2, %v3981_v22, %v3997_v14  ;;  %v9131_v59 = vsel %vm10481_vm0, %v3997_v14, %v3981_v22  ;;  %v9133_v63 = vpop.permute.xlu0 %3781  ;;  %vm10507_vm2 = vcmp.lt.s32.totalorder %v10297_v51, 112 }
 0x7ff   : > { %10496 = vst [vmem:[#allocation73_spill] sm:$0xff] %v9127_v26  ;;  %vm10509_vm0 = vmmov %vm10507_vm2 }
 0x800   : > { %10497 = vst [vmem:[#allocation74_spill] sm:$0xff] %v9131_v59 }
 0x803   : > { %4604 = vrot.lane.b32.xlu2 %v8317_v55, %s5640_s23  ;;  %4588 = vrot.lane.b32.xlu1 %v8315_v23, %s5640_s23 }
 0x804   : > { %4702 = vperm.xlu0 %5464, %v4699_v56  }
 0x805   : > { %v4282_v35 = vpop.permute.xlu1 %4281  ;;  %v4490_v14 = vpop.permute.xlu2 %4489 }
 0x806   : > { %v9144_v12 = vsel %vm10498_vm3, %v4266_v29, %v4282_v35  ;;  %v9148_v22 = vsel %vm10499_vm13, %v4282_v35, %v4266_v29  ;;  %v3983_v17 = vpop.permute.xlu0 %3982  ;;  %vm10511_vm3 = vcmp.lt.s32.totalorder %v10297_v51, 111 }
 0x807   : > { %v9152_v5 = vsel %vm10500_vm12, %v3983_v17, %v3999_v36  ;;  %v9156_v55 = vsel %vm10501_vm9, %v3999_v36, %v3983_v17  ;;  %vm10513_vm13 = vmmov %vm10511_vm3  ;;  %vm10514_vm12 = vcmp.lt.s32.totalorder %v10297_v51, 16 }
 0x808   : > { %vm10515_vm9 = vmmov %vm10514_vm12 }
 0x80d   : > { %v4393_v56 = vpop.permute.xlu1 %4392  ;;  %v4601_v29 = vpop.permute.xlu2 %4600 }
 0x80e   : > { %v9160_v23 = vsel %vm10502_vm6, %v4377_v13, %v4393_v56  ;;  %v9164_v32 = vsel %vm10504_vm10, %v4393_v56, %v4377_v13  ;;  %v9166_v35 = vpop.permute.xlu0 %4378  ;;  %vm10518_vm6 = vmmov %vm10515_vm9 }
 0x80f   : > { %10503 = vst [vmem:[#allocation75_spill] sm:$0xff] %v9160_v23  ;;  %vm10519_vm10 = vmmov %vm10518_vm6 }
 0x810   : > { %10505 = vst [vmem:[#allocation76_spill] sm:$0xff] %v9164_v32 }
 0x811   : > { %10506 = vst [vmem:[#allocation77_spill] sm:$0xff] %v9166_v35 }
 0x815   : > { %v9168_v2 = vpop.permute.xlu1 %3765  ;;  %v3768_v36 = vpop.permute.xlu2 %3767 }
 0x816   : > { %v4506_v43 = vpop.permute.xlu0 %4505 }
 0x817   : > { %v9172_v31 = vsel %vm10507_vm2, %v4490_v14, %v4506_v43  ;;  %v9176_v17 = vsel %vm10509_vm0, %v4506_v43, %v4490_v14  ;;  %vm10520_vm2 = vmmov %vm10518_vm6  ;;  %v10534_v14 = vld [vmem:[#allocation10_spill] sm:$0xff] }
 0x818   : > { %10508 = vst [vmem:[#allocation78_spill] sm:$0xff] %v9172_v31  ;;  %vm10521_vm0 = vmmov %vm10520_vm2 }
 0x819   : > { %10510 = vst [vmem:[#allocation79_spill] sm:$0xff] %v9176_v17 }
 0x81d   : > { %v3847_v23 = vpop.permute.xlu1 %3846  ;;  %v3849_v32 = vpop.permute.xlu2 %3848 }
 0x81e   : > { %v4617_v26 = vpop.permute.xlu0 %4616 }
 0x81f   : > { %v9180_v13 = vsel %vm10511_vm3, %v4601_v29, %v4617_v26  ;;  %v9184_v56 = vsel %vm10513_vm13, %v4617_v26, %v4601_v29  ;;  %v3864_v26 = vsel %vm10519_vm10, %v3847_v23, %v3831_v61  ;;  %vm10522_vm13 = vmmov %vm10511_vm3  ;;  %v10585_v29 = vld [vmem:[#allocation14_spill] sm:$0xff] }
 0x820   : > { %10512 = vst [vmem:[#allocation80_spill] sm:$0xff] %v9180_v13  ;;  %v3856_v13 = vsel %vm10518_vm6, %v3831_v61, %v3847_v23  ;;  %vm10525_vm6 = vcmp.lt.s32.totalorder %v10297_v51, 1 }
 0x821   : > { %vm10526_vm10 = vmmov %vm10525_vm6 }
 0x825   : > { %v4094_v35 = vpop.permute.xlu1 %4093  ;;  %v4597_v61 = vpop.permute.xlu2 %4596 }
 0x826   : > { %v3833_v59 = vpop.permute.xlu0 %3832 }
 0x827   : > { %v3857_v31 = vsel %vm10514_vm12, %v3833_v59, %v3849_v32  ;;  %v3865_v43 = vsel %vm10515_vm9, %v3849_v32, %v3833_v59  ;;  %v3855_v32 = vsel %vm10520_vm2, %v3829_v28, %v9021_v50  ;;  %vm10523_vm12 = vcmask 523264  }
 0x828   : > { %5272 = vmatpush.msk.msrb.mxu0 %vm5755_vm5, %v3865_v43  ;;  %5281 = vmatpush.msk.msrb.mxu1 %vm5761_vm8, %v3857_v31  ;;  %v3863_v31 = vsel %vm10521_vm0, %v9021_v50, %v3829_v28  ;;  %vm10524_vm9 = vmmov %vm10523_vm12  ;;  %vm10531_vm2 = vcmp.lt.s32.totalorder %v10297_v51, 17 }
 0x829   : > { %vm10532_vm0 = vmmov %vm10531_vm2 }
 0x82a   : > { %5273 = vmatpush.msk.msrb.mxu0 %vm5755_vm5, %v3864_v26  ;;  %5282 = vmatpush.msk.msrb.mxu1 %vm5761_vm8, %v3856_v13  ;;  %v10570_v26 = vld [vmem:[#allocation47_spill] sm:$0xff] }
 0x82c   : > { %5274 = vmatpush.msk.msrb.mxu0 %vm5755_vm5, %v3863_v31  ;;  %5283 = vmatpush.msk.msrb.mxu1 %vm5761_vm8, %v3855_v32  ;;  %v10571_v32 = vld [vmem:[#allocation69_spill] sm:$0xff]  ;;  %v10572_v31 = vld [vmem:[#allocation70_spill] sm:$0xff] }
 0x82d   : > { %v4110_v23 = vpop.permute.xlu1 %4109 }
 0x82e   : > { %v4613_v59 = vpop.permute.xlu0 %4612  ;;  %5275 = vmatpush.msk.msrb.mxu0 %vm5755_vm5, %v8913_v11  ;;  %5284 = vmatpush.msk.msrb.mxu1 %vm5761_vm8, %v8909_v19  ;;  %v5271_v11 = vld [vmem:[%s9752_s7 + $0x4] sm:$0x7] }
 0x82f   : > { %v9220_v50 = vsel %vm10511_vm3, %v4597_v61, %v4613_v59  ;;  %v9224_v28 = vsel %vm10522_vm13, %v4613_v59, %v4597_v61  ;;  %vm10535_vm3 = vnez %v10534_v14  ;;  %vm10536_vm13 = vmmov %vm10532_vm0  ;;  %v10573_v61 = vld [vmem:[#allocation67_spill] sm:$0xff]  ;;  %v10574_v59 = vld [vmem:[#allocation50_spill] sm:$0xff] }
 0x830   : > { %5276 = vmatpush.msk.msrb.mxu0 %vm5755_vm5, %v8927_v8  ;;  %5285 = vmatpush.msk.msrb.mxu1 %vm5761_vm8, %v8923_v42  ;;  %v10593_v14 = vld [vmem:[#allocation49_spill] sm:$0xff] }
 0x832   : > { %5277 = vmatpush.msk.msrb.mxu0 %vm5755_vm5, %v8811_v30  ;;  %5286 = vmatpush.msk.msrb.mxu1 %vm5761_vm8, %v8807_v38 }
 0x834   : > { %5278 = vmatpush.msk.msrb.mxu0 %vm5755_vm5, %v8669_v34  ;;  %5287 = vmatpush.msk.msrb.mxu1 %vm5761_vm8, %v8665_v37  ;;  %v4096_v34 = vpop.permute.xlu2 %4095 }
 0x835   : > { %v4268_v19 = vpop.permute.xlu1 %4267 }
 0x836   : > { %v9247_v8 = vpop.permute.xlu0 %4000  ;;  %5279 = vmatpush.msk.msrb.mxu0 %vm5755_vm5, %v8609_v1  ;;  %5288 = vmatpush.msk.msrb.mxu1 %vm5761_vm8, %v8605_v20  ;;  %vm10529_vm5 = vmmov %vm10525_vm6  ;;  %v10587_v1 = vld [vmem:[#allocation62_spill] sm:$0xff] }
 0x837   : > { %5280 = vmatmul.msk.f32.vlgmr.msrb.gmra.mxu0 %vm10523_vm12, %v5271_v11  ;;  %5289 = vmatmul.msk.f32.vlgmr.msrb.gmra.mxu1 %vm10524_vm9, %v5271_v11  ;;  %v4119_v20 = vsel %vm10529_vm5, %v4094_v35, %v4110_v23  ;;  %vm10530_vm8 = vmmov %vm10529_vm5  ;;  %vm10538_vm9 = vcmp.lt.s32.totalorder %v10297_v51, 127  ;;  %v10575_v11 = vld [vmem:[#allocation42_spill] sm:$0xff] }
 0x838   : > { %v4127_v17 = vsel %vm10530_vm8, %v4110_v23, %v4094_v35  ;;  %vm10537_vm12 = vmmov %vm10532_vm0  ;;  %v3817_v23 = vld [vmem:[%s9752_s7] sm:$0x7] }
 0x83d   : > { %v9257_v37 = vpop.permute.xlu1 %4394 }
 0x83e   : > { %v4112_v38 = vpop.permute.xlu0 %4111 }
 0x83f   : > { %v4120_v30 = vsel %vm10525_vm6, %v4096_v34, %v4112_v38  ;;  %v4128_v42 = vsel %vm10526_vm10, %v4112_v38, %v4096_v34  ;;  %vm10539_vm6 = vmmov %vm10538_vm9  ;;  %v10579_v34 = vld [vmem:[#allocation45_spill] sm:$0xff] }
 0x840   : > { %5328 = vmatpush.msk.msra.mxu2 %vm10058_vm1, %v4128_v42  ;;  %5337 = vmatpush.msk.msra.mxu3 %vm10060_vm15, %v4120_v30  ;;  %vm10543_vm5 = vmmov %vm10539_vm6  ;;  %v10581_v38 = vld [vmem:[#allocation29_spill] sm:$0xff]  ;;  %v10584_v42 = vld [vmem:[#allocation55_spill] sm:$0xff] }
 0x841   : > { %vm10544_vm8 = vmmov %vm10543_vm5  ;;  %v10582_v30 = vld [vmem:[#allocation13_spill] sm:$0xff] }
 0x842   : > { %5329 = vmatpush.msk.msra.mxu2 %vm10058_vm1, %v4127_v17  ;;  %5338 = vmatpush.msk.msra.mxu3 %vm10060_vm15, %v4119_v20  ;;  %v10588_v20 = vld [vmem:[#allocation2_spill] sm:$0xff] }
 0x844   : > { %5330 = vmatpush.msk.msra.mxu2 %vm10058_vm1, %v9045_v57  ;;  %5339 = vmatpush.msk.msra.mxu3 %vm10060_vm15, %v9041_v6  ;;  %v10592_v57 = vld [vmem:[#allocation30_spill] sm:$0xff] }
 0x845   : > { %v3784_v13 = vpop.permute.xlu1 %3783 }
 0x846   : > { %5331 = vmatpush.msk.msra.mxu2 %vm10058_vm1, %v8935_v16  ;;  %5340 = vmatpush.msk.msra.mxu3 %vm10060_vm15, %v8931_v15  ;;  %v3792_v35 = vsel %vm10531_vm2, %v3768_v36, %v3784_v13  ;;  %v3800_v43 = vsel %vm10532_vm0, %v3784_v13, %v3768_v36  ;;  %v3791_v16 = vsel %vm10536_vm13, %v9168_v2, %v9133_v63  ;;  %v4286_v6 = vpop.permute.xlu0 %4285  ;;  %v4270_v36 = vpop.permute.xlu2 %4269  ;;  %vm10561_vm13 = vcmask 523264   ;;  %v10589_v13 = vld [vmem:[#allocation65_spill] sm:$0xff] }
 0x847   : > { %5290 = vmatpush.msk.msra.mxu0 %vm10048_vm14, %v3800_v43  ;;  %5299 = vmatpush.msk.msra.mxu1 %vm10535_vm3, %v3792_v35  ;;  %v3799_v15 = vsel %vm10537_vm12, %v9133_v63, %v9168_v2  ;;  %v4294_v2 = vsel %vm10538_vm9, %v4270_v36, %v4286_v6  ;;  %vm10562_vm12 = vmmov %vm10561_vm13  ;;  %v10568_v63 = vld [vmem:[#allocation79_spill] sm:$0xff]  ;;  %v10590_v35 = vld [vmem:[#allocation52_spill] sm:$0xff] }
 0x848   : > { %5332 = vmatpush.msk.msra.mxu2 %vm10058_vm1, %v8968_v39  ;;  %5341 = vmatpush.msk.msra.mxu3 %vm10060_vm15, %v8964_v62  ;;  %v4301_v62 = vsel %vm10544_vm8, %v9123_v27, %v4268_v19  ;;  %v10556_v39 = vld [vmem:[#allocation5_spill] sm:$0xff]  ;;  %v10591_v43 = vld [vmem:[#allocation60_spill] sm:$0xff] }
 0x849   : > { %5291 = vmatpush.msk.msra.mxu0 %vm10048_vm14, %v3799_v15  ;;  %5300 = vmatpush.msk.msra.mxu1 %vm10535_vm3, %v3791_v16  ;;  %v10594_v16 = vld [vmem:[#allocation68_spill] sm:$0xff]  ;;  %v10595_v15 = vld [vmem:[#allocation57_spill] sm:$0xff] }
 0x84a   : > { %5333 = vmatpush.msk.msra.mxu2 %vm10058_vm1, %v8783_v4  ;;  %5342 = vmatpush.msk.msra.mxu3 %vm10060_vm15, %v8779_v21  ;;  %v4302_v21 = vsel %vm10539_vm6, %v4286_v6, %v4270_v36  ;;  %v4293_v4 = vsel %vm10543_vm5, %v4268_v19, %v9123_v27  ;;  %v10576_v19 = vld [vmem:[#allocation43_spill] sm:$0xff]  ;;  %vm10583_vm6 = vnez %v10582_v30  ;;  %v10596_v6 = vld [vmem:[#allocation58_spill] sm:$0xff] }
 0x84b   : > { %5292 = vmatpush.msk.msra.mxu0 %vm10048_vm14, %v9003_v40  ;;  %5301 = vmatpush.msk.msra.mxu1 %vm10535_vm3, %v8999_v10  ;;  %v10557_v40 = vld [vmem:[#allocation35_spill] sm:$0xff]  ;;  %v5308_v36 = vld [vmem:[%s9752_s7 + $0x8] sm:$0x7] }
 0x84c   : > { %5334 = vmatpush.msk.msra.mxu2 %vm10058_vm1, %v8739_v44  ;;  %5343 = vmatpush.msk.msra.mxu3 %vm10060_vm15, %v8735_v0  ;;  %v10541_v44 = vld [vmem:[#allocation18_spill] sm:$0xff]  ;;  %v10565_v10 = vld [vmem:[#allocation51_spill] sm:$0xff] }
 0x84d   : > { %5293 = vmatpush.msk.msra.mxu0 %vm10048_vm14, %v9061_v33  ;;  %5302 = vmatpush.msk.msra.mxu1 %vm10535_vm3, %v9056_v52  ;;  %vm10542_vm10 = vnez %v10541_v44  ;;  %v3985_v27 = vpop.permute.xlu1 %3984  ;;  %v10566_v52 = vld [vmem:[#allocation26_spill] sm:$0xff]  ;;  %v10642_v30 = vld [vmem:[#allocation23_spill] sm:$0xff] }
 0x84e   : > { %5335 = vmatpush.msk.msra.mxu2 %vm10058_vm1, %v8631_v58  ;;  %5344 = vmatpush.msk.msra.mxu3 %vm10060_vm15, %v8627_v54  ;;  %v9367_v54 = vpop.permute.xlu0 %4380  ;;  %v9381_v58 = vpop.permute.xlu2 %4610  ;;  %vm10545_vm15 = vcmp.lt.s32.totalorder %v10297_v51, 15  ;;  %v10567_v33 = vld [vmem:[#allocation78_spill] sm:$0xff] }
 0x84f   : > { %5294 = vmatpush.msk.msra.mxu0 %vm10048_vm14, %v8905_v41  ;;  %5303 = vmatpush.msk.msra.mxu1 %vm10535_vm3, %v8901_v46  ;;  %vm10546_vm1 = vmmov %vm10545_vm15  ;;  %v10555_v46 = vld [vmem:[#allocation6_spill] sm:$0xff]  ;;  %v10558_v41 = vld [vmem:[#allocation63_spill] sm:$0xff] }
 0x850   : > { %5366 = vmatpush.msk.msrb.mxu2 %vm10095_vm7, %v4294_v2  ;;  %5375 = vmatpush.msk.msrb.mxu3 %vm10542_vm10, %v4302_v21  ;;  %v10597_v2 = vld [vmem:[#allocation64_spill] sm:$0xff]  ;;  %v10600_v44 = vld [vmem:[#allocation34_spill] sm:$0xff] }
 0x851   : > { %5295 = vmatpush.msk.msra.mxu0 %vm10048_vm14, %v8747_v25  ;;  %5304 = vmatpush.msk.msra.mxu1 %vm10535_vm3, %v8743_v24  ;;  %v10549_v24 = vld [vmem:[#allocation12_spill] sm:$0xff]  ;;  %v10553_v25 = vld [vmem:[#allocation38_spill] sm:$0xff] }
 0x852   : > { %5367 = vmatpush.msk.msrb.mxu2 %vm10095_vm7, %v4293_v4  ;;  %5376 = vmatpush.msk.msrb.mxu3 %vm10542_vm10, %v4301_v62  ;;  %vm10550_vm0 = vnez %v10549_v24  ;;  %v10601_v4 = vld [vmem:[#allocation44_spill] sm:$0xff]  ;;  %v5365_v62 = vld [vmem:[%s9752_s7 + $0x14] sm:$0x7] }
 0x853   : > { %5296 = vmatpush.msk.msra.mxu0 %vm10048_vm14, %v8695_v9  ;;  %5305 = vmatpush.msk.msra.mxu1 %vm10535_vm3, %v8691_v48  ;;  %v4017_v9 = vsel %vm10546_vm1, %v9247_v8, %v3985_v27  ;;  %v10547_v48 = vld [vmem:[#allocation11_spill] sm:$0xff] }
 0x854   : > { %5368 = vmatpush.msk.msrb.mxu2 %vm10095_vm7, %v9144_v12  ;;  %5377 = vmatpush.msk.msrb.mxu3 %vm10542_vm10, %v9148_v22  ;;  %v4009_v12 = vsel %vm10545_vm15, %v3985_v27, %v9247_v8  ;;  %vm10548_vm2 = vnez %v10547_v48  ;;  %v10569_v22 = vld [vmem:[#allocation48_spill] sm:$0xff]  ;;  %v10604_v27 = vld [vmem:[#allocation54_spill] sm:$0xff]  ;;  %v10609_v48 = vld [vmem:[#allocation53_spill] sm:$0xff] }
 0x855   : > { %5297 = vmatpush.msk.msra.mxu0 %vm10048_vm14, %v8593_v18  ;;  %5306 = vmatpush.msk.msra.mxu1 %vm10535_vm3, %v8589_v47  ;;  %v10551_v47 = vld [vmem:[#allocation74_spill] sm:$0xff]  ;;  %v10552_v18 = vld [vmem:[#allocation73_spill] sm:$0xff]  ;;  %vm10559_vm14 = vcmp.lt.s32.totalorder %v10297_v51, 112  ;;  %v10578_v8 = vld [vmem:[#allocation32_spill] sm:$0xff]  ;;  %v4494_v17 = vpop.permute.xlu1 %4493 }
 0x856   : > { %5369 = vmatpush.msk.msrb.mxu2 %vm10095_vm7, %v8950_v7  ;;  %5378 = vmatpush.msk.msrb.mxu3 %vm10542_vm10, %v8954_v49  ;;  %vm10560_vm3 = vmmov %vm10559_vm14 }
 0x857   : > { %5309 = vmatpush.msk.msrb.mxu0 %vm10548_vm2, %v4017_v9  ;;  %5318 = vmatpush.msk.msrb.mxu1 %vm10550_vm0, %v4009_v12  ;;  %vm10598_vm5 = vmmov %vm10560_vm3  ;;  %v10605_v12 = vld [vmem:[#allocation25_spill] sm:$0xff] }
 0x858   : > { %5370 = vmatpush.msk.msrb.mxu2 %vm10095_vm7, %v8990_v53  ;;  %5379 = vmatpush.msk.msrb.mxu3 %vm10542_vm10, %v8995_v3  ;;  %v4509_v21 = vsel %vm10598_vm5, %v10597_v2, %v4494_v17  ;;  %vm10599_vm8 = vmmov %vm10560_vm3  ;;  %v10608_v9 = vld [vmem:[#allocation37_spill] sm:$0xff]  ;;  %v10627_v53 = vld [vmem:[#allocation75_spill] sm:$0xff]  ;;  %vm10638_vm5 = vcmp.lt.s32.totalorder %v10297_v51, 111 }
 0x859   : > { %5310 = vmatpush.msk.msrb.mxu0 %vm10548_vm2, %v9156_v55  ;;  %5319 = vmatpush.msk.msrb.mxu1 %vm10550_vm0, %v9152_v5  ;;  %v4508_v55 = vpop.permute.xlu0 %4507  ;;  %v10554_v5 = vld [vmem:[#allocation39_spill] sm:$0xff]  ;;  %v4517_v0 = vsel %vm10599_vm8, %v4494_v17, %v10597_v2  ;;  %v10628_v3 = vld [vmem:[#allocation76_spill] sm:$0xff] }
 0x85a   : > { %5371 = vmatpush.msk.msrb.mxu2 %vm10095_vm7, %v8848_v45  ;;  %5380 = vmatpush.msk.msrb.mxu3 %vm10542_vm10, %v8852_v60  ;;  %v5327_v45 = vld [vmem:[%s9752_s7 + $0xc] sm:$0x7]  ;;  %v4492_v60 = vpop.permute.xlu2 %4491  ;;  %v10648_v17 = vld [vmem:[#allocation72_spill] sm:$0xff] }
 0x85b   : > { %5311 = vmatpush.msk.msrb.mxu0 %vm10548_vm2, %v10551_v47  ;;  %5320 = vmatpush.msk.msrb.mxu1 %vm10550_vm0, %v10552_v18  ;;  %v4516_v7 = vsel %vm10559_vm14, %v4492_v60, %v4508_v55  ;;  %v4524_v49 = vsel %vm10560_vm3, %v4508_v55, %v4492_v60  ;;  %v10610_v47 = vld [vmem:[#allocation33_spill] sm:$0xff]  ;;  %v10611_v18 = vld [vmem:[#allocation36_spill] sm:$0xff]  ;;  %v5346_v55 = vld [vmem:[%s9752_s7 + $0x10] sm:$0x7] }
 0x85c   : > { %5372 = vmatpush.msk.msrb.mxu2 %vm10095_vm7, %v10553_v25  ;;  %5381 = vmatpush.msk.msrb.mxu3 %vm10542_vm10, %v10554_v5  ;;  %v10613_v5 = vld [vmem:[#allocation46_spill] sm:$0xff]  ;;  %v10617_v60 = vld [vmem:[#allocation21_spill] sm:$0xff] }
 0x85d   : > { %5312 = vmatpush.msk.msrb.mxu0 %vm10548_vm2, %v10555_v46  ;;  %5321 = vmatpush.msk.msrb.mxu1 %vm10550_vm0, %v10556_v39  ;;  %v4397_v24 = vpop.permute.xlu1 %4396  ;;  %v5403_v46 = vld [vmem:[%s9752_s7 + $0x1c] sm:$0x7]  ;;  %vm10618_vm3 = vnez %v10617_v60 }
 0x85e   : > { %5373 = vmatpush.msk.msrb.mxu2 %vm10095_vm7, %v10557_v40  ;;  %5382 = vmatpush.msk.msrb.mxu3 %vm10542_vm10, %v10558_v41  ;;  %vm10577_vm7 = vmmov %vm10562_vm12  ;;  %vm10586_vm10 = vnez %v10585_v29  ;;  %v10619_v40 = vld [vmem:[#allocation77_spill] sm:$0xff] }
 0x85f   : > { %5336 = vmatmul.msk.f32.vlgmr.msra.gmra.mxu2 %vm10561_vm13, %v5327_v45  ;;  %5345 = vmatmul.msk.f32.vlgmr.msra.gmra.mxu3 %vm10562_vm12, %v5327_v45  ;;  %vm10580_vm9 = vmmov %vm10577_vm7  ;;  %v10614_v45 = vld [vmem:[#allocation31_spill] sm:$0xff] }
 0x860   : > { %5404 = vmatpush.msk.msra.mxu2 %vm5984_vm4, %v4516_v7  ;;  %5413 = vmatpush.msk.msra.mxu3 %vm10131_vm11, %v4524_v49  ;;  %vm10602_vm15 = vmmov %vm10577_vm7  ;;  %v10621_v7 = vld [vmem:[#allocation22_spill] sm:$0xff] }
 0x861   : > { %5313 = vmatpush.msk.msrb.mxu0 %vm10548_vm2, %v10565_v10  ;;  %5322 = vmatpush.msk.msrb.mxu1 %vm10550_vm0, %v10566_v52  ;;  %vm10603_vm1 = vmmov %vm10577_vm7  ;;  %vm10622_vm12 = vnez %v10621_v7  ;;  %v4619_v49 = vpop.permute.xlu0 %4618  ;;  %v10629_v10 = vld [vmem:[#allocation3_spill] sm:$0xff]  ;;  %v10630_v52 = vld [vmem:[#allocation4_spill] sm:$0xff] }
 0x862   : > { %5405 = vmatpush.msk.msra.mxu2 %vm5984_vm4, %v10567_v33  ;;  %5414 = vmatpush.msk.msra.mxu3 %vm10131_vm11, %v10568_v63  ;;  %vm10616_vm14 = vmmov %vm10603_vm1  ;;  %v4603_v33 = vpop.permute.xlu2 %4602  ;;  %v10631_v63 = vld [vmem:[#allocation56_spill] sm:$0xff] }
 0x863   : > { %5314 = vmatpush.msk.msrb.mxu0 %vm10548_vm2, %v10569_v22  ;;  %5323 = vmatpush.msk.msrb.mxu1 %vm10550_vm0, %v10570_v26  ;;  %v10632_v22 = vld [vmem:[#allocation61_spill] sm:$0xff]  ;;  %v10633_v26 = vld [vmem:[#allocation66_spill] sm:$0xff]  ;;  %vm10640_vm8 = vmmov %vm10603_vm1 }
 0x864   : > { %5406 = vmatpush.msk.msra.mxu2 %vm5984_vm4, %v10571_v32  ;;  %5415 = vmatpush.msk.msra.mxu3 %vm10131_vm11, %v10572_v31  ;;  %v10634_v32 = vld [vmem:[#allocation59_spill] sm:$0xff]  ;;  %v10635_v31 = vld [vmem:[#allocation40_spill] sm:$0xff] }
 0x865   : > { %5315 = vmatpush.msk.msrb.mxu0 %vm10548_vm2, %v10573_v61  ;;  %5324 = vmatpush.msk.msrb.mxu1 %vm10550_vm0, %v10574_v59  ;;  %v10636_v61 = vld [vmem:[#allocation41_spill] sm:$0xff] }
 0x866   : > { %5407 = vmatpush.msk.msra.mxu2 %vm5984_vm4, %v10575_v11  ;;  %5416 = vmatpush.msk.msra.mxu3 %vm10131_vm11, %v10576_v19  ;;  %v10637_v11 = vld [vmem:[#allocation28_spill] sm:$0xff]  ;;  %v4627_v19 = vsel %vm10638_vm5, %v4603_v33, %v4619_v49 }
 0x867   : > { %5307 = vmatmul.msk.f32.vlgmr.msra.gmra.mxu1 %vm10577_vm7, %v3817_v23  ;;  %5316 = vmatpush.msk.msrb.mxu0 %vm10548_vm2, %v10578_v8  ;;  %vm10607_vm2 = vmmov %vm10603_vm1  ;;  %v10639_v8 = vld [vmem:[#allocation27_spill] sm:$0xff] }
 0x868   : > { %5325 = vmatpush.msk.msrb.mxu1 %vm10550_vm0, %v10579_v34  ;;  %5298 = vmatmul.msk.f32.vlgmr.msra.gmra.mxu0 %vm10580_vm9, %v3817_v23  ;;  %vm10623_vm7 = vmmov %vm10603_vm1  ;;  %v5384_v23 = vld [vmem:[%s9752_s7 + $0x18] sm:$0x7] }
 0x869   : > { %5347 = vmatpush.msk.msra.mxu0 %vm10583_vm6, %v10581_v38  ;;  %5408 = vmatpush.msk.msra.mxu2 %vm5984_vm4, %v10587_v1  ;;  %v4593_v59 = vpop.permute.xlu0 %4592  ;;  %v10646_v1 = vld [vmem:[#allocation80_spill] sm:$0xff] }
 0x86a   : > { %5356 = vmatpush.msk.msra.mxu1 %vm10586_vm10, %v10584_v42  ;;  %5417 = vmatpush.msk.msra.mxu3 %vm10131_vm11, %v10588_v20  ;;  %v10644_v42 = vld [vmem:[#allocation24_spill] sm:$0xff]  ;;  %v4591_v29 = vpop.permute.xlu2 %4590  ;;  %v10647_v20 = vld [vmem:[#allocation71_spill] sm:$0xff] }
 0x86b   : > { %5348 = vmatpush.msk.msra.mxu0 %vm10583_vm6, %v10589_v13  ;;  %5409 = vmatpush.msk.msra.mxu2 %vm5984_vm4, %v10591_v43 }
 0x86c   : > { %5357 = vmatpush.msk.msra.mxu1 %vm10586_vm10, %v10590_v35  ;;  %5418 = vmatpush.msk.msra.mxu3 %vm10131_vm11, %v10592_v57 }
 0x86d   : > { %5349 = vmatpush.msk.msra.mxu0 %vm10583_vm6, %v10593_v14  ;;  %5410 = vmatpush.msk.msra.mxu2 %vm5984_vm4, %v10595_v15 }
 0x86e   : > { %5358 = vmatpush.msk.msra.mxu1 %vm10586_vm10, %v10594_v16  ;;  %5419 = vmatpush.msk.msra.mxu3 %vm10131_vm11, %v10596_v6  ;;  %v5422_v16 = vld [vmem:[%s9752_s7 + $0x20] sm:$0x7] }
 0x86f   : > { %5350 = vmatpush.msk.msra.mxu0 %vm10583_vm6, %v10600_v44  ;;  %5411 = vmatpush.msk.msra.mxu2 %vm5984_vm4, %v4509_v21  ;;  %vm10606_vm4 = vmmov %vm10603_vm1 }
 0x870   : > { %5359 = vmatpush.msk.msra.mxu1 %vm10586_vm10, %v10601_v4  ;;  %5420 = vmatpush.msk.msra.mxu3 %vm10131_vm11, %v4517_v0  ;;  %vm10612_vm11 = vcmp.lt.s32.totalorder %v10297_v51, 113 }
 0x871   : > { %5326 = vmatmul.msk.f32.vlgmr.msrb.gmra.mxu1 %vm10602_vm15, %v5308_v36  ;;  %5317 = vmatmul.msk.f32.vlgmr.msrb.gmra.mxu0 %vm10603_vm1, %v5308_v36  ;;  %v4405_v25 = vsel %vm10612_vm11, %v9367_v54, %v4397_v24  ;;  %vm10615_vm0 = vmmov %vm10612_vm11  ;;  %v4607_v35 = vpop.permute.xlu0 %4606 }
 0x872   : > { %5351 = vmatpush.msk.msra.mxu0 %vm10583_vm6, %v10604_v27  ;;  %5360 = vmatpush.msk.msra.mxu1 %vm10586_vm10, %v10605_v12  ;;  %v4413_v39 = vsel %vm10615_vm0, %v4397_v24, %v9367_v54  ;;  %vm10620_vm13 = vmmov %vm10615_vm0 }
 0x873   : > { %5383 = vmatmul.msk.f32.vlgmr.msrb.gmra.mxu3 %vm10606_vm4, %v5365_v62  ;;  %5374 = vmatmul.msk.f32.vlgmr.msrb.gmra.mxu2 %vm10607_vm2, %v5365_v62  ;;  %v4404_v41 = vsel %vm10620_vm13, %v10619_v40, %v9257_v37  ;;  %vm10624_vm9 = vmmov %vm10615_vm0  ;;  %vm10643_vm4 = vnez %v10642_v30  ;;  %vm10645_vm2 = vnez %v10644_v42 }
 0x874   : > { %5352 = vmatpush.msk.msra.mxu0 %vm10583_vm6, %v10608_v9  ;;  %5361 = vmatpush.msk.msra.mxu1 %vm10586_vm10, %v10609_v48  ;;  %v4412_v54 = vsel %vm10624_vm9, %v9257_v37, %v10619_v40  ;;  %v4595_v37 = vpop.permute.xlu1 %4594  ;;  %vm10641_vm15 = vmmov %vm10638_vm5 }
 0x875   : > { %v4635_v34 = vsel %vm10641_vm15, %v4619_v49, %v4603_v33  ;;  %vm10649_vm11 = vmmov %vm10638_vm5 }
 0x876   : > { %5353 = vmatpush.msk.msra.mxu0 %vm10583_vm6, %v10610_v47  ;;  %5362 = vmatpush.msk.msra.mxu1 %vm10586_vm10, %v10611_v18  ;;  %v4623_v13 = vsel %vm10649_vm11, %v4595_v37, %v9381_v58  ;;  %vm10650_vm0 = vmmov %vm10638_vm5  ;;  %vm4712_vm5 = vcmask 1043456  }
 0x877   : > { %vm10653_vm13 = vmmov %vm10650_vm0 }
 0x878   : > { %5354 = vmatpush.msk.msra.mxu0 %vm10583_vm6, %v10613_v5  ;;  %5363 = vmatpush.msk.msra.mxu1 %vm10586_vm10, %v10614_v45  ;;  %vm10625_vm6 = vmmov %vm10603_vm1 }
 0x879   : > { %5364 = vmatmul.msk.f32.vlgmr.msra.gmra.mxu1 %vm10616_vm14, %v5346_v55  ;;  %5355 = vmatmul.msk.f32.vlgmr.msra.gmra.mxu0 %vm10623_vm7, %v5346_v55  ;;  %vm10626_vm10 = vmmov %vm10603_vm1 }
 0x87a   : > { %5385 = vmatpush.msk.msrb.mxu0 %vm10618_vm3, %v4405_v25  ;;  %5394 = vmatpush.msk.msrb.mxu1 %vm10622_vm12, %v4413_v39  ;;  %vm10651_vm14 = vmmov %vm10650_vm0 }
 0x87b   : > { %5412 = vmatmul.msk.f32.vlgmr.msra.gmra.mxu2 %vm10625_vm6, %v5403_v46  ;;  %5421 = vmatmul.msk.f32.vlgmr.msra.gmra.mxu3 %vm10626_vm10, %v5403_v46  ;;  %vm10655_vm7 = vmmov %vm10650_vm0 }
 0x87c   : > { %5386 = vmatpush.msk.msrb.mxu0 %vm10618_vm3, %v4404_v41  ;;  %5395 = vmatpush.msk.msrb.mxu1 %vm10622_vm12, %v4412_v54  ;;  %v4609_v38 = vpop.permute.xlu1 %4608  ;;  %vm10656_vm9 = vmmov %vm10650_vm0 }
 0x87d   : > { %v4622_v43 = vsel %vm10651_vm14, %v4593_v59, %v4609_v38  ;;  %vm10657_vm6 = vmmov %vm10603_vm1 }
 0x87e   : > { %5387 = vmatpush.msk.msrb.mxu0 %vm10618_vm3, %v10627_v53  ;;  %5396 = vmatpush.msk.msrb.mxu1 %vm10622_vm12, %v10628_v3  ;;  %vm10658_vm10 = vmmov %vm10603_vm1 }
 0x880   : > { %5388 = vmatpush.msk.msrb.mxu0 %vm10618_vm3, %v10629_v10  ;;  %5397 = vmatpush.msk.msrb.mxu1 %vm10622_vm12, %v10630_v52 }
 0x882   : > { %5389 = vmatpush.msk.msrb.mxu0 %vm10618_vm3, %v10631_v63  ;;  %5398 = vmatpush.msk.msrb.mxu1 %vm10622_vm12, %v10632_v22  ;;  %v4703_v22 = vpop.permute.xlu0 %4702 }
 0x884   : > { %5390 = vmatpush.msk.msrb.mxu0 %vm10618_vm3, %v10633_v26  ;;  %5399 = vmatpush.msk.msrb.mxu1 %vm10622_vm12, %v10634_v32  ;;  %v4589_v57 = vpop.permute.xlu1 %4588 }
 0x886   : > { %5391 = vmatpush.msk.msrb.mxu0 %vm10618_vm3, %v10635_v31  ;;  %5400 = vmatpush.msk.msrb.mxu1 %vm10622_vm12, %v10636_v61 }
 0x888   : > { %5392 = vmatpush.msk.msrb.mxu0 %vm10618_vm3, %v10637_v11  ;;  %5401 = vmatpush.msk.msrb.mxu1 %vm10622_vm12, %v10639_v8  ;;  %vm10652_vm3 = vmmov %vm10650_vm0 }
 0x889   : > { %5393 = vmatmul.msk.f32.vlgmr.msrb.gmra.mxu0 %vm10640_vm8, %v5384_v23  ;;  %5402 = vmatmul.msk.f32.vlgmr.msrb.gmra.mxu1 %vm10603_vm1, %v5384_v23  ;;  %vm10654_vm12 = vmmov %vm10650_vm0 }
 0x88a   : > { %5423 = vmatpush.msk.msra.mxu0 %vm10643_vm4, %v4627_v19  ;;  %5432 = vmatpush.msk.msra.mxu1 %vm10645_vm2, %v4635_v34  ;;  %v4629_v14 = vsel %vm10654_vm12, %v4607_v35, %v4591_v29 }
 0x88c   : > { %5424 = vmatpush.msk.msra.mxu0 %vm10643_vm4, %v10646_v1  ;;  %5433 = vmatpush.msk.msra.mxu1 %vm10645_vm2, %v9184_v56  ;;  %v4631_v56 = vsel %vm10650_vm0, %v9381_v58, %v4595_v37  ;;  %v4605_v58 = vpop.permute.xlu2 %4604 }
 0x88d   : > { %v4620_v15 = vsel %vm10655_vm7, %v4589_v57, %v4605_v58  ;;  %v4628_v6 = vsel %vm10656_vm9, %v4605_v58, %v4589_v57 }
 0x88e   : > { %5425 = vmatpush.msk.msra.mxu0 %vm10643_vm4, %v10647_v20  ;;  %5434 = vmatpush.msk.msra.mxu1 %vm10645_vm2, %v10648_v17 }
 0x890   : > { %5426 = vmatpush.msk.msra.mxu0 %vm10643_vm4, %v9220_v50  ;;  %5435 = vmatpush.msk.msra.mxu1 %vm10645_vm2, %v9224_v28  ;;  %v4630_v50 = vsel %vm10652_vm3, %v4609_v38, %v4593_v59  ;;  %v4621_v28 = vsel %vm10653_vm13, %v4591_v29, %v4607_v35 }
 0x892   : > { %5427 = vmatpush.msk.msra.mxu0 %vm10643_vm4, %v4623_v13  ;;  %5436 = vmatpush.msk.msra.mxu1 %vm10645_vm2, %v4631_v56 }
 0x894   : > { %5428 = vmatpush.msk.msra.mxu0 %vm10643_vm4, %v4622_v43  ;;  %5437 = vmatpush.msk.msra.mxu1 %vm10645_vm2, %v4630_v50 }
 0x896   : > { %5429 = vmatpush.msk.msra.mxu0 %vm10643_vm4, %v4621_v28  ;;  %5438 = vmatpush.msk.msra.mxu1 %vm10645_vm2, %v4629_v14 }
 0x898   : > { %5430 = vmatpush.msk.msra.mxu0 %vm10643_vm4, %v4620_v15  ;;  %5439 = vmatpush.msk.msra.mxu1 %vm10645_vm2, %v4628_v6 }
 0x899   : > { %5431 = vmatmul.msk.f32.vlgmr.msra.gmra.mxu0 %vm10657_vm6, %v5422_v16  ;;  %5440 = vmatmul.msk.f32.vlgmr.msra.gmra.mxu1 %vm10658_vm10, %v5422_v16 }
 0x8b4   : > { %v3904_v36 = vpop.f32.mrf.mxu0  ;;  %v3924_v2 = vpop.f32.mrf.mxu1 }
 0x8e2   : > { %v4167_v62 = vpop.f32.mrf.mxu2  ;;  %v4187_v51 = vpop.f32.mrf.mxu3 }
 0x8e4   : > { %v3967_v0 = vpop.f32.mrf.mxu1 }
 0x8e5   : > { %v3947_v21 = vpop.f32.mrf.mxu0  ;;  %v3968_v12 = vadd.f32 %v3967_v0, %v3924_v2 }
 0x8e6   : > { %v3948_v27 = vadd.f32 %v3947_v21, %v3904_v36 }
 0x8ee   : > { %v4056_v44 = vpop.f32.mrf.mxu0  ;;  %v4076_v4 = vpop.f32.mrf.mxu1 }
 0x8ef   : > { %v4079_v9 = vadd.f32 %v4056_v44, %v3948_v27  ;;  %v4080_v48 = vadd.f32 %v4076_v4, %v3968_v12 }
 0x8f1   : > { %v4190_v18 = vadd.f32 %v4167_v62, %v4079_v9  ;;  %v4191_v55 = vadd.f32 %v4187_v51, %v4080_v48 }
 0x8f6   : > { %v4230_v24 = vpop.f32.mrf.mxu0  ;;  %v4250_v47 = vpop.f32.mrf.mxu1 }
 0x8f7   : > { %v4341_v25 = vpop.f32.mrf.mxu2  ;;  %v4253_v5 = vadd.f32 %v4230_v24, %v4190_v18  ;;  %v4361_v45 = vpop.f32.mrf.mxu3  ;;  %v4254_v46 = vadd.f32 %v4250_v47, %v4191_v55 }
 0x8f9   : > { %v4364_v60 = vadd.f32 %v4341_v25, %v4253_v5  ;;  %v4365_v41 = vadd.f32 %v4361_v45, %v4254_v46 }
 0x8ff   : > { %v4563_v49 = vpop.f32.mrf.mxu2  ;;  %v4583_v53 = vpop.f32.mrf.mxu3 }
 0x906   : > { %v4452_v39 = vpop.f32.mrf.mxu0  ;;  %v4472_v40 = vpop.f32.mrf.mxu1 }
 0x907   : > { %v4475_v7 = vadd.f32 %v4452_v39, %v4364_v60  ;;  %v4476_v54 = vadd.f32 %v4472_v40, %v4365_v41 }
 0x909   : > { %v4586_v3 = vadd.f32 %v4563_v49, %v4475_v7  ;;  %v4587_v37 = vadd.f32 %v4583_v53, %v4476_v54 }
 0x916   : > { %v4674_v10 = vpop.f32.mrf.mxu0  ;;  %v4694_v33 = vpop.f32.mrf.mxu1 }
 0x917   : > { %v4697_v52 = vadd.f32 %v4674_v10, %v4586_v3  ;;  %v4698_v63 = vadd.f32 %v4694_v33, %v4587_v37 }
 0x919   : > { %v4705_v26 = vadd.f32 %v4703_v22, %v4697_v52  ;;  %v4706_v32 = vadd.f32 %v4703_v22, %v4698_v63 }
 0x91b   : > { %v4708_v31 = vmax.f32 %v4706_v32, 0.0  ;;  %v4707_v23 = vmax.f32 %v4705_v26, 0.0 }
 0x91d   : > { %v4711_v61 = vrot.slane %v4708_v31, 4 }
 0x91f   : > { %v4713_v59 = vsel %vm4712_vm5, %v4707_v23, %v4711_v61 }
 0x920   : > { %4715 = vst [vmem:[%s334_s20] sm:$0x77] %v4713_v59 }
 0x921 PF: > { %s19_s30 = sadd.s32 1, %s5631_s30  }
 0x922   : > { %p16_p4 = scmp.ge.s32.totalorder %s19_s30, 4  }
 0x924   :  { %18 = sbr.rel (!%p16_p4) target bundleno = 1 (0x1), region = 113 }

</bundles_post_ra>
